<compile_context>
chip_gen: v7x
topology: tpu7x:2x2x1
jax: 0.10.0
libtpu: 0.0.40
codegen_flags: <defaults>
</compile_context>

<pallas_src>
import functools

import jax
import jax.numpy as jnp
import numpy as np
from jax.experimental import pallas as pl
from jax.experimental.pallas import tpu as pltpu

LANE = 128


def _round_up(n, m):
    return ((n + m - 1) // m) * m


# ----------------------------------------------------------------------------
# Fused kernel: NB batch rows per grid step ("parallel" -> megacore sharding).
# ----------------------------------------------------------------------------
def xvector_fused_kernel(x_ref, w0_ref, wr_ref, bc_ref, w1m_ref, w1s_ref,
                         b1_ref, w2_ref, b2_ref, o_ref,
                         buf_ref, mean_ref, std_ref, *, tt):
    # x_ref  : (NB, T, Cp) bf16         w0_ref : (K, Cp, Hp) bf16
    # wr_ref : (L-1, K, Hp, Hp) bf16    bc_ref : (L, 1, Hp) f32
    # w1m/w1s: (Hp, Ep) bf16            b1/b2  : (1, Ep) f32
    # w2_ref : (Ep, Ep) bf16            o_ref  : (1, NB, Ep) f32
    # buf_ref: (T, Hp) bf16 scratch -- layer activations, reused in place and
    #          across batch rows (rows are processed sequentially).
    # mean_ref / std_ref: (NB, Hp) f32 scratch -- stacked pooled stats for fc1.
    f32 = jnp.float32
    K = w0_ref.shape[0]
    L = bc_ref.shape[0]
    NB, T, _ = x_ref.shape
    Hp = buf_ref.shape[1]

    for b in range(NB):
        t_in = T
        for layer in range(L):
            t_out = t_in - (K - 1)
            bias = bc_ref[layer]                          # (1, Hp) f32
            last = layer == L - 1
            if last:
                s1 = jnp.zeros((1, Hp), f32)
                s2 = jnp.zeros((1, Hp), f32)

            # Time tiles: full tiles of `tt` rows (multiple of 8 -> unmasked
            # stores) plus one tail tile for the shrinking t_out.
            n_full, rem = divmod(t_out, tt)
            tiles = [(i * tt, tt) for i in range(n_full)]
            if rem:
                tiles.append((n_full * tt, rem))

            for t0, h in tiles:
                # K-tap Conv1d (valid, dilation=1) as a chained accumulation of
                # bf16 matmuls held in a traced f32 value (no scratch RMW);
                # every LHS is a Ref slice (no materialized shifted copies).
                if layer == 0:
                    acc = jnp.dot(x_ref[b, t0:t0 + h, :], w0_ref[0],
                                  preferred_element_type=f32)
                    for k in range(1, K):
                        acc = acc + jnp.dot(x_ref[b, t0 + k:t0 + k + h, :],
                                            w0_ref[k],
                                            preferred_element_type=f32)
                else:
                    acc = jnp.dot(buf_ref[t0:t0 + h, :], wr_ref[layer - 1, 0],
                                  preferred_element_type=f32)
                    for k in range(1, K):
                        acc = acc + jnp.dot(buf_ref[t0 + k:t0 + k + h, :],
                                            wr_ref[layer - 1, k],
                                            preferred_element_type=f32)

                act = jnp.maximum(acc + bias, 0.0)        # bias + ReLU, f32
                if not last:
                    buf_ref[t0:t0 + h, :] = act.astype(buf_ref.dtype)
                else:
                    # Fused statistics pooling: accumulate sum / sum-of-squares
                    # on the fly -- no second pass over the activations.
                    s1 = s1 + jnp.sum(act, axis=0, keepdims=True)
                    s2 = s2 + jnp.sum(act * act, axis=0, keepdims=True)

            if last:
                # TODO(synk): StatisticsPooling source not provided; standard
                # x-vector pooling assumed: mean ++ unbiased std (torch.std),
                # no eps / train-time noise.
                n = float(t_out)
                mean = s1 * (1.0 / n)
                var = (s2 - n * mean * mean) * (1.0 / (n - 1.0))
                std = jnp.sqrt(jnp.maximum(var, 0.0))
                mean_ref[b:b + 1, :] = mean
                std_ref[b:b + 1, :] = std
            t_in = t_out

    # fc1 (split into mean/std halves -> no in-kernel concat) + ReLU, then fc2,
    # with all NB rows stacked so the MXU sees M = NB instead of M = 1.
    bf16 = w1m_ref.dtype
    h1 = jnp.dot(mean_ref[...].astype(bf16), w1m_ref[...],
                 preferred_element_type=jnp.float32)
    h1 = h1 + jnp.dot(std_ref[...].astype(bf16), w1s_ref[...],
                      preferred_element_type=jnp.float32)
    h1 = jnp.maximum(h1 + b1_ref[...], 0.0)
    out = jnp.dot(h1.astype(bf16), w2_ref[...],
                  preferred_element_type=jnp.float32) + b2_ref[...]
    o_ref[0] = out                                        # (NB, Ep) f32


# ----------------------------------------------------------------------------
# Wrapper: padding, BlockSpecs, grid, per-generation VMEM limit.
# ----------------------------------------------------------------------------
def _vmem_limit_bytes():
    """~85% of this chip's per-core VMEM, capped at 112 MiB (v5e/v6e -> ~108 MiB,
    v7x 64 MiB/TC -> ~54 MiB).  Conservative fallback if the query fails."""
    try:
        cap = pltpu.get_tpu_info().vmem_capacity_bytes
    except Exception:
        cap = 64 * 1024 * 1024
    return min(int(cap * 0.85), 112 * 1024 * 1024)


def xvector_forward(x, p, *, emb_size, batch_block=2, time_tile=128):
    """x: (B, T, input_size) f32 -- the same tensor the PyTorch module gets
    (its internal transpose(1, 2) is absorbed by the channels-last layout)."""
    B, T, F = x.shape
    K, Cp, Hp = p["w0"].shape
    L = p["bc"].shape[0]
    Ep = p["w2"].shape[1]
    NB = batch_block
    assert time_tile % 8 == 0, "time_tile must be a multiple of 8 (sublanes)"
    t_final = T - (K - 1) * L
    if t_final < 2:
        raise ValueError(
            f"sequence too short for {L} valid convs with kernel_size={K}: "
            f"need T >= {(K - 1) * L + 2}, got T={T}")

    # Zero-pad features to the 128-lane width, pad batch to a multiple of the
    # batch block and cast to bf16 for the MXU.  Padding is exact: padded
    # channels / rows carry zeros all the way through (and padded batch rows
    # are sliced away at the end).
    B_pad = _round_up(B, NB)
    x_p = jnp.zeros((B_pad, T, Cp), jnp.bfloat16).at[:B, :, :F].set(
        x.astype(jnp.bfloat16))
    n_blk = B_pad // NB

    # Constant-index weight operands stay VMEM-resident across grid steps;
    # single-buffer them (a second pipeline buffer is pure VMEM waste).
    single = dict(pipeline_mode=pl.Buffered(buffer_count=1))

    out = pl.pallas_call(
        functools.partial(xvector_fused_kernel, tt=time_tile),
        out_shape=jax.ShapeDtypeStruct((n_blk, NB, Ep), jnp.float32),
        grid=(n_blk,),
        in_specs=[
            pl.BlockSpec((NB, T, Cp), lambda i: (i, 0, 0)),                 # x rows
            pl.BlockSpec((K, Cp, Hp), lambda i: (0, 0, 0), **single),       # conv layer 0
            pl.BlockSpec(p["wr"].shape, lambda i: (0, 0, 0, 0), **single),  # conv layers 1..L-1
            pl.BlockSpec((L, 1, Hp), lambda i: (0, 0, 0)),                  # conv biases
            pl.BlockSpec((Hp, Ep), lambda i: (0, 0), **single),             # fc1 (mean half)
            pl.BlockSpec((Hp, Ep), lambda i: (0, 0), **single),             # fc1 (std half)
            pl.BlockSpec((1, Ep), lambda i: (0, 0)),                        # fc1 bias
            pl.BlockSpec((Ep, Ep), lambda i: (0, 0), **single),             # fc2 weight
            pl.BlockSpec((1, Ep), lambda i: (0, 0)),                        # fc2 bias
        ],
        out_specs=pl.BlockSpec((1, NB, Ep), lambda i: (i, 0, 0)),
        scratch_shapes=[
            pltpu.VMEM((T, Hp), jnp.bfloat16),   # layer activations (in place)
            pltpu.VMEM((NB, Hp), jnp.float32),   # stacked pooled means
            pltpu.VMEM((NB, Hp), jnp.float32),   # stacked pooled stds
        ],
        compiler_params=pltpu.CompilerParams(
            dimension_semantics=("parallel",),        # megacore over batch blocks
            vmem_limit_bytes=_vmem_limit_bytes()),
    )(x_p, p["w0"], p["wr"], p["bc"], p["w1m"], p["w1s"],
      p["b1"], p["w2"], p["b2"])
    return out.reshape(B_pad, Ep)[:B, :emb_size]


# ----------------------------------------------------------------------------
# Parameter construction (logical, PyTorch-equivalent) + packing (pad + bf16).
# ----------------------------------------------------------------------------
def init_params(key, input_size, num_layers, hidden_size, embedding_size,
                kernel_size=5):
    params = {"tdnn": []}
    in_ch = input_size
    keys = jax.random.split(key, 2 * num_layers + 4)
    ki, scale = 0, 0.1
    for _ in range(num_layers):
        # PyTorch Conv1d weight is (C_out, C_in, K); stored here as (K, C_in, C_out).
        w = scale * jax.random.normal(
            keys[ki], (kernel_size, in_ch, hidden_size), jnp.float32); ki += 1
        b = scale * jax.random.normal(
            keys[ki], (1, hidden_size), jnp.float32); ki += 1
        params["tdnn"].append((w, b))
        in_ch = hidden_size
    # PyTorch Linear weight is (out, in); stored here as its transpose (in, out).
    params["w1"] = scale * jax.random.normal(
        keys[ki], (2 * hidden_size, embedding_size), jnp.float32); ki += 1
    params["b1"] = scale * jax.random.normal(
        keys[ki], (1, embedding_size), jnp.float32); ki += 1
    params["w2"] = scale * jax.random.normal(
        keys[ki], (embedding_size, embedding_size), jnp.float32); ki += 1
    params["b2"] = scale * jax.random.normal(
        keys[ki], (1, embedding_size), jnp.float32); ki += 1
    return params


def pack_params(params, lane=LANE):
    """Zero-pad channel dims to multiples of 128 lanes, cast matmul weights to
    bf16 and stack per-layer conv weights/biases (padding is exact: padded
    channels compute exactly 0 through every layer)."""
    tdnn = params["tdnn"]
    L = len(tdnn)
    K, c_in, H = tdnn[0][0].shape
    E = params["w2"].shape[1]
    Cp, Hp, Ep = _round_up(c_in, lane), _round_up(H, lane), _round_up(E, lane)

    w0 = jnp.zeros((K, Cp, Hp), jnp.float32).at[:, :c_in, :H].set(tdnn[0][0])
    wr = jnp.zeros((max(L - 1, 1), K, Hp, Hp), jnp.float32)
    for l in range(1, L):
        wr = wr.at[l - 1, :, :H, :H].set(tdnn[l][0])
    bc = jnp.zeros((L, 1, Hp), jnp.float32)
    for l in range(L):
        bc = bc.at[l, 0, :H].set(tdnn[l][1][0])

    w1, w2 = params["w1"], params["w2"]
    w1m = jnp.zeros((Hp, Ep), jnp.float32).at[:H, :E].set(w1[:H])   # mean half
    w1s = jnp.zeros((Hp, Ep), jnp.float32).at[:H, :E].set(w1[H:])   # std half
    b1 = jnp.zeros((1, Ep), jnp.float32).at[:, :E].set(params["b1"])
    w2p = jnp.zeros((Ep, Ep), jnp.float32).at[:E, :E].set(w2)
    b2 = jnp.zeros((1, Ep), jnp.float32).at[:, :E].set(params["b2"])

    bf16 = jnp.bfloat16
    return {"w0": w0.astype(bf16), "wr": wr.astype(bf16), "bc": bc,
            "w1m": w1m.astype(bf16), "w1s": w1s.astype(bf16), "b1": b1,
            "w2": w2p.astype(bf16), "b2": b2}


def xvector_reference(x, params):
    """Pure-JAX f32 reference mirroring the PyTorch forward."""
    h = x
    for w, b in params["tdnn"]:
        K = w.shape[0]
        t_out = h.shape[1] - (K - 1)
        h = jax.nn.relu(
            sum(h[:, k:k + t_out, :] @ w[k] for k in range(K)) + b)
    mean = h.mean(axis=1)
    std = jnp.sqrt(h.var(axis=1, ddof=1))
    stats = jnp.concatenate([mean, std], axis=1)
    h1 = jax.nn.relu(stats @ params["w1"] + params["b1"])
    return h1 @ params["w2"] + params["b2"]


if __name__ == "__main__":
    # Small, forward-consistent shapes: 5 valid convs with k=5 need T >= 22.
    # B=4 with batch_block=2 -> grid=(2,): even, so both v7x TCs get work.
    B, T, FEAT = 4, 32, 8
    NUM_LAYERS, HIDDEN, EMB = 5, 32, 32

    key = jax.random.PRNGKey(0)
    k_params, k_x = jax.random.split(key)
    params = init_params(k_params, FEAT, NUM_LAYERS, HIDDEN, EMB)
    packed = pack_params(params)
    x = jax.random.normal(k_x, (B, T, FEAT), jnp.float32)

    fwd = jax.jit(functools.partial(xvector_forward, emb_size=EMB,
                                    batch_block=2, time_tile=128))
    out = fwd(x, packed)
    jax.block_until_ready(out)
    assert out.shape == (B, EMB), out.shape

    # Numerical check vs. the pure-JAX f32 reference (bf16-MXU tolerance).
    ref = xvector_reference(x, params)
    np.testing.assert_allclose(np.asarray(out, np.float32),
                               np.asarray(ref, np.float32),
                               rtol=1.5e-1, atol=5e-2)
    print("KERNEL_OK")
</pallas_src>

<mosaic_0001>
module attributes {stable_mosaic.version = 11 : i64} {
  func.func @xvector_fused_kernel(%arg0: i32, %arg1: memref<2x32x128xbf16, #tpu.memory_space<vmem>>, %arg2: memref<5x128x128xbf16, #tpu.memory_space<vmem>>, %arg3: memref<4x5x128x128xbf16, #tpu.memory_space<vmem>>, %arg4: memref<5x1x128xf32, #tpu.memory_space<vmem>>, %arg5: memref<128x128xbf16, #tpu.memory_space<vmem>>, %arg6: memref<128x128xbf16, #tpu.memory_space<vmem>>, %arg7: memref<1x128xf32, #tpu.memory_space<vmem>>, %arg8: memref<128x128xbf16, #tpu.memory_space<vmem>>, %arg9: memref<1x128xf32, #tpu.memory_space<vmem>>, %arg10: memref<1x2x128xf32, #tpu.memory_space<vmem>>, %arg11: memref<32x128xbf16, #tpu.memory_space<vmem>>, %arg12: memref<2x128xf32, #tpu.memory_space<vmem>>, %arg13: memref<2x128xf32, #tpu.memory_space<vmem>>) attributes {dimension_semantics = [#tpu.dimension_semantics<parallel>], iteration_bounds = array<i64: 2>, scalar_prefetch = 0 : i64, scratch_operands = 3 : i64, tpu.core_type = #tpu.core_type<tc>, window_params = [{transform_indices = @transform_0, window_bounds = array<i64: 2, 32, 128>}, {pipeline_mode = #tpu.pipeline_mode<synchronous>, transform_indices = @transform_1, window_bounds = array<i64: 5, 128, 128>}, {pipeline_mode = #tpu.pipeline_mode<synchronous>, transform_indices = @transform_2, window_bounds = array<i64: 4, 5, 128, 128>}, {pipeline_mode = #tpu.pipeline_mode<synchronous>, transform_indices = @transform_3, window_bounds = array<i64: 5, 1, 128>}, {pipeline_mode = #tpu.pipeline_mode<synchronous>, transform_indices = @transform_4, window_bounds = array<i64: 128, 128>}, {pipeline_mode = #tpu.pipeline_mode<synchronous>, transform_indices = @transform_5, window_bounds = array<i64: 128, 128>}, {pipeline_mode = #tpu.pipeline_mode<synchronous>, transform_indices = @transform_6, window_bounds = array<i64: 1, 128>}, {pipeline_mode = #tpu.pipeline_mode<synchronous>, transform_indices = @transform_7, window_bounds = array<i64: 128, 128>}, {pipeline_mode = #tpu.pipeline_mode<synchronous>, transform_indices = @transform_8, window_bounds = array<i64: 1, 128>}, {transform_indices = @transform_9, window_bounds = array<i64: 1, 2, 128>}]} {
    %c0 = arith.constant 0 : index
    %c0_0 = arith.constant 0 : index
    %c0_1 = arith.constant 0 : index
    %0 = vector.load %arg4[%c0, %c0_0, %c0_1] : memref<5x1x128xf32, #tpu.memory_space<vmem>>, vector<1x1x128xf32>
    %1 = vector.shape_cast %0 : vector<1x1x128xf32> to vector<1x128xf32>
    %c0_2 = arith.constant 0 : index
    %c0_3 = arith.constant 0 : index
    %c0_4 = arith.constant 0 : index
    %2 = vector.load %arg1[%c0_2, %c0_3, %c0_4] : memref<2x32x128xbf16, #tpu.memory_space<vmem>>, vector<1x28x128xbf16>
    %3 = vector.shape_cast %2 : vector<1x28x128xbf16> to vector<28x128xbf16>
    %c0_5 = arith.constant 0 : index
    %c0_6 = arith.constant 0 : index
    %c0_7 = arith.constant 0 : index
    %4 = vector.load %arg2[%c0_5, %c0_6, %c0_7] : memref<5x128x128xbf16, #tpu.memory_space<vmem>>, vector<1x128x128xbf16>
    %5 = vector.shape_cast %4 : vector<1x128x128xbf16> to vector<128x128xbf16>
    %cst = arith.constant dense<0.000000e+00> : vector<28x128xf32>
    %6 = tpu.matmul %3, %5, %cst {dimension_numbers = #tpu.dot_dimension_numbers<[1], [0], [0], [1], [0, 0, 1, 1], [], []>} : vector<28x128xbf16>, vector<128x128xbf16>, vector<28x128xf32> -> vector<28x128xf32>
    %c0_8 = arith.constant 0 : index
    %c1 = arith.constant 1 : index
    %c0_9 = arith.constant 0 : index
    %7 = vector.load %arg1[%c0_8, %c1, %c0_9] : memref<2x32x128xbf16, #tpu.memory_space<vmem>>, vector<1x28x128xbf16>
    %8 = vector.shape_cast %7 : vector<1x28x128xbf16> to vector<28x128xbf16>
    %c1_10 = arith.constant 1 : index
    %c0_11 = arith.constant 0 : index
    %c0_12 = arith.constant 0 : index
    %9 = vector.load %arg2[%c1_10, %c0_11, %c0_12] : memref<5x128x128xbf16, #tpu.memory_space<vmem>>, vector<1x128x128xbf16>
    %10 = vector.shape_cast %9 : vector<1x128x128xbf16> to vector<128x128xbf16>
    %cst_13 = arith.constant dense<0.000000e+00> : vector<28x128xf32>
    %11 = tpu.matmul %8, %10, %cst_13 {dimension_numbers = #tpu.dot_dimension_numbers<[1], [0], [0], [1], [0, 0, 1, 1], [], []>} : vector<28x128xbf16>, vector<128x128xbf16>, vector<28x128xf32> -> vector<28x128xf32>
    %12 = arith.addf %6, %11 : vector<28x128xf32>
    %c0_14 = arith.constant 0 : index
    %c2 = arith.constant 2 : index
    %c0_15 = arith.constant 0 : index
    %13 = vector.load %arg1[%c0_14, %c2, %c0_15] : memref<2x32x128xbf16, #tpu.memory_space<vmem>>, vector<1x28x128xbf16>
    %14 = vector.shape_cast %13 : vector<1x28x128xbf16> to vector<28x128xbf16>
    %c2_16 = arith.constant 2 : index
    %c0_17 = arith.constant 0 : index
    %c0_18 = arith.constant 0 : index
    %15 = vector.load %arg2[%c2_16, %c0_17, %c0_18] : memref<5x128x128xbf16, #tpu.memory_space<vmem>>, vector<1x128x128xbf16>
    %16 = vector.shape_cast %15 : vector<1x128x128xbf16> to vector<128x128xbf16>
    %cst_19 = arith.constant dense<0.000000e+00> : vector<28x128xf32>
    %17 = tpu.matmul %14, %16, %cst_19 {dimension_numbers = #tpu.dot_dimension_numbers<[1], [0], [0], [1], [0, 0, 1, 1], [], []>} : vector<28x128xbf16>, vector<128x128xbf16>, vector<28x128xf32> -> vector<28x128xf32>
    %18 = arith.addf %12, %17 : vector<28x128xf32>
    %c0_20 = arith.constant 0 : index
    %c3 = arith.constant 3 : index
    %c0_21 = arith.constant 0 : index
    %19 = vector.load %arg1[%c0_20, %c3, %c0_21] : memref<2x32x128xbf16, #tpu.memory_space<vmem>>, vector<1x28x128xbf16>
    %20 = vector.shape_cast %19 : vector<1x28x128xbf16> to vector<28x128xbf16>
    %c3_22 = arith.constant 3 : index
    %c0_23 = arith.constant 0 : index
    %c0_24 = arith.constant 0 : index
    %21 = vector.load %arg2[%c3_22, %c0_23, %c0_24] : memref<5x128x128xbf16, #tpu.memory_space<vmem>>, vector<1x128x128xbf16>
    %22 = vector.shape_cast %21 : vector<1x128x128xbf16> to vector<128x128xbf16>
    %cst_25 = arith.constant dense<0.000000e+00> : vector<28x128xf32>
    %23 = tpu.matmul %20, %22, %cst_25 {dimension_numbers = #tpu.dot_dimension_numbers<[1], [0], [0], [1], [0, 0, 1, 1], [], []>} : vector<28x128xbf16>, vector<128x128xbf16>, vector<28x128xf32> -> vector<28x128xf32>
    %24 = arith.addf %18, %23 : vector<28x128xf32>
    %c0_26 = arith.constant 0 : index
    %c4 = arith.constant 4 : index
    %c0_27 = arith.constant 0 : index
    %25 = vector.load %arg1[%c0_26, %c4, %c0_27] : memref<2x32x128xbf16, #tpu.memory_space<vmem>>, vector<1x28x128xbf16>
    %26 = vector.shape_cast %25 : vector<1x28x128xbf16> to vector<28x128xbf16>
    %c4_28 = arith.constant 4 : index
    %c0_29 = arith.constant 0 : index
    %c0_30 = arith.constant 0 : index
    %27 = vector.load %arg2[%c4_28, %c0_29, %c0_30] : memref<5x128x128xbf16, #tpu.memory_space<vmem>>, vector<1x128x128xbf16>
    %28 = vector.shape_cast %27 : vector<1x128x128xbf16> to vector<128x128xbf16>
    %cst_31 = arith.constant dense<0.000000e+00> : vector<28x128xf32>
    %29 = tpu.matmul %26, %28, %cst_31 {dimension_numbers = #tpu.dot_dimension_numbers<[1], [0], [0], [1], [0, 0, 1, 1], [], []>} : vector<28x128xbf16>, vector<128x128xbf16>, vector<28x128xf32> -> vector<28x128xf32>
    %30 = arith.addf %24, %29 : vector<28x128xf32>
    %31 = vector.broadcast %1 : vector<1x128xf32> to vector<28x128xf32>
    %32 = arith.addf %30, %31 : vector<28x128xf32>
    %cst_32 = arith.constant 0.000000e+00 : f32
    %33 = vector.broadcast %cst_32 : f32 to vector<28x128xf32>
    %34 = arith.maximumf %32, %33 : vector<28x128xf32>
    %35 = arith.truncf %34 : vector<28x128xf32> to vector<28x128xbf16>
    %c0_33 = arith.constant 0 : index
    %c0_34 = arith.constant 0 : index
    %36 = vector.load %arg11[%c0_33, %c0_34] : memref<32x128xbf16, #tpu.memory_space<vmem>>, vector<28x128xbf16>
    tpu.vector_store %arg11[%c0_33, %c0_34], %35 {strides = array<i32>} : memref<32x128xbf16, #tpu.memory_space<vmem>>, vector<28x128xbf16>,
    %c1_35 = arith.constant 1 : index
    %c0_36 = arith.constant 0 : index
    %c0_37 = arith.constant 0 : index
    %37 = vector.load %arg4[%c1_35, %c0_36, %c0_37] : memref<5x1x128xf32, #tpu.memory_space<vmem>>, vector<1x1x128xf32>
    %38 = vector.shape_cast %37 : vector<1x1x128xf32> to vector<1x128xf32>
    %c0_38 = arith.constant 0 : index
    %c0_39 = arith.constant 0 : index
    %39 = vector.load %arg11[%c0_38, %c0_39] : memref<32x128xbf16, #tpu.memory_space<vmem>>, vector<24x128xbf16>
    %c0_40 = arith.constant 0 : index
    %c0_41 = arith.constant 0 : index
    %c0_42 = arith.constant 0 : index
    %c0_43 = arith.constant 0 : index
    %40 = vector.load %arg3[%c0_40, %c0_41, %c0_42, %c0_43] : memref<4x5x128x128xbf16, #tpu.memory_space<vmem>>, vector<1x1x128x128xbf16>
    %41 = vector.shape_cast %40 : vector<1x1x128x128xbf16> to vector<128x128xbf16>
    %cst_44 = arith.constant dense<0.000000e+00> : vector<24x128xf32>
    %42 = tpu.matmul %39, %41, %cst_44 {dimension_numbers = #tpu.dot_dimension_numbers<[1], [0], [0], [1], [0, 0, 1, 1], [], []>} : vector<24x128xbf16>, vector<128x128xbf16>, vector<24x128xf32> -> vector<24x128xf32>
    %c1_45 = arith.constant 1 : index
    %c0_46 = arith.constant 0 : index
    %43 = vector.load %arg11[%c1_45, %c0_46] : memref<32x128xbf16, #tpu.memory_space<vmem>>, vector<24x128xbf16>
    %c0_47 = arith.constant 0 : index
    %c1_48 = arith.constant 1 : index
    %c0_49 = arith.constant 0 : index
    %c0_50 = arith.constant 0 : index
    %44 = vector.load %arg3[%c0_47, %c1_48, %c0_49, %c0_50] : memref<4x5x128x128xbf16, #tpu.memory_space<vmem>>, vector<1x1x128x128xbf16>
    %45 = vector.shape_cast %44 : vector<1x1x128x128xbf16> to vector<128x128xbf16>
    %cst_51 = arith.constant dense<0.000000e+00> : vector<24x128xf32>
    %46 = tpu.matmul %43, %45, %cst_51 {dimension_numbers = #tpu.dot_dimension_numbers<[1], [0], [0], [1], [0, 0, 1, 1], [], []>} : vector<24x128xbf16>, vector<128x128xbf16>, vector<24x128xf32> -> vector<24x128xf32>
    %47 = arith.addf %42, %46 : vector<24x128xf32>
    %c2_52 = arith.constant 2 : index
    %c0_53 = arith.constant 0 : index
    %48 = vector.load %arg11[%c2_52, %c0_53] : memref<32x128xbf16, #tpu.memory_space<vmem>>, vector<24x128xbf16>
    %c0_54 = arith.constant 0 : index
    %c2_55 = arith.constant 2 : index
    %c0_56 = arith.constant 0 : index
    %c0_57 = arith.constant 0 : index
    %49 = vector.load %arg3[%c0_54, %c2_55, %c0_56, %c0_57] : memref<4x5x128x128xbf16, #tpu.memory_space<vmem>>, vector<1x1x128x128xbf16>
    %50 = vector.shape_cast %49 : vector<1x1x128x128xbf16> to vector<128x128xbf16>
    %cst_58 = arith.constant dense<0.000000e+00> : vector<24x128xf32>
    %51 = tpu.matmul %48, %50, %cst_58 {dimension_numbers = #tpu.dot_dimension_numbers<[1], [0], [0], [1], [0, 0, 1, 1], [], []>} : vector<24x128xbf16>, vector<128x128xbf16>, vector<24x128xf32> -> vector<24x128xf32>
    %52 = arith.addf %47, %51 : vector<24x128xf32>
    %c3_59 = arith.constant 3 : index
    %c0_60 = arith.constant 0 : index
    %53 = vector.load %arg11[%c3_59, %c0_60] : memref<32x128xbf16, #tpu.memory_space<vmem>>, vector<24x128xbf16>
    %c0_61 = arith.constant 0 : index
    %c3_62 = arith.constant 3 : index
    %c0_63 = arith.constant 0 : index
    %c0_64 = arith.constant 0 : index
    %54 = vector.load %arg3[%c0_61, %c3_62, %c0_63, %c0_64] : memref<4x5x128x128xbf16, #tpu.memory_space<vmem>>, vector<1x1x128x128xbf16>
    %55 = vector.shape_cast %54 : vector<1x1x128x128xbf16> to vector<128x128xbf16>
    %cst_65 = arith.constant dense<0.000000e+00> : vector<24x128xf32>
    %56 = tpu.matmul %53, %55, %cst_65 {dimension_numbers = #tpu.dot_dimension_numbers<[1], [0], [0], [1], [0, 0, 1, 1], [], []>} : vector<24x128xbf16>, vector<128x128xbf16>, vector<24x128xf32> -> vector<24x128xf32>
    %57 = arith.addf %52, %56 : vector<24x128xf32>
    %c4_66 = arith.constant 4 : index
    %c0_67 = arith.constant 0 : index
    %58 = vector.load %arg11[%c4_66, %c0_67] : memref<32x128xbf16, #tpu.memory_space<vmem>>, vector<24x128xbf16>
    %c0_68 = arith.constant 0 : index
    %c4_69 = arith.constant 4 : index
    %c0_70 = arith.constant 0 : index
    %c0_71 = arith.constant 0 : index
    %59 = vector.load %arg3[%c0_68, %c4_69, %c0_70, %c0_71] : memref<4x5x128x128xbf16, #tpu.memory_space<vmem>>, vector<1x1x128x128xbf16>
    %60 = vector.shape_cast %59 : vector<1x1x128x128xbf16> to vector<128x128xbf16>
    %cst_72 = arith.constant dense<0.000000e+00> : vector<24x128xf32>
    %61 = tpu.matmul %58, %60, %cst_72 {dimension_numbers = #tpu.dot_dimension_numbers<[1], [0], [0], [1], [0, 0, 1, 1], [], []>} : vector<24x128xbf16>, vector<128x128xbf16>, vector<24x128xf32> -> vector<24x128xf32>
    %62 = arith.addf %57, %61 : vector<24x128xf32>
    %63 = vector.broadcast %38 : vector<1x128xf32> to vector<24x128xf32>
    %64 = arith.addf %62, %63 : vector<24x128xf32>
    %cst_73 = arith.constant 0.000000e+00 : f32
    %65 = vector.broadcast %cst_73 : f32 to vector<24x128xf32>
    %66 = arith.maximumf %64, %65 : vector<24x128xf32>
    %67 = arith.truncf %66 : vector<24x128xf32> to vector<24x128xbf16>
    %c0_74 = arith.constant 0 : index
    %c0_75 = arith.constant 0 : index
    %68 = vector.load %arg11[%c0_74, %c0_75] : memref<32x128xbf16, #tpu.memory_space<vmem>>, vector<24x128xbf16>
    tpu.vector_store %arg11[%c0_74, %c0_75], %67 {strides = array<i32>} : memref<32x128xbf16, #tpu.memory_space<vmem>>, vector<24x128xbf16>,
    %c2_76 = arith.constant 2 : index
    %c0_77 = arith.constant 0 : index
    %c0_78 = arith.constant 0 : index
    %69 = vector.load %arg4[%c2_76, %c0_77, %c0_78] : memref<5x1x128xf32, #tpu.memory_space<vmem>>, vector<1x1x128xf32>
    %70 = vector.shape_cast %69 : vector<1x1x128xf32> to vector<1x128xf32>
    %c0_79 = arith.constant 0 : index
    %c0_80 = arith.constant 0 : index
    %71 = vector.load %arg11[%c0_79, %c0_80] : memref<32x128xbf16, #tpu.memory_space<vmem>>, vector<20x128xbf16>
    %c1_81 = arith.constant 1 : index
    %c0_82 = arith.constant 0 : index
    %c0_83 = arith.constant 0 : index
    %c0_84 = arith.constant 0 : index
    %72 = vector.load %arg3[%c1_81, %c0_82, %c0_83, %c0_84] : memref<4x5x128x128xbf16, #tpu.memory_space<vmem>>, vector<1x1x128x128xbf16>
    %73 = vector.shape_cast %72 : vector<1x1x128x128xbf16> to vector<128x128xbf16>
    %cst_85 = arith.constant dense<0.000000e+00> : vector<20x128xf32>
    %74 = tpu.matmul %71, %73, %cst_85 {dimension_numbers = #tpu.dot_dimension_numbers<[1], [0], [0], [1], [0, 0, 1, 1], [], []>} : vector<20x128xbf16>, vector<128x128xbf16>, vector<20x128xf32> -> vector<20x128xf32>
    %c1_86 = arith.constant 1 : index
    %c0_87 = arith.constant 0 : index
    %75 = vector.load %arg11[%c1_86, %c0_87] : memref<32x128xbf16, #tpu.memory_space<vmem>>, vector<20x128xbf16>
    %c1_88 = arith.constant 1 : index
    %c1_89 = arith.constant 1 : index
    %c0_90 = arith.constant 0 : index
    %c0_91 = arith.constant 0 : index
    %76 = vector.load %arg3[%c1_88, %c1_89, %c0_90, %c0_91] : memref<4x5x128x128xbf16, #tpu.memory_space<vmem>>, vector<1x1x128x128xbf16>
    %77 = vector.shape_cast %76 : vector<1x1x128x128xbf16> to vector<128x128xbf16>
    %cst_92 = arith.constant dense<0.000000e+00> : vector<20x128xf32>
    %78 = tpu.matmul %75, %77, %cst_92 {dimension_numbers = #tpu.dot_dimension_numbers<[1], [0], [0], [1], [0, 0, 1, 1], [], []>} : vector<20x128xbf16>, vector<128x128xbf16>, vector<20x128xf32> -> vector<20x128xf32>
    %79 = arith.addf %74, %78 : vector<20x128xf32>
    %c2_93 = arith.constant 2 : index
    %c0_94 = arith.constant 0 : index
    %80 = vector.load %arg11[%c2_93, %c0_94] : memref<32x128xbf16, #tpu.memory_space<vmem>>, vector<20x128xbf16>
    %c1_95 = arith.constant 1 : index
    %c2_96 = arith.constant 2 : index
    %c0_97 = arith.constant 0 : index
    %c0_98 = arith.constant 0 : index
    %81 = vector.load %arg3[%c1_95, %c2_96, %c0_97, %c0_98] : memref<4x5x128x128xbf16, #tpu.memory_space<vmem>>, vector<1x1x128x128xbf16>
    %82 = vector.shape_cast %81 : vector<1x1x128x128xbf16> to vector<128x128xbf16>
    %cst_99 = arith.constant dense<0.000000e+00> : vector<20x128xf32>
    %83 = tpu.matmul %80, %82, %cst_99 {dimension_numbers = #tpu.dot_dimension_numbers<[1], [0], [0], [1], [0, 0, 1, 1], [], []>} : vector<20x128xbf16>, vector<128x128xbf16>, vector<20x128xf32> -> vector<20x128xf32>
    %84 = arith.addf %79, %83 : vector<20x128xf32>
    %c3_100 = arith.constant 3 : index
    %c0_101 = arith.constant 0 : index
    %85 = vector.load %arg11[%c3_100, %c0_101] : memref<32x128xbf16, #tpu.memory_space<vmem>>, vector<20x128xbf16>
    %c1_102 = arith.constant 1 : index
    %c3_103 = arith.constant 3 : index
    %c0_104 = arith.constant 0 : index
    %c0_105 = arith.constant 0 : index
    %86 = vector.load %arg3[%c1_102, %c3_103, %c0_104, %c0_105] : memref<4x5x128x128xbf16, #tpu.memory_space<vmem>>, vector<1x1x128x128xbf16>
    %87 = vector.shape_cast %86 : vector<1x1x128x128xbf16> to vector<128x128xbf16>
    %cst_106 = arith.constant dense<0.000000e+00> : vector<20x128xf32>
    %88 = tpu.matmul %85, %87, %cst_106 {dimension_numbers = #tpu.dot_dimension_numbers<[1], [0], [0], [1], [0, 0, 1, 1], [], []>} : vector<20x128xbf16>, vector<128x128xbf16>, vector<20x128xf32> -> vector<20x128xf32>
    %89 = arith.addf %84, %88 : vector<20x128xf32>
    %c4_107 = arith.constant 4 : index
    %c0_108 = arith.constant 0 : index
    %90 = vector.load %arg11[%c4_107, %c0_108] : memref<32x128xbf16, #tpu.memory_space<vmem>>, vector<20x128xbf16>
    %c1_109 = arith.constant 1 : index
    %c4_110 = arith.constant 4 : index
    %c0_111 = arith.constant 0 : index
    %c0_112 = arith.constant 0 : index
    %91 = vector.load %arg3[%c1_109, %c4_110, %c0_111, %c0_112] : memref<4x5x128x128xbf16, #tpu.memory_space<vmem>>, vector<1x1x128x128xbf16>
    %92 = vector.shape_cast %91 : vector<1x1x128x128xbf16> to vector<128x128xbf16>
    %cst_113 = arith.constant dense<0.000000e+00> : vector<20x128xf32>
    %93 = tpu.matmul %90, %92, %cst_113 {dimension_numbers = #tpu.dot_dimension_numbers<[1], [0], [0], [1], [0, 0, 1, 1], [], []>} : vector<20x128xbf16>, vector<128x128xbf16>, vector<20x128xf32> -> vector<20x128xf32>
    %94 = arith.addf %89, %93 : vector<20x128xf32>
    %95 = vector.broadcast %70 : vector<1x128xf32> to vector<20x128xf32>
    %96 = arith.addf %94, %95 : vector<20x128xf32>
    %cst_114 = arith.constant 0.000000e+00 : f32
    %97 = vector.broadcast %cst_114 : f32 to vector<20x128xf32>
    %98 = arith.maximumf %96, %97 : vector<20x128xf32>
    %99 = arith.truncf %98 : vector<20x128xf32> to vector<20x128xbf16>
    %c0_115 = arith.constant 0 : index
    %c0_116 = arith.constant 0 : index
    %100 = vector.load %arg11[%c0_115, %c0_116] : memref<32x128xbf16, #tpu.memory_space<vmem>>, vector<20x128xbf16>
    tpu.vector_store %arg11[%c0_115, %c0_116], %99 {strides = array<i32>} : memref<32x128xbf16, #tpu.memory_space<vmem>>, vector<20x128xbf16>,
    %c3_117 = arith.constant 3 : index
    %c0_118 = arith.constant 0 : index
    %c0_119 = arith.constant 0 : index
    %101 = vector.load %arg4[%c3_117, %c0_118, %c0_119] : memref<5x1x128xf32, #tpu.memory_space<vmem>>, vector<1x1x128xf32>
    %102 = vector.shape_cast %101 : vector<1x1x128xf32> to vector<1x128xf32>
    %c0_120 = arith.constant 0 : index
    %c0_121 = arith.constant 0 : index
    %103 = vector.load %arg11[%c0_120, %c0_121] : memref<32x128xbf16, #tpu.memory_space<vmem>>, vector<16x128xbf16>
    %c2_122 = arith.constant 2 : index
    %c0_123 = arith.constant 0 : index
    %c0_124 = arith.constant 0 : index
    %c0_125 = arith.constant 0 : index
    %104 = vector.load %arg3[%c2_122, %c0_123, %c0_124, %c0_125] : memref<4x5x128x128xbf16, #tpu.memory_space<vmem>>, vector<1x1x128x128xbf16>
    %105 = vector.shape_cast %104 : vector<1x1x128x128xbf16> to vector<128x128xbf16>
    %cst_126 = arith.constant dense<0.000000e+00> : vector<16x128xf32>
    %106 = tpu.matmul %103, %105, %cst_126 {dimension_numbers = #tpu.dot_dimension_numbers<[1], [0], [0], [1], [0, 0, 1, 1], [], []>} : vector<16x128xbf16>, vector<128x128xbf16>, vector<16x128xf32> -> vector<16x128xf32>
    %c1_127 = arith.constant 1 : index
    %c0_128 = arith.constant 0 : index
    %107 = vector.load %arg11[%c1_127, %c0_128] : memref<32x128xbf16, #tpu.memory_space<vmem>>, vector<16x128xbf16>
    %c2_129 = arith.constant 2 : index
    %c1_130 = arith.constant 1 : index
    %c0_131 = arith.constant 0 : index
    %c0_132 = arith.constant 0 : index
    %108 = vector.load %arg3[%c2_129, %c1_130, %c0_131, %c0_132] : memref<4x5x128x128xbf16, #tpu.memory_space<vmem>>, vector<1x1x128x128xbf16>
    %109 = vector.shape_cast %108 : vector<1x1x128x128xbf16> to vector<128x128xbf16>
    %cst_133 = arith.constant dense<0.000000e+00> : vector<16x128xf32>
    %110 = tpu.matmul %107, %109, %cst_133 {dimension_numbers = #tpu.dot_dimension_numbers<[1], [0], [0], [1], [0, 0, 1, 1], [], []>} : vector<16x128xbf16>, vector<128x128xbf16>, vector<16x128xf32> -> vector<16x128xf32>
    %111 = arith.addf %106, %110 : vector<16x128xf32>
    %c2_134 = arith.constant 2 : index
    %c0_135 = arith.constant 0 : index
    %112 = vector.load %arg11[%c2_134, %c0_135] : memref<32x128xbf16, #tpu.memory_space<vmem>>, vector<16x128xbf16>
    %c2_136 = arith.constant 2 : index
    %c2_137 = arith.constant 2 : index
    %c0_138 = arith.constant 0 : index
    %c0_139 = arith.constant 0 : index
    %113 = vector.load %arg3[%c2_136, %c2_137, %c0_138, %c0_139] : memref<4x5x128x128xbf16, #tpu.memory_space<vmem>>, vector<1x1x128x128xbf16>
    %114 = vector.shape_cast %113 : vector<1x1x128x128xbf16> to vector<128x128xbf16>
    %cst_140 = arith.constant dense<0.000000e+00> : vector<16x128xf32>
    %115 = tpu.matmul %112, %114, %cst_140 {dimension_numbers = #tpu.dot_dimension_numbers<[1], [0], [0], [1], [0, 0, 1, 1], [], []>} : vector<16x128xbf16>, vector<128x128xbf16>, vector<16x128xf32> -> vector<16x128xf32>
    %116 = arith.addf %111, %115 : vector<16x128xf32>
    %c3_141 = arith.constant 3 : index
    %c0_142 = arith.constant 0 : index
    %117 = vector.load %arg11[%c3_141, %c0_142] : memref<32x128xbf16, #tpu.memory_space<vmem>>, vector<16x128xbf16>
    %c2_143 = arith.constant 2 : index
    %c3_144 = arith.constant 3 : index
    %c0_145 = arith.constant 0 : index
    %c0_146 = arith.constant 0 : index
    %118 = vector.load %arg3[%c2_143, %c3_144, %c0_145, %c0_146] : memref<4x5x128x128xbf16, #tpu.memory_space<vmem>>, vector<1x1x128x128xbf16>
    %119 = vector.shape_cast %118 : vector<1x1x128x128xbf16> to vector<128x128xbf16>
    %cst_147 = arith.constant dense<0.000000e+00> : vector<16x128xf32>
    %120 = tpu.matmul %117, %119, %cst_147 {dimension_numbers = #tpu.dot_dimension_numbers<[1], [0], [0], [1], [0, 0, 1, 1], [], []>} : vector<16x128xbf16>, vector<128x128xbf16>, vector<16x128xf32> -> vector<16x128xf32>
    %121 = arith.addf %116, %120 : vector<16x128xf32>
    %c4_148 = arith.constant 4 : index
    %c0_149 = arith.constant 0 : index
    %122 = vector.load %arg11[%c4_148, %c0_149] : memref<32x128xbf16, #tpu.memory_space<vmem>>, vector<16x128xbf16>
    %c2_150 = arith.constant 2 : index
    %c4_151 = arith.constant 4 : index
    %c0_152 = arith.constant 0 : index
    %c0_153 = arith.constant 0 : index
    %123 = vector.load %arg3[%c2_150, %c4_151, %c0_152, %c0_153] : memref<4x5x128x128xbf16, #tpu.memory_space<vmem>>, vector<1x1x128x128xbf16>
    %124 = vector.shape_cast %123 : vector<1x1x128x128xbf16> to vector<128x128xbf16>
    %cst_154 = arith.constant dense<0.000000e+00> : vector<16x128xf32>
    %125 = tpu.matmul %122, %124, %cst_154 {dimension_numbers = #tpu.dot_dimension_numbers<[1], [0], [0], [1], [0, 0, 1, 1], [], []>} : vector<16x128xbf16>, vector<128x128xbf16>, vector<16x128xf32> -> vector<16x128xf32>
    %126 = arith.addf %121, %125 : vector<16x128xf32>
    %127 = vector.broadcast %102 : vector<1x128xf32> to vector<16x128xf32>
    %128 = arith.addf %126, %127 : vector<16x128xf32>
    %cst_155 = arith.constant 0.000000e+00 : f32
    %129 = vector.broadcast %cst_155 : f32 to vector<16x128xf32>
    %130 = arith.maximumf %128, %129 : vector<16x128xf32>
    %131 = arith.truncf %130 : vector<16x128xf32> to vector<16x128xbf16>
    %c0_156 = arith.constant 0 : index
    %c0_157 = arith.constant 0 : index
    %132 = vector.load %arg11[%c0_156, %c0_157] : memref<32x128xbf16, #tpu.memory_space<vmem>>, vector<16x128xbf16>
    tpu.vector_store %arg11[%c0_156, %c0_157], %131 {strides = array<i32>} : memref<32x128xbf16, #tpu.memory_space<vmem>>, vector<16x128xbf16>,
    %c4_158 = arith.constant 4 : index
    %c0_159 = arith.constant 0 : index
    %c0_160 = arith.constant 0 : index
    %133 = vector.load %arg4[%c4_158, %c0_159, %c0_160] : memref<5x1x128xf32, #tpu.memory_space<vmem>>, vector<1x1x128xf32>
    %134 = vector.shape_cast %133 : vector<1x1x128xf32> to vector<1x128xf32>
    %cst_161 = arith.constant 0.000000e+00 : f32
    %135 = vector.broadcast %cst_161 : f32 to vector<1x128xf32>
    %cst_162 = arith.constant 0.000000e+00 : f32
    %136 = vector.broadcast %cst_162 : f32 to vector<1x128xf32>
    %c0_163 = arith.constant 0 : index
    %c0_164 = arith.constant 0 : index
    %137 = vector.load %arg11[%c0_163, %c0_164] : memref<32x128xbf16, #tpu.memory_space<vmem>>, vector<12x128xbf16>
    %c3_165 = arith.constant 3 : index
    %c0_166 = arith.constant 0 : index
    %c0_167 = arith.constant 0 : index
    %c0_168 = arith.constant 0 : index
    %138 = vector.load %arg3[%c3_165, %c0_166, %c0_167, %c0_168] : memref<4x5x128x128xbf16, #tpu.memory_space<vmem>>, vector<1x1x128x128xbf16>
    %139 = vector.shape_cast %138 : vector<1x1x128x128xbf16> to vector<128x128xbf16>
    %cst_169 = arith.constant dense<0.000000e+00> : vector<12x128xf32>
    %140 = tpu.matmul %137, %139, %cst_169 {dimension_numbers = #tpu.dot_dimension_numbers<[1], [0], [0], [1], [0, 0, 1, 1], [], []>} : vector<12x128xbf16>, vector<128x128xbf16>, vector<12x128xf32> -> vector<12x128xf32>
    %c1_170 = arith.constant 1 : index
    %c0_171 = arith.constant 0 : index
    %141 = vector.load %arg11[%c1_170, %c0_171] : memref<32x128xbf16, #tpu.memory_space<vmem>>, vector<12x128xbf16>
    %c3_172 = arith.constant 3 : index
    %c1_173 = arith.constant 1 : index
    %c0_174 = arith.constant 0 : index
    %c0_175 = arith.constant 0 : index
    %142 = vector.load %arg3[%c3_172, %c1_173, %c0_174, %c0_175] : memref<4x5x128x128xbf16, #tpu.memory_space<vmem>>, vector<1x1x128x128xbf16>
    %143 = vector.shape_cast %142 : vector<1x1x128x128xbf16> to vector<128x128xbf16>
    %cst_176 = arith.constant dense<0.000000e+00> : vector<12x128xf32>
    %144 = tpu.matmul %141, %143, %cst_176 {dimension_numbers = #tpu.dot_dimension_numbers<[1], [0], [0], [1], [0, 0, 1, 1], [], []>} : vector<12x128xbf16>, vector<128x128xbf16>, vector<12x128xf32> -> vector<12x128xf32>
    %145 = arith.addf %140, %144 : vector<12x128xf32>
    %c2_177 = arith.constant 2 : index
    %c0_178 = arith.constant 0 : index
    %146 = vector.load %arg11[%c2_177, %c0_178] : memref<32x128xbf16, #tpu.memory_space<vmem>>, vector<12x128xbf16>
    %c3_179 = arith.constant 3 : index
    %c2_180 = arith.constant 2 : index
    %c0_181 = arith.constant 0 : index
    %c0_182 = arith.constant 0 : index
    %147 = vector.load %arg3[%c3_179, %c2_180, %c0_181, %c0_182] : memref<4x5x128x128xbf16, #tpu.memory_space<vmem>>, vector<1x1x128x128xbf16>
    %148 = vector.shape_cast %147 : vector<1x1x128x128xbf16> to vector<128x128xbf16>
    %cst_183 = arith.constant dense<0.000000e+00> : vector<12x128xf32>
    %149 = tpu.matmul %146, %148, %cst_183 {dimension_numbers = #tpu.dot_dimension_numbers<[1], [0], [0], [1], [0, 0, 1, 1], [], []>} : vector<12x128xbf16>, vector<128x128xbf16>, vector<12x128xf32> -> vector<12x128xf32>
    %150 = arith.addf %145, %149 : vector<12x128xf32>
    %c3_184 = arith.constant 3 : index
    %c0_185 = arith.constant 0 : index
    %151 = vector.load %arg11[%c3_184, %c0_185] : memref<32x128xbf16, #tpu.memory_space<vmem>>, vector<12x128xbf16>
    %c3_186 = arith.constant 3 : index
    %c3_187 = arith.constant 3 : index
    %c0_188 = arith.constant 0 : index
    %c0_189 = arith.constant 0 : index
    %152 = vector.load %arg3[%c3_186, %c3_187, %c0_188, %c0_189] : memref<4x5x128x128xbf16, #tpu.memory_space<vmem>>, vector<1x1x128x128xbf16>
    %153 = vector.shape_cast %152 : vector<1x1x128x128xbf16> to vector<128x128xbf16>
    %cst_190 = arith.constant dense<0.000000e+00> : vector<12x128xf32>
    %154 = tpu.matmul %151, %153, %cst_190 {dimension_numbers = #tpu.dot_dimension_numbers<[1], [0], [0], [1], [0, 0, 1, 1], [], []>} : vector<12x128xbf16>, vector<128x128xbf16>, vector<12x128xf32> -> vector<12x128xf32>
    %155 = arith.addf %150, %154 : vector<12x128xf32>
    %c4_191 = arith.constant 4 : index
    %c0_192 = arith.constant 0 : index
    %156 = vector.load %arg11[%c4_191, %c0_192] : memref<32x128xbf16, #tpu.memory_space<vmem>>, vector<12x128xbf16>
    %c3_193 = arith.constant 3 : index
    %c4_194 = arith.constant 4 : index
    %c0_195 = arith.constant 0 : index
    %c0_196 = arith.constant 0 : index
    %157 = vector.load %arg3[%c3_193, %c4_194, %c0_195, %c0_196] : memref<4x5x128x128xbf16, #tpu.memory_space<vmem>>, vector<1x1x128x128xbf16>
    %158 = vector.shape_cast %157 : vector<1x1x128x128xbf16> to vector<128x128xbf16>
    %cst_197 = arith.constant dense<0.000000e+00> : vector<12x128xf32>
    %159 = tpu.matmul %156, %158, %cst_197 {dimension_numbers = #tpu.dot_dimension_numbers<[1], [0], [0], [1], [0, 0, 1, 1], [], []>} : vector<12x128xbf16>, vector<128x128xbf16>, vector<12x128xf32> -> vector<12x128xf32>
    %160 = arith.addf %155, %159 : vector<12x128xf32>
    %161 = vector.broadcast %134 : vector<1x128xf32> to vector<12x128xf32>
    %162 = arith.addf %160, %161 : vector<12x128xf32>
    %cst_198 = arith.constant 0.000000e+00 : f32
    %163 = vector.broadcast %cst_198 : f32 to vector<12x128xf32>
    %164 = arith.maximumf %162, %163 : vector<12x128xf32>
    %cst_199 = arith.constant dense<0.000000e+00> : vector<128xf32>
    %165 = vector.multi_reduction <add>, %164, %cst_199 [0] : vector<12x128xf32> to vector<128xf32>
    %166 = vector.shape_cast %165 : vector<128xf32> to vector<1x128xf32>
    %167 = arith.addf %135, %166 : vector<1x128xf32>
    %168 = arith.mulf %164, %164 : vector<12x128xf32>
    %cst_200 = arith.constant dense<0.000000e+00> : vector<128xf32>
    %169 = vector.multi_reduction <add>, %168, %cst_200 [0] : vector<12x128xf32> to vector<128xf32>
    %170 = vector.shape_cast %169 : vector<128xf32> to vector<1x128xf32>
    %171 = arith.addf %136, %170 : vector<1x128xf32>
    %cst_201 = arith.constant 0.0833333358 : f32
    %172 = vector.broadcast %cst_201 : f32 to vector<1x128xf32>
    %173 = arith.mulf %167, %172 : vector<1x128xf32>
    %cst_202 = arith.constant 1.200000e+01 : f32
    %174 = vector.broadcast %cst_202 : f32 to vector<1x128xf32>
    %175 = arith.mulf %174, %173 : vector<1x128xf32>
    %176 = arith.mulf %175, %173 : vector<1x128xf32>
    %177 = arith.subf %171, %176 : vector<1x128xf32>
    %cst_203 = arith.constant 0.0909090936 : f32
    %178 = vector.broadcast %cst_203 : f32 to vector<1x128xf32>
    %179 = arith.mulf %177, %178 : vector<1x128xf32>
    %cst_204 = arith.constant 0.000000e+00 : f32
    %180 = vector.broadcast %cst_204 : f32 to vector<1x128xf32>
    %181 = arith.maximumf %179, %180 : vector<1x128xf32>
    %182 = math.sqrt %181 : vector<1x128xf32>
    %c0_205 = arith.constant 0 : index
    %c0_206 = arith.constant 0 : index
    %183 = vector.load %arg12[%c0_205, %c0_206] : memref<2x128xf32, #tpu.memory_space<vmem>>, vector<1x128xf32>
    tpu.vector_store %arg12[%c0_205, %c0_206], %173 {strides = array<i32>} : memref<2x128xf32, #tpu.memory_space<vmem>>, vector<1x128xf32>,
    %c0_207 = arith.constant 0 : index
    %c0_208 = arith.constant 0 : index
    %184 = vector.load %arg13[%c0_207, %c0_208] : memref<2x128xf32, #tpu.memory_space<vmem>>, vector<1x128xf32>
    tpu.vector_store %arg13[%c0_207, %c0_208], %182 {strides = array<i32>} : memref<2x128xf32, #tpu.memory_space<vmem>>, vector<1x128xf32>,
    %c0_209 = arith.constant 0 : index
    %c0_210 = arith.constant 0 : index
    %c0_211 = arith.constant 0 : index
    %185 = vector.load %arg4[%c0_209, %c0_210, %c0_211] : memref<5x1x128xf32, #tpu.memory_space<vmem>>, vector<1x1x128xf32>
    %186 = vector.shape_cast %185 : vector<1x1x128xf32> to vector<1x128xf32>
    %c1_212 = arith.constant 1 : index
    %c0_213 = arith.constant 0 : index
    %c0_214 = arith.constant 0 : index
    %187 = vector.load %arg1[%c1_212, %c0_213, %c0_214] : memref<2x32x128xbf16, #tpu.memory_space<vmem>>, vector<1x28x128xbf16>
    %188 = vector.shape_cast %187 : vector<1x28x128xbf16> to vector<28x128xbf16>
    %c0_215 = arith.constant 0 : index
    %c0_216 = arith.constant 0 : index
    %c0_217 = arith.constant 0 : index
    %189 = vector.load %arg2[%c0_215, %c0_216, %c0_217] : memref<5x128x128xbf16, #tpu.memory_space<vmem>>, vector<1x128x128xbf16>
    %190 = vector.shape_cast %189 : vector<1x128x128xbf16> to vector<128x128xbf16>
    %cst_218 = arith.constant dense<0.000000e+00> : vector<28x128xf32>
    %191 = tpu.matmul %188, %190, %cst_218 {dimension_numbers = #tpu.dot_dimension_numbers<[1], [0], [0], [1], [0, 0, 1, 1], [], []>} : vector<28x128xbf16>, vector<128x128xbf16>, vector<28x128xf32> -> vector<28x128xf32>
    %c1_219 = arith.constant 1 : index
    %c1_220 = arith.constant 1 : index
    %c0_221 = arith.constant 0 : index
    %192 = vector.load %arg1[%c1_219, %c1_220, %c0_221] : memref<2x32x128xbf16, #tpu.memory_space<vmem>>, vector<1x28x128xbf16>
    %193 = vector.shape_cast %192 : vector<1x28x128xbf16> to vector<28x128xbf16>
    %c1_222 = arith.constant 1 : index
    %c0_223 = arith.constant 0 : index
    %c0_224 = arith.constant 0 : index
    %194 = vector.load %arg2[%c1_222, %c0_223, %c0_224] : memref<5x128x128xbf16, #tpu.memory_space<vmem>>, vector<1x128x128xbf16>
    %195 = vector.shape_cast %194 : vector<1x128x128xbf16> to vector<128x128xbf16>
    %cst_225 = arith.constant dense<0.000000e+00> : vector<28x128xf32>
    %196 = tpu.matmul %193, %195, %cst_225 {dimension_numbers = #tpu.dot_dimension_numbers<[1], [0], [0], [1], [0, 0, 1, 1], [], []>} : vector<28x128xbf16>, vector<128x128xbf16>, vector<28x128xf32> -> vector<28x128xf32>
    %197 = arith.addf %191, %196 : vector<28x128xf32>
    %c1_226 = arith.constant 1 : index
    %c2_227 = arith.constant 2 : index
    %c0_228 = arith.constant 0 : index
    %198 = vector.load %arg1[%c1_226, %c2_227, %c0_228] : memref<2x32x128xbf16, #tpu.memory_space<vmem>>, vector<1x28x128xbf16>
    %199 = vector.shape_cast %198 : vector<1x28x128xbf16> to vector<28x128xbf16>
    %c2_229 = arith.constant 2 : index
    %c0_230 = arith.constant 0 : index
    %c0_231 = arith.constant 0 : index
    %200 = vector.load %arg2[%c2_229, %c0_230, %c0_231] : memref<5x128x128xbf16, #tpu.memory_space<vmem>>, vector<1x128x128xbf16>
    %201 = vector.shape_cast %200 : vector<1x128x128xbf16> to vector<128x128xbf16>
    %cst_232 = arith.constant dense<0.000000e+00> : vector<28x128xf32>
    %202 = tpu.matmul %199, %201, %cst_232 {dimension_numbers = #tpu.dot_dimension_numbers<[1], [0], [0], [1], [0, 0, 1, 1], [], []>} : vector<28x128xbf16>, vector<128x128xbf16>, vector<28x128xf32> -> vector<28x128xf32>
    %203 = arith.addf %197, %202 : vector<28x128xf32>
    %c1_233 = arith.constant 1 : index
    %c3_234 = arith.constant 3 : index
    %c0_235 = arith.constant 0 : index
    %204 = vector.load %arg1[%c1_233, %c3_234, %c0_235] : memref<2x32x128xbf16, #tpu.memory_space<vmem>>, vector<1x28x128xbf16>
    %205 = vector.shape_cast %204 : vector<1x28x128xbf16> to vector<28x128xbf16>
    %c3_236 = arith.constant 3 : index
    %c0_237 = arith.constant 0 : index
    %c0_238 = arith.constant 0 : index
    %206 = vector.load %arg2[%c3_236, %c0_237, %c0_238] : memref<5x128x128xbf16, #tpu.memory_space<vmem>>, vector<1x128x128xbf16>
    %207 = vector.shape_cast %206 : vector<1x128x128xbf16> to vector<128x128xbf16>
    %cst_239 = arith.constant dense<0.000000e+00> : vector<28x128xf32>
    %208 = tpu.matmul %205, %207, %cst_239 {dimension_numbers = #tpu.dot_dimension_numbers<[1], [0], [0], [1], [0, 0, 1, 1], [], []>} : vector<28x128xbf16>, vector<128x128xbf16>, vector<28x128xf32> -> vector<28x128xf32>
    %209 = arith.addf %203, %208 : vector<28x128xf32>
    %c1_240 = arith.constant 1 : index
    %c4_241 = arith.constant 4 : index
    %c0_242 = arith.constant 0 : index
    %210 = vector.load %arg1[%c1_240, %c4_241, %c0_242] : memref<2x32x128xbf16, #tpu.memory_space<vmem>>, vector<1x28x128xbf16>
    %211 = vector.shape_cast %210 : vector<1x28x128xbf16> to vector<28x128xbf16>
    %c4_243 = arith.constant 4 : index
    %c0_244 = arith.constant 0 : index
    %c0_245 = arith.constant 0 : index
    %212 = vector.load %arg2[%c4_243, %c0_244, %c0_245] : memref<5x128x128xbf16, #tpu.memory_space<vmem>>, vector<1x128x128xbf16>
    %213 = vector.shape_cast %212 : vector<1x128x128xbf16> to vector<128x128xbf16>
    %cst_246 = arith.constant dense<0.000000e+00> : vector<28x128xf32>
    %214 = tpu.matmul %211, %213, %cst_246 {dimension_numbers = #tpu.dot_dimension_numbers<[1], [0], [0], [1], [0, 0, 1, 1], [], []>} : vector<28x128xbf16>, vector<128x128xbf16>, vector<28x128xf32> -> vector<28x128xf32>
    %215 = arith.addf %209, %214 : vector<28x128xf32>
    %216 = vector.broadcast %186 : vector<1x128xf32> to vector<28x128xf32>
    %217 = arith.addf %215, %216 : vector<28x128xf32>
    %cst_247 = arith.constant 0.000000e+00 : f32
    %218 = vector.broadcast %cst_247 : f32 to vector<28x128xf32>
    %219 = arith.maximumf %217, %218 : vector<28x128xf32>
    %220 = arith.truncf %219 : vector<28x128xf32> to vector<28x128xbf16>
    %c0_248 = arith.constant 0 : index
    %c0_249 = arith.constant 0 : index
    %221 = vector.load %arg11[%c0_248, %c0_249] : memref<32x128xbf16, #tpu.memory_space<vmem>>, vector<28x128xbf16>
    tpu.vector_store %arg11[%c0_248, %c0_249], %220 {strides = array<i32>} : memref<32x128xbf16, #tpu.memory_space<vmem>>, vector<28x128xbf16>,
    %c1_250 = arith.constant 1 : index
    %c0_251 = arith.constant 0 : index
    %c0_252 = arith.constant 0 : index
    %222 = vector.load %arg4[%c1_250, %c0_251, %c0_252] : memref<5x1x128xf32, #tpu.memory_space<vmem>>, vector<1x1x128xf32>
    %223 = vector.shape_cast %222 : vector<1x1x128xf32> to vector<1x128xf32>
    %c0_253 = arith.constant 0 : index
    %c0_254 = arith.constant 0 : index
    %224 = vector.load %arg11[%c0_253, %c0_254] : memref<32x128xbf16, #tpu.memory_space<vmem>>, vector<24x128xbf16>
    %c0_255 = arith.constant 0 : index
    %c0_256 = arith.constant 0 : index
    %c0_257 = arith.constant 0 : index
    %c0_258 = arith.constant 0 : index
    %225 = vector.load %arg3[%c0_255, %c0_256, %c0_257, %c0_258] : memref<4x5x128x128xbf16, #tpu.memory_space<vmem>>, vector<1x1x128x128xbf16>
    %226 = vector.shape_cast %225 : vector<1x1x128x128xbf16> to vector<128x128xbf16>
    %cst_259 = arith.constant dense<0.000000e+00> : vector<24x128xf32>
    %227 = tpu.matmul %224, %226, %cst_259 {dimension_numbers = #tpu.dot_dimension_numbers<[1], [0], [0], [1], [0, 0, 1, 1], [], []>} : vector<24x128xbf16>, vector<128x128xbf16>, vector<24x128xf32> -> vector<24x128xf32>
    %c1_260 = arith.constant 1 : index
    %c0_261 = arith.constant 0 : index
    %228 = vector.load %arg11[%c1_260, %c0_261] : memref<32x128xbf16, #tpu.memory_space<vmem>>, vector<24x128xbf16>
    %c0_262 = arith.constant 0 : index
    %c1_263 = arith.constant 1 : index
    %c0_264 = arith.constant 0 : index
    %c0_265 = arith.constant 0 : index
    %229 = vector.load %arg3[%c0_262, %c1_263, %c0_264, %c0_265] : memref<4x5x128x128xbf16, #tpu.memory_space<vmem>>, vector<1x1x128x128xbf16>
    %230 = vector.shape_cast %229 : vector<1x1x128x128xbf16> to vector<128x128xbf16>
    %cst_266 = arith.constant dense<0.000000e+00> : vector<24x128xf32>
    %231 = tpu.matmul %228, %230, %cst_266 {dimension_numbers = #tpu.dot_dimension_numbers<[1], [0], [0], [1], [0, 0, 1, 1], [], []>} : vector<24x128xbf16>, vector<128x128xbf16>, vector<24x128xf32> -> vector<24x128xf32>
    %232 = arith.addf %227, %231 : vector<24x128xf32>
    %c2_267 = arith.constant 2 : index
    %c0_268 = arith.constant 0 : index
    %233 = vector.load %arg11[%c2_267, %c0_268] : memref<32x128xbf16, #tpu.memory_space<vmem>>, vector<24x128xbf16>
    %c0_269 = arith.constant 0 : index
    %c2_270 = arith.constant 2 : index
    %c0_271 = arith.constant 0 : index
    %c0_272 = arith.constant 0 : index
    %234 = vector.load %arg3[%c0_269, %c2_270, %c0_271, %c0_272] : memref<4x5x128x128xbf16, #tpu.memory_space<vmem>>, vector<1x1x128x128xbf16>
    %235 = vector.shape_cast %234 : vector<1x1x128x128xbf16> to vector<128x128xbf16>
    %cst_273 = arith.constant dense<0.000000e+00> : vector<24x128xf32>
    %236 = tpu.matmul %233, %235, %cst_273 {dimension_numbers = #tpu.dot_dimension_numbers<[1], [0], [0], [1], [0, 0, 1, 1], [], []>} : vector<24x128xbf16>, vector<128x128xbf16>, vector<24x128xf32> -> vector<24x128xf32>
    %237 = arith.addf %232, %236 : vector<24x128xf32>
    %c3_274 = arith.constant 3 : index
    %c0_275 = arith.constant 0 : index
    %238 = vector.load %arg11[%c3_274, %c0_275] : memref<32x128xbf16, #tpu.memory_space<vmem>>, vector<24x128xbf16>
    %c0_276 = arith.constant 0 : index
    %c3_277 = arith.constant 3 : index
    %c0_278 = arith.constant 0 : index
    %c0_279 = arith.constant 0 : index
    %239 = vector.load %arg3[%c0_276, %c3_277, %c0_278, %c0_279] : memref<4x5x128x128xbf16, #tpu.memory_space<vmem>>, vector<1x1x128x128xbf16>
    %240 = vector.shape_cast %239 : vector<1x1x128x128xbf16> to vector<128x128xbf16>
    %cst_280 = arith.constant dense<0.000000e+00> : vector<24x128xf32>
    %241 = tpu.matmul %238, %240, %cst_280 {dimension_numbers = #tpu.dot_dimension_numbers<[1], [0], [0], [1], [0, 0, 1, 1], [], []>} : vector<24x128xbf16>, vector<128x128xbf16>, vector<24x128xf32> -> vector<24x128xf32>
    %242 = arith.addf %237, %241 : vector<24x128xf32>
    %c4_281 = arith.constant 4 : index
    %c0_282 = arith.constant 0 : index
    %243 = vector.load %arg11[%c4_281, %c0_282] : memref<32x128xbf16, #tpu.memory_space<vmem>>, vector<24x128xbf16>
    %c0_283 = arith.constant 0 : index
    %c4_284 = arith.constant 4 : index
    %c0_285 = arith.constant 0 : index
    %c0_286 = arith.constant 0 : index
    %244 = vector.load %arg3[%c0_283, %c4_284, %c0_285, %c0_286] : memref<4x5x128x128xbf16, #tpu.memory_space<vmem>>, vector<1x1x128x128xbf16>
    %245 = vector.shape_cast %244 : vector<1x1x128x128xbf16> to vector<128x128xbf16>
    %cst_287 = arith.constant dense<0.000000e+00> : vector<24x128xf32>
    %246 = tpu.matmul %243, %245, %cst_287 {dimension_numbers = #tpu.dot_dimension_numbers<[1], [0], [0], [1], [0, 0, 1, 1], [], []>} : vector<24x128xbf16>, vector<128x128xbf16>, vector<24x128xf32> -> vector<24x128xf32>
    %247 = arith.addf %242, %246 : vector<24x128xf32>
    %248 = vector.broadcast %223 : vector<1x128xf32> to vector<24x128xf32>
    %249 = arith.addf %247, %248 : vector<24x128xf32>
    %cst_288 = arith.constant 0.000000e+00 : f32
    %250 = vector.broadcast %cst_288 : f32 to vector<24x128xf32>
    %251 = arith.maximumf %249, %250 : vector<24x128xf32>
    %252 = arith.truncf %251 : vector<24x128xf32> to vector<24x128xbf16>
    %c0_289 = arith.constant 0 : index
    %c0_290 = arith.constant 0 : index
    %253 = vector.load %arg11[%c0_289, %c0_290] : memref<32x128xbf16, #tpu.memory_space<vmem>>, vector<24x128xbf16>
    tpu.vector_store %arg11[%c0_289, %c0_290], %252 {strides = array<i32>} : memref<32x128xbf16, #tpu.memory_space<vmem>>, vector<24x128xbf16>,
    %c2_291 = arith.constant 2 : index
    %c0_292 = arith.constant 0 : index
    %c0_293 = arith.constant 0 : index
    %254 = vector.load %arg4[%c2_291, %c0_292, %c0_293] : memref<5x1x128xf32, #tpu.memory_space<vmem>>, vector<1x1x128xf32>
    %255 = vector.shape_cast %254 : vector<1x1x128xf32> to vector<1x128xf32>
    %c0_294 = arith.constant 0 : index
    %c0_295 = arith.constant 0 : index
    %256 = vector.load %arg11[%c0_294, %c0_295] : memref<32x128xbf16, #tpu.memory_space<vmem>>, vector<20x128xbf16>
    %c1_296 = arith.constant 1 : index
    %c0_297 = arith.constant 0 : index
    %c0_298 = arith.constant 0 : index
    %c0_299 = arith.constant 0 : index
    %257 = vector.load %arg3[%c1_296, %c0_297, %c0_298, %c0_299] : memref<4x5x128x128xbf16, #tpu.memory_space<vmem>>, vector<1x1x128x128xbf16>
    %258 = vector.shape_cast %257 : vector<1x1x128x128xbf16> to vector<128x128xbf16>
    %cst_300 = arith.constant dense<0.000000e+00> : vector<20x128xf32>
    %259 = tpu.matmul %256, %258, %cst_300 {dimension_numbers = #tpu.dot_dimension_numbers<[1], [0], [0], [1], [0, 0, 1, 1], [], []>} : vector<20x128xbf16>, vector<128x128xbf16>, vector<20x128xf32> -> vector<20x128xf32>
    %c1_301 = arith.constant 1 : index
    %c0_302 = arith.constant 0 : index
    %260 = vector.load %arg11[%c1_301, %c0_302] : memref<32x128xbf16, #tpu.memory_space<vmem>>, vector<20x128xbf16>
    %c1_303 = arith.constant 1 : index
    %c1_304 = arith.constant 1 : index
    %c0_305 = arith.constant 0 : index
    %c0_306 = arith.constant 0 : index
    %261 = vector.load %arg3[%c1_303, %c1_304, %c0_305, %c0_306] : memref<4x5x128x128xbf16, #tpu.memory_space<vmem>>, vector<1x1x128x128xbf16>
    %262 = vector.shape_cast %261 : vector<1x1x128x128xbf16> to vector<128x128xbf16>
    %cst_307 = arith.constant dense<0.000000e+00> : vector<20x128xf32>
    %263 = tpu.matmul %260, %262, %cst_307 {dimension_numbers = #tpu.dot_dimension_numbers<[1], [0], [0], [1], [0, 0, 1, 1], [], []>} : vector<20x128xbf16>, vector<128x128xbf16>, vector<20x128xf32> -> vector<20x128xf32>
    %264 = arith.addf %259, %263 : vector<20x128xf32>
    %c2_308 = arith.constant 2 : index
    %c0_309 = arith.constant 0 : index
    %265 = vector.load %arg11[%c2_308, %c0_309] : memref<32x128xbf16, #tpu.memory_space<vmem>>, vector<20x128xbf16>
    %c1_310 = arith.constant 1 : index
    %c2_311 = arith.constant 2 : index
    %c0_312 = arith.constant 0 : index
    %c0_313 = arith.constant 0 : index
    %266 = vector.load %arg3[%c1_310, %c2_311, %c0_312, %c0_313] : memref<4x5x128x128xbf16, #tpu.memory_space<vmem>>, vector<1x1x128x128xbf16>
    %267 = vector.shape_cast %266 : vector<1x1x128x128xbf16> to vector<128x128xbf16>
    %cst_314 = arith.constant dense<0.000000e+00> : vector<20x128xf32>
    %268 = tpu.matmul %265, %267, %cst_314 {dimension_numbers = #tpu.dot_dimension_numbers<[1], [0], [0], [1], [0, 0, 1, 1], [], []>} : vector<20x128xbf16>, vector<128x128xbf16>, vector<20x128xf32> -> vector<20x128xf32>
    %269 = arith.addf %264, %268 : vector<20x128xf32>
    %c3_315 = arith.constant 3 : index
    %c0_316 = arith.constant 0 : index
    %270 = vector.load %arg11[%c3_315, %c0_316] : memref<32x128xbf16, #tpu.memory_space<vmem>>, vector<20x128xbf16>
    %c1_317 = arith.constant 1 : index
    %c3_318 = arith.constant 3 : index
    %c0_319 = arith.constant 0 : index
    %c0_320 = arith.constant 0 : index
    %271 = vector.load %arg3[%c1_317, %c3_318, %c0_319, %c0_320] : memref<4x5x128x128xbf16, #tpu.memory_space<vmem>>, vector<1x1x128x128xbf16>
    %272 = vector.shape_cast %271 : vector<1x1x128x128xbf16> to vector<128x128xbf16>
    %cst_321 = arith.constant dense<0.000000e+00> : vector<20x128xf32>
    %273 = tpu.matmul %270, %272, %cst_321 {dimension_numbers = #tpu.dot_dimension_numbers<[1], [0], [0], [1], [0, 0, 1, 1], [], []>} : vector<20x128xbf16>, vector<128x128xbf16>, vector<20x128xf32> -> vector<20x128xf32>
    %274 = arith.addf %269, %273 : vector<20x128xf32>
    %c4_322 = arith.constant 4 : index
    %c0_323 = arith.constant 0 : index
    %275 = vector.load %arg11[%c4_322, %c0_323] : memref<32x128xbf16, #tpu.memory_space<vmem>>, vector<20x128xbf16>
    %c1_324 = arith.constant 1 : index
    %c4_325 = arith.constant 4 : index
    %c0_326 = arith.constant 0 : index
    %c0_327 = arith.constant 0 : index
    %276 = vector.load %arg3[%c1_324, %c4_325, %c0_326, %c0_327] : memref<4x5x128x128xbf16, #tpu.memory_space<vmem>>, vector<1x1x128x128xbf16>
    %277 = vector.shape_cast %276 : vector<1x1x128x128xbf16> to vector<128x128xbf16>
    %cst_328 = arith.constant dense<0.000000e+00> : vector<20x128xf32>
    %278 = tpu.matmul %275, %277, %cst_328 {dimension_numbers = #tpu.dot_dimension_numbers<[1], [0], [0], [1], [0, 0, 1, 1], [], []>} : vector<20x128xbf16>, vector<128x128xbf16>, vector<20x128xf32> -> vector<20x128xf32>
    %279 = arith.addf %274, %278 : vector<20x128xf32>
    %280 = vector.broadcast %255 : vector<1x128xf32> to vector<20x128xf32>
    %281 = arith.addf %279, %280 : vector<20x128xf32>
    %cst_329 = arith.constant 0.000000e+00 : f32
    %282 = vector.broadcast %cst_329 : f32 to vector<20x128xf32>
    %283 = arith.maximumf %281, %282 : vector<20x128xf32>
    %284 = arith.truncf %283 : vector<20x128xf32> to vector<20x128xbf16>
    %c0_330 = arith.constant 0 : index
    %c0_331 = arith.constant 0 : index
    %285 = vector.load %arg11[%c0_330, %c0_331] : memref<32x128xbf16, #tpu.memory_space<vmem>>, vector<20x128xbf16>
    tpu.vector_store %arg11[%c0_330, %c0_331], %284 {strides = array<i32>} : memref<32x128xbf16, #tpu.memory_space<vmem>>, vector<20x128xbf16>,
    %c3_332 = arith.constant 3 : index
    %c0_333 = arith.constant 0 : index
    %c0_334 = arith.constant 0 : index
    %286 = vector.load %arg4[%c3_332, %c0_333, %c0_334] : memref<5x1x128xf32, #tpu.memory_space<vmem>>, vector<1x1x128xf32>
    %287 = vector.shape_cast %286 : vector<1x1x128xf32> to vector<1x128xf32>
    %c0_335 = arith.constant 0 : index
    %c0_336 = arith.constant 0 : index
    %288 = vector.load %arg11[%c0_335, %c0_336] : memref<32x128xbf16, #tpu.memory_space<vmem>>, vector<16x128xbf16>
    %c2_337 = arith.constant 2 : index
    %c0_338 = arith.constant 0 : index
    %c0_339 = arith.constant 0 : index
    %c0_340 = arith.constant 0 : index
    %289 = vector.load %arg3[%c2_337, %c0_338, %c0_339, %c0_340] : memref<4x5x128x128xbf16, #tpu.memory_space<vmem>>, vector<1x1x128x128xbf16>
    %290 = vector.shape_cast %289 : vector<1x1x128x128xbf16> to vector<128x128xbf16>
    %cst_341 = arith.constant dense<0.000000e+00> : vector<16x128xf32>
    %291 = tpu.matmul %288, %290, %cst_341 {dimension_numbers = #tpu.dot_dimension_numbers<[1], [0], [0], [1], [0, 0, 1, 1], [], []>} : vector<16x128xbf16>, vector<128x128xbf16>, vector<16x128xf32> -> vector<16x128xf32>
    %c1_342 = arith.constant 1 : index
    %c0_343 = arith.constant 0 : index
    %292 = vector.load %arg11[%c1_342, %c0_343] : memref<32x128xbf16, #tpu.memory_space<vmem>>, vector<16x128xbf16>
    %c2_344 = arith.constant 2 : index
    %c1_345 = arith.constant 1 : index
    %c0_346 = arith.constant 0 : index
    %c0_347 = arith.constant 0 : index
    %293 = vector.load %arg3[%c2_344, %c1_345, %c0_346, %c0_347] : memref<4x5x128x128xbf16, #tpu.memory_space<vmem>>, vector<1x1x128x128xbf16>
    %294 = vector.shape_cast %293 : vector<1x1x128x128xbf16> to vector<128x128xbf16>
    %cst_348 = arith.constant dense<0.000000e+00> : vector<16x128xf32>
    %295 = tpu.matmul %292, %294, %cst_348 {dimension_numbers = #tpu.dot_dimension_numbers<[1], [0], [0], [1], [0, 0, 1, 1], [], []>} : vector<16x128xbf16>, vector<128x128xbf16>, vector<16x128xf32> -> vector<16x128xf32>
    %296 = arith.addf %291, %295 : vector<16x128xf32>
    %c2_349 = arith.constant 2 : index
    %c0_350 = arith.constant 0 : index
    %297 = vector.load %arg11[%c2_349, %c0_350] : memref<32x128xbf16, #tpu.memory_space<vmem>>, vector<16x128xbf16>
    %c2_351 = arith.constant 2 : index
    %c2_352 = arith.constant 2 : index
    %c0_353 = arith.constant 0 : index
    %c0_354 = arith.constant 0 : index
    %298 = vector.load %arg3[%c2_351, %c2_352, %c0_353, %c0_354] : memref<4x5x128x128xbf16, #tpu.memory_space<vmem>>, vector<1x1x128x128xbf16>
    %299 = vector.shape_cast %298 : vector<1x1x128x128xbf16> to vector<128x128xbf16>
    %cst_355 = arith.constant dense<0.000000e+00> : vector<16x128xf32>
    %300 = tpu.matmul %297, %299, %cst_355 {dimension_numbers = #tpu.dot_dimension_numbers<[1], [0], [0], [1], [0, 0, 1, 1], [], []>} : vector<16x128xbf16>, vector<128x128xbf16>, vector<16x128xf32> -> vector<16x128xf32>
    %301 = arith.addf %296, %300 : vector<16x128xf32>
    %c3_356 = arith.constant 3 : index
    %c0_357 = arith.constant 0 : index
    %302 = vector.load %arg11[%c3_356, %c0_357] : memref<32x128xbf16, #tpu.memory_space<vmem>>, vector<16x128xbf16>
    %c2_358 = arith.constant 2 : index
    %c3_359 = arith.constant 3 : index
    %c0_360 = arith.constant 0 : index
    %c0_361 = arith.constant 0 : index
    %303 = vector.load %arg3[%c2_358, %c3_359, %c0_360, %c0_361] : memref<4x5x128x128xbf16, #tpu.memory_space<vmem>>, vector<1x1x128x128xbf16>
    %304 = vector.shape_cast %303 : vector<1x1x128x128xbf16> to vector<128x128xbf16>
    %cst_362 = arith.constant dense<0.000000e+00> : vector<16x128xf32>
    %305 = tpu.matmul %302, %304, %cst_362 {dimension_numbers = #tpu.dot_dimension_numbers<[1], [0], [0], [1], [0, 0, 1, 1], [], []>} : vector<16x128xbf16>, vector<128x128xbf16>, vector<16x128xf32> -> vector<16x128xf32>
    %306 = arith.addf %301, %305 : vector<16x128xf32>
    %c4_363 = arith.constant 4 : index
    %c0_364 = arith.constant 0 : index
    %307 = vector.load %arg11[%c4_363, %c0_364] : memref<32x128xbf16, #tpu.memory_space<vmem>>, vector<16x128xbf16>
    %c2_365 = arith.constant 2 : index
    %c4_366 = arith.constant 4 : index
    %c0_367 = arith.constant 0 : index
    %c0_368 = arith.constant 0 : index
    %308 = vector.load %arg3[%c2_365, %c4_366, %c0_367, %c0_368] : memref<4x5x128x128xbf16, #tpu.memory_space<vmem>>, vector<1x1x128x128xbf16>
    %309 = vector.shape_cast %308 : vector<1x1x128x128xbf16> to vector<128x128xbf16>
    %cst_369 = arith.constant dense<0.000000e+00> : vector<16x128xf32>
    %310 = tpu.matmul %307, %309, %cst_369 {dimension_numbers = #tpu.dot_dimension_numbers<[1], [0], [0], [1], [0, 0, 1, 1], [], []>} : vector<16x128xbf16>, vector<128x128xbf16>, vector<16x128xf32> -> vector<16x128xf32>
    %311 = arith.addf %306, %310 : vector<16x128xf32>
    %312 = vector.broadcast %287 : vector<1x128xf32> to vector<16x128xf32>
    %313 = arith.addf %311, %312 : vector<16x128xf32>
    %cst_370 = arith.constant 0.000000e+00 : f32
    %314 = vector.broadcast %cst_370 : f32 to vector<16x128xf32>
    %315 = arith.maximumf %313, %314 : vector<16x128xf32>
    %316 = arith.truncf %315 : vector<16x128xf32> to vector<16x128xbf16>
    %c0_371 = arith.constant 0 : index
    %c0_372 = arith.constant 0 : index
    %317 = vector.load %arg11[%c0_371, %c0_372] : memref<32x128xbf16, #tpu.memory_space<vmem>>, vector<16x128xbf16>
    tpu.vector_store %arg11[%c0_371, %c0_372], %316 {strides = array<i32>} : memref<32x128xbf16, #tpu.memory_space<vmem>>, vector<16x128xbf16>,
    %c4_373 = arith.constant 4 : index
    %c0_374 = arith.constant 0 : index
    %c0_375 = arith.constant 0 : index
    %318 = vector.load %arg4[%c4_373, %c0_374, %c0_375] : memref<5x1x128xf32, #tpu.memory_space<vmem>>, vector<1x1x128xf32>
    %319 = vector.shape_cast %318 : vector<1x1x128xf32> to vector<1x128xf32>
    %cst_376 = arith.constant 0.000000e+00 : f32
    %320 = vector.broadcast %cst_376 : f32 to vector<1x128xf32>
    %cst_377 = arith.constant 0.000000e+00 : f32
    %321 = vector.broadcast %cst_377 : f32 to vector<1x128xf32>
    %c0_378 = arith.constant 0 : index
    %c0_379 = arith.constant 0 : index
    %322 = vector.load %arg11[%c0_378, %c0_379] : memref<32x128xbf16, #tpu.memory_space<vmem>>, vector<12x128xbf16>
    %c3_380 = arith.constant 3 : index
    %c0_381 = arith.constant 0 : index
    %c0_382 = arith.constant 0 : index
    %c0_383 = arith.constant 0 : index
    %323 = vector.load %arg3[%c3_380, %c0_381, %c0_382, %c0_383] : memref<4x5x128x128xbf16, #tpu.memory_space<vmem>>, vector<1x1x128x128xbf16>
    %324 = vector.shape_cast %323 : vector<1x1x128x128xbf16> to vector<128x128xbf16>
    %cst_384 = arith.constant dense<0.000000e+00> : vector<12x128xf32>
    %325 = tpu.matmul %322, %324, %cst_384 {dimension_numbers = #tpu.dot_dimension_numbers<[1], [0], [0], [1], [0, 0, 1, 1], [], []>} : vector<12x128xbf16>, vector<128x128xbf16>, vector<12x128xf32> -> vector<12x128xf32>
    %c1_385 = arith.constant 1 : index
    %c0_386 = arith.constant 0 : index
    %326 = vector.load %arg11[%c1_385, %c0_386] : memref<32x128xbf16, #tpu.memory_space<vmem>>, vector<12x128xbf16>
    %c3_387 = arith.constant 3 : index
    %c1_388 = arith.constant 1 : index
    %c0_389 = arith.constant 0 : index
    %c0_390 = arith.constant 0 : index
    %327 = vector.load %arg3[%c3_387, %c1_388, %c0_389, %c0_390] : memref<4x5x128x128xbf16, #tpu.memory_space<vmem>>, vector<1x1x128x128xbf16>
    %328 = vector.shape_cast %327 : vector<1x1x128x128xbf16> to vector<128x128xbf16>
    %cst_391 = arith.constant dense<0.000000e+00> : vector<12x128xf32>
    %329 = tpu.matmul %326, %328, %cst_391 {dimension_numbers = #tpu.dot_dimension_numbers<[1], [0], [0], [1], [0, 0, 1, 1], [], []>} : vector<12x128xbf16>, vector<128x128xbf16>, vector<12x128xf32> -> vector<12x128xf32>
    %330 = arith.addf %325, %329 : vector<12x128xf32>
    %c2_392 = arith.constant 2 : index
    %c0_393 = arith.constant 0 : index
    %331 = vector.load %arg11[%c2_392, %c0_393] : memref<32x128xbf16, #tpu.memory_space<vmem>>, vector<12x128xbf16>
    %c3_394 = arith.constant 3 : index
    %c2_395 = arith.constant 2 : index
    %c0_396 = arith.constant 0 : index
    %c0_397 = arith.constant 0 : index
    %332 = vector.load %arg3[%c3_394, %c2_395, %c0_396, %c0_397] : memref<4x5x128x128xbf16, #tpu.memory_space<vmem>>, vector<1x1x128x128xbf16>
    %333 = vector.shape_cast %332 : vector<1x1x128x128xbf16> to vector<128x128xbf16>
    %cst_398 = arith.constant dense<0.000000e+00> : vector<12x128xf32>
    %334 = tpu.matmul %331, %333, %cst_398 {dimension_numbers = #tpu.dot_dimension_numbers<[1], [0], [0], [1], [0, 0, 1, 1], [], []>} : vector<12x128xbf16>, vector<128x128xbf16>, vector<12x128xf32> -> vector<12x128xf32>
    %335 = arith.addf %330, %334 : vector<12x128xf32>
    %c3_399 = arith.constant 3 : index
    %c0_400 = arith.constant 0 : index
    %336 = vector.load %arg11[%c3_399, %c0_400] : memref<32x128xbf16, #tpu.memory_space<vmem>>, vector<12x128xbf16>
    %c3_401 = arith.constant 3 : index
    %c3_402 = arith.constant 3 : index
    %c0_403 = arith.constant 0 : index
    %c0_404 = arith.constant 0 : index
    %337 = vector.load %arg3[%c3_401, %c3_402, %c0_403, %c0_404] : memref<4x5x128x128xbf16, #tpu.memory_space<vmem>>, vector<1x1x128x128xbf16>
    %338 = vector.shape_cast %337 : vector<1x1x128x128xbf16> to vector<128x128xbf16>
    %cst_405 = arith.constant dense<0.000000e+00> : vector<12x128xf32>
    %339 = tpu.matmul %336, %338, %cst_405 {dimension_numbers = #tpu.dot_dimension_numbers<[1], [0], [0], [1], [0, 0, 1, 1], [], []>} : vector<12x128xbf16>, vector<128x128xbf16>, vector<12x128xf32> -> vector<12x128xf32>
    %340 = arith.addf %335, %339 : vector<12x128xf32>
    %c4_406 = arith.constant 4 : index
    %c0_407 = arith.constant 0 : index
    %341 = vector.load %arg11[%c4_406, %c0_407] : memref<32x128xbf16, #tpu.memory_space<vmem>>, vector<12x128xbf16>
    %c3_408 = arith.constant 3 : index
    %c4_409 = arith.constant 4 : index
    %c0_410 = arith.constant 0 : index
    %c0_411 = arith.constant 0 : index
    %342 = vector.load %arg3[%c3_408, %c4_409, %c0_410, %c0_411] : memref<4x5x128x128xbf16, #tpu.memory_space<vmem>>, vector<1x1x128x128xbf16>
    %343 = vector.shape_cast %342 : vector<1x1x128x128xbf16> to vector<128x128xbf16>
    %cst_412 = arith.constant dense<0.000000e+00> : vector<12x128xf32>
    %344 = tpu.matmul %341, %343, %cst_412 {dimension_numbers = #tpu.dot_dimension_numbers<[1], [0], [0], [1], [0, 0, 1, 1], [], []>} : vector<12x128xbf16>, vector<128x128xbf16>, vector<12x128xf32> -> vector<12x128xf32>
    %345 = arith.addf %340, %344 : vector<12x128xf32>
    %346 = vector.broadcast %319 : vector<1x128xf32> to vector<12x128xf32>
    %347 = arith.addf %345, %346 : vector<12x128xf32>
    %cst_413 = arith.constant 0.000000e+00 : f32
    %348 = vector.broadcast %cst_413 : f32 to vector<12x128xf32>
    %349 = arith.maximumf %347, %348 : vector<12x128xf32>
    %cst_414 = arith.constant dense<0.000000e+00> : vector<128xf32>
    %350 = vector.multi_reduction <add>, %349, %cst_414 [0] : vector<12x128xf32> to vector<128xf32>
    %351 = vector.shape_cast %350 : vector<128xf32> to vector<1x128xf32>
    %352 = arith.addf %320, %351 : vector<1x128xf32>
    %353 = arith.mulf %349, %349 : vector<12x128xf32>
    %cst_415 = arith.constant dense<0.000000e+00> : vector<128xf32>
    %354 = vector.multi_reduction <add>, %353, %cst_415 [0] : vector<12x128xf32> to vector<128xf32>
    %355 = vector.shape_cast %354 : vector<128xf32> to vector<1x128xf32>
    %356 = arith.addf %321, %355 : vector<1x128xf32>
    %cst_416 = arith.constant 0.0833333358 : f32
    %357 = vector.broadcast %cst_416 : f32 to vector<1x128xf32>
    %358 = arith.mulf %352, %357 : vector<1x128xf32>
    %cst_417 = arith.constant 1.200000e+01 : f32
    %359 = vector.broadcast %cst_417 : f32 to vector<1x128xf32>
    %360 = arith.mulf %359, %358 : vector<1x128xf32>
    %361 = arith.mulf %360, %358 : vector<1x128xf32>
    %362 = arith.subf %356, %361 : vector<1x128xf32>
    %cst_418 = arith.constant 0.0909090936 : f32
    %363 = vector.broadcast %cst_418 : f32 to vector<1x128xf32>
    %364 = arith.mulf %362, %363 : vector<1x128xf32>
    %cst_419 = arith.constant 0.000000e+00 : f32
    %365 = vector.broadcast %cst_419 : f32 to vector<1x128xf32>
    %366 = arith.maximumf %364, %365 : vector<1x128xf32>
    %367 = math.sqrt %366 : vector<1x128xf32>
    %c1_420 = arith.constant 1 : index
    %c0_421 = arith.constant 0 : index
    %368 = vector.load %arg12[%c1_420, %c0_421] : memref<2x128xf32, #tpu.memory_space<vmem>>, vector<1x128xf32>
    tpu.vector_store %arg12[%c1_420, %c0_421], %358 {strides = array<i32>} : memref<2x128xf32, #tpu.memory_space<vmem>>, vector<1x128xf32>,
    %c1_422 = arith.constant 1 : index
    %c0_423 = arith.constant 0 : index
    %369 = vector.load %arg13[%c1_422, %c0_423] : memref<2x128xf32, #tpu.memory_space<vmem>>, vector<1x128xf32>
    tpu.vector_store %arg13[%c1_422, %c0_423], %367 {strides = array<i32>} : memref<2x128xf32, #tpu.memory_space<vmem>>, vector<1x128xf32>,
    %c0_424 = arith.constant 0 : index
    %c0_425 = arith.constant 0 : index
    %370 = vector.load %arg12[%c0_424, %c0_425] : memref<2x128xf32, #tpu.memory_space<vmem>>, vector<2x128xf32>
    %371 = arith.truncf %370 : vector<2x128xf32> to vector<2x128xbf16>
    %c0_426 = arith.constant 0 : index
    %c0_427 = arith.constant 0 : index
    %372 = vector.load %arg5[%c0_426, %c0_427] : memref<128x128xbf16, #tpu.memory_space<vmem>>, vector<128x128xbf16>
    %cst_428 = arith.constant dense<0.000000e+00> : vector<2x128xf32>
    %373 = tpu.matmul %371, %372, %cst_428 {dimension_numbers = #tpu.dot_dimension_numbers<[1], [0], [0], [1], [0, 0, 1, 1], [], []>} : vector<2x128xbf16>, vector<128x128xbf16>, vector<2x128xf32> -> vector<2x128xf32>
    %c0_429 = arith.constant 0 : index
    %c0_430 = arith.constant 0 : index
    %374 = vector.load %arg13[%c0_429, %c0_430] : memref<2x128xf32, #tpu.memory_space<vmem>>, vector<2x128xf32>
    %375 = arith.truncf %374 : vector<2x128xf32> to vector<2x128xbf16>
    %c0_431 = arith.constant 0 : index
    %c0_432 = arith.constant 0 : index
    %376 = vector.load %arg6[%c0_431, %c0_432] : memref<128x128xbf16, #tpu.memory_space<vmem>>, vector<128x128xbf16>
    %cst_433 = arith.constant dense<0.000000e+00> : vector<2x128xf32>
    %377 = tpu.matmul %375, %376, %cst_433 {dimension_numbers = #tpu.dot_dimension_numbers<[1], [0], [0], [1], [0, 0, 1, 1], [], []>} : vector<2x128xbf16>, vector<128x128xbf16>, vector<2x128xf32> -> vector<2x128xf32>
    %378 = arith.addf %373, %377 : vector<2x128xf32>
    %c0_434 = arith.constant 0 : index
    %c0_435 = arith.constant 0 : index
    %379 = vector.load %arg7[%c0_434, %c0_435] : memref<1x128xf32, #tpu.memory_space<vmem>>, vector<1x128xf32>
    %380 = vector.broadcast %379 : vector<1x128xf32> to vector<2x128xf32>
    %381 = arith.addf %378, %380 : vector<2x128xf32>
    %cst_436 = arith.constant 0.000000e+00 : f32
    %382 = vector.broadcast %cst_436 : f32 to vector<2x128xf32>
    %383 = arith.maximumf %381, %382 : vector<2x128xf32>
    %384 = arith.truncf %383 : vector<2x128xf32> to vector<2x128xbf16>
    %c0_437 = arith.constant 0 : index
    %c0_438 = arith.constant 0 : index
    %385 = vector.load %arg8[%c0_437, %c0_438] : memref<128x128xbf16, #tpu.memory_space<vmem>>, vector<128x128xbf16>
    %cst_439 = arith.constant dense<0.000000e+00> : vector<2x128xf32>
    %386 = tpu.matmul %384, %385, %cst_439 {dimension_numbers = #tpu.dot_dimension_numbers<[1], [0], [0], [1], [0, 0, 1, 1], [], []>} : vector<2x128xbf16>, vector<128x128xbf16>, vector<2x128xf32> -> vector<2x128xf32>
    %c0_440 = arith.constant 0 : index
    %c0_441 = arith.constant 0 : index
    %387 = vector.load %arg9[%c0_440, %c0_441] : memref<1x128xf32, #tpu.memory_space<vmem>>, vector<1x128xf32>
    %388 = vector.broadcast %387 : vector<1x128xf32> to vector<2x128xf32>
    %389 = arith.addf %386, %388 : vector<2x128xf32>
    %c0_442 = arith.constant 0 : index
    %c0_443 = arith.constant 0 : index
    %c0_444 = arith.constant 0 : index
    %390 = vector.load %arg10[%c0_442, %c0_443, %c0_444] : memref<1x2x128xf32, #tpu.memory_space<vmem>>, vector<1x2x128xf32>
    %391 = vector.shape_cast %390 : vector<1x2x128xf32> to vector<2x128xf32>
    %392 = vector.shape_cast %389 : vector<2x128xf32> to vector<1x2x128xf32>
    tpu.vector_store %arg10[%c0_442, %c0_443, %c0_444], %392 {strides = array<i32>} : memref<1x2x128xf32, #tpu.memory_space<vmem>>, vector<1x2x128xf32>,
    return
  }
  func.func @transform_0(%arg0: i32) -> (i32, i32, i32) {
    %c0_i32 = arith.constant 0 : i32
    %c0_i32_0 = arith.constant 0 : i32
    %c0_i32_1 = arith.constant 0 : i32
    return %arg0, %c0_i32, %c0_i32_0 : i32, i32, i32
  }
  func.func @transform_1(%arg0: i32) -> (i32, i32, i32) {
    %c0_i32 = arith.constant 0 : i32
    %c0_i32_0 = arith.constant 0 : i32
    %c0_i32_1 = arith.constant 0 : i32
    %c0_i32_2 = arith.constant 0 : i32
    return %c0_i32, %c0_i32_0, %c0_i32_1 : i32, i32, i32
  }
  func.func @transform_2(%arg0: i32) -> (i32, i32, i32, i32) {
    %c0_i32 = arith.constant 0 : i32
    %c0_i32_0 = arith.constant 0 : i32
    %c0_i32_1 = arith.constant 0 : i32
    %c0_i32_2 = arith.constant 0 : i32
    %c0_i32_3 = arith.constant 0 : i32
    return %c0_i32, %c0_i32_0, %c0_i32_1, %c0_i32_2 : i32, i32, i32, i32
  }
  func.func @transform_3(%arg0: i32) -> (i32, i32, i32) {
    %c0_i32 = arith.constant 0 : i32
    %c0_i32_0 = arith.constant 0 : i32
    %c0_i32_1 = arith.constant 0 : i32
    %c0_i32_2 = arith.constant 0 : i32
    return %c0_i32, %c0_i32_0, %c0_i32_1 : i32, i32, i32
  }
  func.func @transform_4(%arg0: i32) -> (i32, i32) {
    %c0_i32 = arith.constant 0 : i32
    %c0_i32_0 = arith.constant 0 : i32
    %c0_i32_1 = arith.constant 0 : i32
    return %c0_i32, %c0_i32_0 : i32, i32
  }
  func.func @transform_5(%arg0: i32) -> (i32, i32) {
    %c0_i32 = arith.constant 0 : i32
    %c0_i32_0 = arith.constant 0 : i32
    %c0_i32_1 = arith.constant 0 : i32
    return %c0_i32, %c0_i32_0 : i32, i32
  }
  func.func @transform_6(%arg0: i32) -> (i32, i32) {
    %c0_i32 = arith.constant 0 : i32
    %c0_i32_0 = arith.constant 0 : i32
    %c0_i32_1 = arith.constant 0 : i32
    return %c0_i32, %c0_i32_0 : i32, i32
  }
  func.func @transform_7(%arg0: i32) -> (i32, i32) {
    %c0_i32 = arith.constant 0 : i32
    %c0_i32_0 = arith.constant 0 : i32
    %c0_i32_1 = arith.constant 0 : i32
    return %c0_i32, %c0_i32_0 : i32, i32
  }
  func.func @transform_8(%arg0: i32) -> (i32, i32) {
    %c0_i32 = arith.constant 0 : i32
    %c0_i32_0 = arith.constant 0 : i32
    %c0_i32_1 = arith.constant 0 : i32
    return %c0_i32, %c0_i32_0 : i32, i32
  }
  func.func @transform_9(%arg0: i32) -> (i32, i32, i32) {
    %c0_i32 = arith.constant 0 : i32
    %c0_i32_0 = arith.constant 0 : i32
    %c0_i32_1 = arith.constant 0 : i32
    return %arg0, %c0_i32, %c0_i32_0 : i32, i32, i32
  }
}

</mosaic_0001>

<bundles_post_ra>
// kernel: xvector_forward.1
= control target key start
LH: loop header
LB: loop body
LE: loop exit
PB: predicated region body
PF: predicated region fallthrough
CT: control target
= control target key end

     0   :  { %14 = vsyncpa [#allocation6], 0  ;;  %s10606_s0 = inlined_call_operand.vmem [shape: bf16[4,32,128], index: 0, kind: input, shape index: {}]   ;;  %s10607_s1 = inlined_call_operand.hbm [shape: bf16[5,128,128], index: 1, kind: input, shape index: {}]   ;;  %s10608_s2 = inlined_call_operand.hbm [shape: bf16[4,5,128,128], index: 2, kind: input, shape index: {}]   ;;  %s10609_s3 = inlined_call_operand.vmem [shape: f32[5,1,128], index: 3, kind: input, shape index: {}]   ;;  %s10610_s4 = inlined_call_operand.vmem [shape: bf16[128,128], index: 4, kind: input, shape index: {}]   ;;  %s10611_s5 = inlined_call_operand.vmem [shape: bf16[128,128], index: 5, kind: input, shape index: {}]   ;;  %s10612_s6 = inlined_call_operand.vmem [shape: f32[1,128], index: 6, kind: input, shape index: {}]   ;;  %s10613_s7 = inlined_call_operand.vmem [shape: bf16[128,128], index: 7, kind: input, shape index: {}]   ;;  %s10614_s8 = inlined_call_operand.vmem [shape: f32[1,128], index: 8, kind: input, shape index: {}]   ;;  %s10615_s9 = inlined_call_operand.hbm [shape: f32[2,2,128], index: 9, kind: output, shape index: {}]  }
   0x1   :  { %15 = vsyncpa [#allocation9], 0 }
   0x2   :  { %16 = vsyncpa [#allocation7], 0 }
   0x3   :  { %18 = vsyncpa [#allocation7 + $0x1], 0  ;;  %s9910_s30 = smov 0   ;;  %s9912_s10 = smov 0  }
   0x4   :  { %s9914_s11 = smov 0   ;;  %s9916_s12 = smov 0  }
   0x5 LB: > { %10622 = sst [smem:[#allocation14_spill]] %s9847_s11  ;;  %s9931_s13 = sadd.s32 4294967295, %s9851_s12   ;;  %s9851_s12 = sphi %s9916_s12, %s10636_s12   ;;  %s9847_s11 = sphi %s9914_s11, %s10638_s11   ;;  %s9843_s10 = sphi %s9912_s10, %s10640_s10   ;;  %s9839_s30 = sphi %s9910_s30, %s10639_s30  }
   0x6   : > { %s7141_s14 = sadd.s32 4294967294, %s9851_s12   ;;  %s9935_s15 = sadd.s32 1, %s9851_s12  }
   0x7   : > { %10623 = sst [smem:[#allocation15_spill]] %s9935_s15  ;;  %s225_s16 = sadd.s32 1, %s9847_s11 }
   0x8   : > { %s222_s17 = ssub.s32 %s9851_s12, %s9935_s15  ;;  %p235_p0 = scmp.ne.s32.totalorder %s9847_s11, %s9843_s10 }
   0x9   : > { %p223_p1 = scmp.eq.s32.totalorder %s222_s17, 0  ;;  %p236_p2 = scmp.eq.s32.totalorder %s9931_s13, 1 }
   0xa   : > { %p241_p3 = scmp.ne.s32.totalorder %s9843_s10, %s9839_s30  ;;  %p242_p4 = scmp.eq.s32.totalorder %s7141_s14, 1 }
   0xb   : > { %s9946_s18 = scalar_select %p223_p1, %s9847_s11, %s225_s16  }
   0xc   : > { %p9948_p5 = por %p236_p2, %p235_p0  ;;  %p9952_p6 = por %p242_p4, %p241_p3 }
   0xd   : > { %10624 = sst [smem:[#allocation16_spill]] %s9946_s18  ;;  %p7142_p7 = scmp.ge.s32.totalorder %s9851_s12, 1 }
   0xe   : > { %s10625_s19 = scalar_select %p9948_p5, 1, 0 }
   0xf   : > { %s10626_s20 = scalar_select %p9952_p6, 1, 0 }
  0x10   : > { %p249_p8 = scmp.lt.s32.totalorder %s9851_s12, 3  ;;  %p10616_p9 = scmp.eq.s32.totalorder %s9931_s13, 0 }
  0x11   : > { %s9853_s22 = smov [#allocation5]   ;;  %s9854_s25 = smov [#allocation8]  }
  0x12   : > { %p9959_p10 = pnand %p7142_p7, %p249_p8  ;;  %s261_s23 = sshll.u32 %s9853_s22, 4  ;;  %s262_s23 = int_to_ptr.vmem [resolvable:$true] %s261_s23 }
  0x13   : > { %s274_s26 = sshll.u32 %s9854_s25, 4  ;;  %s9725_s29 = scalar_lea.hbm %s10607_s1, 5120  ;;  %s9971_s26 = int_to_ptr.vmem [resolvable:$true] %s274_s26 }
  0x14   : > { %s10627_s21 = scalar_select %p9959_p10, 1, 0 }
  0x15   : > { %p9231_p11 = pneg %p9959_p10  ;;  %p9726_p13 = scmp.ne.s32.totalorder %s10607_s1, %s9725_s29 }
  0x16   : > { %p9732_p3 = scmp.lt.u32.totalorder %s9725_s29, %s10607_s1 }
  0x17   : > { %p9967_p12 = pnand %p10616_p9, %p9231_p11 }
  0x19   : > { %p9727_p0 = pneg %p9967_p12 }
  0x1b   : > { %p9728_p1 = pnand %p9727_p0, %p9726_p13 }
  0x1d   : > { %p9729_p2 = pneg %p9728_p1 }
  0x1f   : > { %p9734_p4 = pnand %p9732_p3, %p9729_p2 }
  0x21   : > { %9737 = shalt.err (!%p9734_p4)
}
  0x22   : > { %s9738_s25 = scalar_lea.vmem %s262_s23, 5120  ;;  %p9746_p9 = scmp.lt.s32.totalorder %s262_s23, %s262_s23 }
  0x23   : > { %p9739_p7 = scmp.ne.s32.totalorder %s262_s23, %s9738_s25  ;;  %p9747_p6 = scmp.lt.s32.totalorder %s9738_s25, %s9738_s25 }
  0x25   : > { %p9741_p8 = pnand %p9739_p7, %p9727_p0  ;;  %p9748_p5 = por %p9747_p6, %p9746_p9 }
  0x27   : > { %p9742_p11 = pneg %p9741_p8 }
  0x29   : > { %p9749_p10 = pnand %p9748_p5, %p9742_p11 }
  0x2b   : > { %9752 = shalt.err (!%p9749_p10)
}
  0x2c   : > { %s9855_s27 = smov 64   ;;  %s9856_s28 = smov 4  }
  0x2d   : > { %9234 = dma.hbm_to_vmem [thread:$0]  (!%p9967_p12), %s10607_s1, 5120, %s262_s23, [#allocation6], %s9855_s27, %s9855_s27, %s9856_s28  }
  0x2e   : > { %s9753_s22 = scalar_lea.hbm %s10608_s2, 20480 }
  0x2f   : > { %p9754_p13 = scmp.ne.s32.totalorder %s10608_s2, %s9753_s22  ;;  %p9760_p9 = scmp.lt.u32.totalorder %s9753_s22, %s10608_s2 }
  0x31   : > { %p9756_p5 = pnand %p9754_p13, %p9727_p0 }
  0x33   : > { %p9757_p6 = pneg %p9756_p5 }
  0x35   : > { %p9762_p10 = pnand %p9760_p9, %p9757_p6 }
  0x37   : > { %9765 = shalt.err (!%p9762_p10)
}
  0x38   : > { %s9766_s23 = scalar_lea.vmem %s9971_s26, 20480  ;;  %p9774_p4 = scmp.lt.s32.totalorder %s9971_s26, %s9971_s26 }
  0x39   : > { %p9767_p1 = scmp.ne.s32.totalorder %s9971_s26, %s9766_s23  ;;  %p9775_p7 = scmp.lt.s32.totalorder %s9766_s23, %s9766_s23 }
  0x3b   : > { %p9769_p2 = pnand %p9767_p1, %p9727_p0  ;;  %p9776_p8 = por %p9775_p7, %p9774_p4 }
  0x3d   : > { %p9770_p3 = pneg %p9769_p2 }
  0x3f   : > { %p9777_p11 = pnand %p9776_p8, %p9770_p3 }
  0x41   : > { %9780 = shalt.err (!%p9777_p11)
}
  0x42   : > { %9237 = dma.hbm_to_vmem [thread:$0]  (!%p9967_p12), %s10608_s2, 20480, %s9971_s26, [#allocation9], %s9855_s27, %s9855_s27, %s9856_s28  }
  0x43   : > { %p10629_p13 = scmp.ne.s32.totalorder %s10627_s21, 0 }
  0x44   : > { %p10630_p5 = scmp.eq.s32.totalorder (!%p10629_p13), %s9931_s13, 0 }
  0x45   : > { %318 = sbr.rel (%p10629_p13) target bundleno = 3601 (0xe11), region = 56 }
  0x4c   : > { %9826 = dma.done.wait (%p10630_p5), [#allocation6], 5120   ;;  %p10631_p0 = pmov %p10630_p5 }
  0x4e   : > { %9828 = vsyncadd (%p10631_p0), [#allocation6], 4294962176  ;;  %p10632_p6 = pmov %p10631_p0 }
  0x4f   : > { %p10633_p9 = pmov %p10631_p0 }
  0x50   : > { %9830 = dma.done.wait (%p10632_p6), [#allocation9], 20480  }
  0x51   : > { %9832 = vsyncadd (%p10633_p9), [#allocation9], 4294946816  ;;  %s7150_s18 = sshll.u32 %s9931_s13, 1  ;;  %v9285_v0 = vld [vmem:[#allocation5 + $0x40] sm:$0xff]   ;;  %v9286_v1 = vld [vmem:[#allocation5 + $0x48] sm:$0xff]   ;;  %vm924_vm1 = vcmask 1045504  }
  0x52   : > { %p360_p10 = scmp.lt.s32.totalorder %s7150_s18, 3  ;;  %8129 = vmatprep.subr.bf16.mxu0 %v9285_v0  ;;  %v9287_v2 = vld [vmem:[#allocation5 + $0x50] sm:$0xff]   ;;  %v9288_v3 = vld [vmem:[#allocation5 + $0x58] sm:$0xff]   ;;  %vm416_vm0 = vsmask.f32 7424  ;;  %v9289_v12 = vld [vmem:[#allocation5 + $0x60] sm:$0xff]  }
  0x53   : > { %8130 = vmatpush3.bf16.msra.mxu0 %v9285_v0  ;;  %v9290_v17 = vld [vmem:[#allocation5 + $0x68] sm:$0xff]   ;;  %v9291_v19 = vld [vmem:[#allocation5 + $0x70] sm:$0xff]   ;;  %v9292_v20 = vld [vmem:[#allocation5 + $0x78] sm:$0xff]   ;;  %vm654_vm2 = vcmask 1046528   ;;  %vm782_vm3 = vsmask.f32 6400 }
  0x54   : > { %s10642_s18 = smov (!%p360_p10, %s7150_s18), 3  ;;  %8131 = vmatprep.subr.bf16.mxu0 %v9286_v1  ;;  %v9295_v22 = vld [vmem:[#allocation5] sm:$0xff]   ;;  %v9296_v24 = vld [vmem:[#allocation5 + $0x8] sm:$0xff]   ;;  %v9297_v28 = vld [vmem:[#allocation5 + $0x10] sm:$0xff]   ;;  %vm9858_vm4 = vmmov 0   ;;  %vm3519_vm5 = vcmask 1043456  }
  0x55   : > { %s7621_s21 = sshll.u32 %s10642_s18, 4  ;;  %v9298_v31 = vld [vmem:[#allocation5 + $0x18] sm:$0xff]   ;;  %v9299_v36 = vld [vmem:[#allocation5 + $0x20] sm:$0xff]   ;;  %v9332_v43 = vld [vmem:[#allocation8 + $0x48] sm:$0xff]   ;;  %s356_s18 = sand.u32 1, %s9843_s10  }
  0x56   : > { %s10034_s27 = scalar_lea.vmem %s10606_s0, %s7621_s21  ;;  %v9331_v42 = vld [vmem:[#allocation8 + $0x40] sm:$0xff]   ;;  %v9300_v48 = vld [vmem:[#allocation5 + $0x28] sm:$0xff]   ;;  %v9301_v50 = vld [vmem:[#allocation5 + $0x30] sm:$0xff]   ;;  %s7149_s21 = sshll.u32 %s356_s18, 1 }
  0x57   : > { %8132 = vmatpush3.bf16.msra.mxu0 %v9286_v1  ;;  %v368_v4 = vld [vmem:[%s10034_s27] sm:$0xf]  ;;  %v10038_v5 = vld [vmem:[%s10034_s27 + $0x4] sm:$0xf]  ;;  %v10041_v6 = vld [vmem:[%s10034_s27 + $0x8] sm:$0xf]  ;;  %8229 = vmatprep.subr.bf16.mxu1 %v9331_v42 }
  0x58   : > { %8133 = vmatprep.subr.bf16.mxu0 %v9287_v2  ;;  %v388_v7 = vld [vmem:[%s10034_s27 + $0xc] sm:$0x7]  ;;  %v7153_v8 = vcombine.low %v368_v4, %v10038_v5  ;;  %v633_v25 = vld [vmem:[%s10034_s27] sm:$0xe]  ;;  %8230 = vmatpush3.bf16.msra.mxu1 %v9331_v42  ;;  %v9303_v53 = vld [vmem:[#allocation5 + $0x80] sm:$0xff]   ;;  %s358_s28 = scalar_lea.vmem [#allocation10], %s7149_s21 }
  0x59   : > { %v10046_v9 = vcombine.low %v10041_v6, %v388_v7  ;;  %v761_v26 = vld [vmem:[%s10034_s27 + $0xc] sm:$0xf]  ;;  %v7172_v27 = vcombine.low %v633_v25, %v10038_v5  ;;  %v903_v39 = vld [vmem:[%s10034_s27] sm:$0xc]  ;;  %8231 = vmatprep.subr.bf16.mxu1 %v9332_v43  ;;  %v9306_v57 = vld [vmem:[#allocation5 + $0x90] sm:$0xff]   ;;  %s7060_s29 = sshll.u32 %s358_s28, 4  ;;  %s10566_s29 = int_to_ptr.vmem [resolvable:$true] %s7060_s29 }
  0x5a   : > { %v418_v10 = vshrl.u32 %v7153_v8, 16  ;;  %v420_v11 = vshll.u32 %v7153_v8, 16  ;;  %v10055_v29 = vcombine.low %v10041_v6, %v761_v26  ;;  %v7190_v40 = vcombine.low %v903_v39, %v10038_v5  ;;  %v9302_v51 = vld [vmem:[#allocation5 + $0x38] sm:$0xff]   ;;  %v9305_v55 = vld [vmem:[#allocation5 + $0x88] sm:$0xff]   ;;  %v9308_v59 = vld [vmem:[#allocation5 + $0xa0] sm:$0xff]   ;;  %s7047_s22 = scalar_lea.sflag [#allocation7], %s356_s18 }
  0x5b   : > { %8134 = vmatpush3.bf16.msra.mxu0 %v9287_v2  ;;  %v425_v13 = vshll.u32 %v10046_v9, 16  ;;  %v429_v21 = vshrl.u32 %v10046_v9, 16  ;;  %v784_v30 = vshrl.u32 %v7172_v27, 16  ;;  %v656_v32 = vrot.slane %v10046_v9, 1  ;;  %v371_v52 = vld [vmem:[%s10034_s27 + $0xc] sm:$0x3] }
  0x5c   : > { %8135 = vmatprep.subr.bf16.mxu0 %v9288_v3  ;;  %v422_v14 = vrot.slane %v420_v11, 1  ;;  %v787_v33 = vshll.u32 %v7172_v27, 16  ;;  %v792_v34 = vshrl.u32 %v10055_v29, 16  ;;  %v795_v35 = vshll.u32 %v10055_v29, 16  ;;  %8232 = vmatpush3.bf16.msra.mxu1 %v9332_v43  ;;  %v9307_v58 = vld [vmem:[#allocation5 + $0x98] sm:$0xff]   ;;  %v9309_v60 = vld [vmem:[#allocation5 + $0xa8] sm:$0xff]  }
  0x5d   : > { %v427_v15 = vrot.slane %v425_v13, 1  ;;  %v655_v37 = vrot.slane %v7172_v27, 1  ;;  %v10060_v38 = vrot.slane %v784_v30, 1  ;;  %v926_v41 = vrot.slane %v10055_v29, 2  ;;  %v9310_v61 = vld [vmem:[#allocation5 + $0xb0] sm:$0xff]   ;;  %v9311_v62 = vld [vmem:[#allocation5 + $0xb8] sm:$0xff]  }
  0x5e   : > { %v423_v16 = vor.u32 %v422_v14, %v418_v10  ;;  %v789_v44 = vrot.slane %v787_v33, 2  ;;  %v794_v45 = vrot.slane %v792_v34, 1  ;;  %v797_v46 = vrot.slane %v795_v35, 2  ;;  %v9313_v63 = vld [vmem:[#allocation5 + $0xc0] sm:$0xff]   ;;  %v9314_v2 = vld [vmem:[#allocation5 + $0xc8] sm:$0xff]   ;;  %v9315_v4 = vld [vmem:[#allocation5 + $0xd0] sm:$0xff]  }
  0x5f   : > { %8136 = vmatpush3.bf16.msra.mxu0 %v9288_v3  ;;  %v431_v23 = vor.u32 %v429_v21, %v427_v15  ;;  %v925_v47 = vrot.slane %v7190_v40, 2  ;;  %v7163_v54 = vcombine.low %v10041_v6, %v371_v52  ;;  %v657_v56 = vsel %vm654_vm2, %v655_v37, %v656_v32  ;;  %v9316_v5 = vld [vmem:[#allocation5 + $0xd8] sm:$0xff]   ;;  %v9317_v6 = vld [vmem:[#allocation5 + $0xe0] sm:$0xff]   ;;  %v9318_v7 = vld [vmem:[#allocation5 + $0xe8] sm:$0xff]   ;;  %p10634_p1 = scmp.ne.s32.totalorder %s10625_s19, 0  ;;  %s9859_s25 = smov [#allocation10]  }
  0x60   : > { %8137 = vmatprep.subr.bf16.mxu0 %v9289_v12  ;;  %v428_v18 = vsel %vm416_vm0, %v423_v16, %v427_v15  ;;  %v790_v0 = vor.u32 %v789_v44, %v10060_v38  ;;  %v798_v1 = vor.u32 %v797_v46, %v794_v45  ;;  %v9320_v10 = vld [vmem:[#allocation5 + $0xf8] sm:$0xff]   ;;  %v9322_v9 = vld [vmem:[#allocation5 + $0x100] sm:$0xff]   ;;  %v9323_v11 = vld [vmem:[#allocation5 + $0x108] sm:$0xff]   ;;  %s9785_s23 = sshll.u32 %s9859_s25, 4  ;;  %s9786_s23 = int_to_ptr.vmem [resolvable:$false] %s9785_s23 }
  0x61   : > { %8145 = vmatprep.mubr.bf16.mxu0 %v428_v18  ;;  %v10068_v49 = vsel %vm924_vm1, %v925_v47, %v926_v41  ;;  %v9325_v13 = vld [vmem:[#allocation5 + $0x118] sm:$0xff]   ;;  %v9326_v14 = vld [vmem:[#allocation5 + $0x120] sm:$0xff]   ;;  %v9327_v15 = vld [vmem:[#allocation5 + $0x128] sm:$0xff]   ;;  %s9787_s11 = scalar_lea.vmem %s9786_s23, 64  ;;  %p9788_p4 = scmp.lt.s32.totalorder %s10566_s29, %s9786_s23 }
  0x62   : > { %v799_v3 = vsel %vm782_vm3, %v790_v0, %v798_v1  ;;  %v9328_v16 = vld [vmem:[#allocation5 + $0x130] sm:$0xff]   ;;  %v9336_v21 = vld [vmem:[#allocation8 + $0x68] sm:$0xff]   ;;  %v9342_v52 = vld [vmem:[#allocation8 + $0x18] sm:$0xff]  }
  0x63   : > { %8138 = vmatpush3.bf16.msra.mxu0 %v9289_v12  ;;  %v9324_v12 = vld [vmem:[#allocation5 + $0x110] sm:$0xff]   ;;  %v7199_v25 = vld [vmem:[%s10609_s3] ss:$0 sm:$0xff] }
  0x64   : > { %8139 = vmatprep.subr.bf16.mxu0 %v9290_v17  ;;  %v9333_v18 = vld [vmem:[#allocation8 + $0x50] sm:$0xff]  }
  0x65   : > { %8233 = vmatprep.subr.bf16.mxu1 %v9333_v18  ;;  %v9349_v0 = vld [vmem:[#allocation8 + $0x90] sm:$0xff]  }
  0x66   : > { %8234 = vmatpush3.bf16.msra.mxu1 %v9333_v18  ;;  %v9356_v18 = vld [vmem:[#allocation8 + $0xc8] sm:$0xff]  }
  0x67   : > { %8140 = vmatpush3.bf16.msra.mxu0 %v9290_v17  ;;  %v9329_v17 = vld [vmem:[#allocation5 + $0x138] sm:$0xff]  }
  0x68   : > { %8141 = vmatprep.subr.bf16.mxu0 %v9291_v19 }
  0x6b   : > { %8142 = vmatpush3.bf16.msra.mxu0 %v9291_v19  ;;  %v9334_v19 = vld [vmem:[#allocation8 + $0x58] sm:$0xff]  }
  0x6c   : > { %8143 = vmatprep.subr.bf16.mxu0 %v9292_v20  ;;  %8235 = vmatprep.subr.bf16.mxu1 %v9334_v19 }
  0x6d   : > { %8236 = vmatpush3.bf16.msra.mxu1 %v9334_v19 }
  0x6f   : > { %8144 = vmatpush3.bf16.msra.mxu0 %v9292_v20  ;;  %v9335_v20 = vld [vmem:[#allocation8 + $0x60] sm:$0xff]  }
  0x70   : > { %8149 = vmatprep.subr.bf16.mxu0 %v9295_v22  ;;  %8237 = vmatprep.subr.bf16.mxu1 %v9335_v20 }
  0x71   : > { %8238 = vmatpush3.bf16.msra.mxu1 %v9335_v20  ;;  %v9357_v20 = vld [vmem:[#allocation8 + $0xd0] sm:$0xff]  }
  0x72   : > { %8146 = vmatmul.mubr.bf16.vlgmr.msra.gmra.mrb[0].mxu0 %v431_v23  ;;  %8239 = vmatprep.subr.bf16.mxu1 %v9336_v21  ;;  %v9338_v23 = vld [vmem:[#allocation8 + $0x78] sm:$0xff]  }
  0x73   : > { %8150 = vmatpush3.bf16.msra.mxu0 %v9295_v22  ;;  %8165 = vmatprep.mubr.bf16.mxu0 %v7153_v8  ;;  %v9319_v8 = vld [vmem:[#allocation5 + $0xf0] sm:$0xff]  }
  0x74   : > { %8151 = vmatprep.subr.bf16.mxu0 %v9296_v24  ;;  %v9337_v22 = vld [vmem:[#allocation8 + $0x70] sm:$0xff]  }
  0x75   : > { %8240 = vmatpush3.bf16.msra.mxu1 %v9336_v21  ;;  %v9358_v21 = vld [vmem:[#allocation8 + $0xd8] sm:$0xff]  }
  0x76   : > { %8241 = vmatprep.subr.bf16.mxu1 %v9337_v22 }
  0x77   : > { %8152 = vmatpush3.bf16.msra.mxu0 %v9296_v24  ;;  %v9339_v24 = vld [vmem:[#allocation8] sm:$0xff]  }
  0x78   : > { %8153 = vmatprep.subr.bf16.mxu0 %v9297_v28 }
  0x79   : > { %8242 = vmatpush3.bf16.msra.mxu1 %v9337_v22  ;;  %v9359_v22 = vld [vmem:[#allocation8 + $0xe0] sm:$0xff]  }
  0x7a   : > { %8243 = vmatprep.subr.bf16.mxu1 %v9338_v23 }
  0x7b   : > { %8154 = vmatpush3.bf16.msra.mxu0 %v9297_v28 }
  0x7c   : > { %8155 = vmatprep.subr.bf16.mxu0 %v9298_v31 }
  0x7d   : > { %8244 = vmatpush3.bf16.msra.mxu1 %v9338_v23  ;;  %v9360_v23 = vld [vmem:[#allocation8 + $0xe8] sm:$0xff]  }
  0x7e   : > { %8249 = vmatprep.subr.bf16.mxu1 %v9339_v24 }
  0x7f   : > { %8156 = vmatpush3.bf16.msra.mxu0 %v9298_v31 }
  0x80   : > { %8157 = vmatprep.subr.bf16.mxu0 %v9299_v36 }
  0x83   : > { %8158 = vmatpush3.bf16.msra.mxu0 %v9299_v36 }
  0x84   : > { %8159 = vmatprep.subr.bf16.mxu0 %v9300_v48 }
  0x87   : > { %8160 = vmatpush3.bf16.msra.mxu0 %v9300_v48 }
  0x88   : > { %8161 = vmatprep.subr.bf16.mxu0 %v9301_v50 }
  0x8b   : > { %8162 = vmatpush3.bf16.msra.mxu0 %v9301_v50  ;;  %v9340_v50 = vld [vmem:[#allocation8 + $0x8] sm:$0xff]  }
  0x8c   : > { %8163 = vmatprep.subr.bf16.mxu0 %v9302_v51 }
  0x8f   : > { %8164 = vmatpush3.bf16.msra.mxu0 %v9302_v51  ;;  %v9341_v51 = vld [vmem:[#allocation8 + $0x10] sm:$0xff]  }
  0x90   : > { %8169 = vmatprep.subr.bf16.mxu0 %v9303_v53 }
  0x92   : > { %8166 = vmatmul.mubr.bf16.vlgmr.msra.gmra.mrb[0].mxu0 %v7163_v54  ;;  %v9344_v54 = vld [vmem:[#allocation8 + $0x28] sm:$0xff]  }
  0x93   : > { %8170 = vmatpush3.bf16.msra.mxu0 %v9303_v53  ;;  %8185 = vmatprep.mubr.bf16.mxu0 %v657_v56  ;;  %v9343_v53 = vld [vmem:[#allocation8 + $0x20] sm:$0xff]   ;;  %v9346_v56 = vld [vmem:[#allocation8 + $0x38] sm:$0xff]  }
  0x94   : > { %8171 = vmatprep.subr.bf16.mxu0 %v9305_v55 }
  0x97   : > { %8172 = vmatpush3.bf16.msra.mxu0 %v9305_v55  ;;  %v9345_v55 = vld [vmem:[#allocation8 + $0x30] sm:$0xff]  }
  0x98   : > { %8173 = vmatprep.subr.bf16.mxu0 %v9306_v57 }
  0x9b   : > { %8174 = vmatpush3.bf16.msra.mxu0 %v9306_v57 }
  0x9c   : > { %8175 = vmatprep.subr.bf16.mxu0 %v9307_v58 }
  0x9f   : > { %8176 = vmatpush3.bf16.msra.mxu0 %v9307_v58  ;;  %v9347_v58 = vld [vmem:[#allocation8 + $0x80] sm:$0xff]  }
  0xa0   : > { %8177 = vmatprep.subr.bf16.mxu0 %v9308_v59 }
  0xa3   : > { %8178 = vmatpush3.bf16.msra.mxu0 %v9308_v59 }
  0xa4   : > { %8179 = vmatprep.subr.bf16.mxu0 %v9309_v60 }
  0xa7   : > { %8180 = vmatpush3.bf16.msra.mxu0 %v9309_v60 }
  0xa8   : > { %8181 = vmatprep.subr.bf16.mxu0 %v9310_v61 }
  0xab   : > { %8182 = vmatpush3.bf16.msra.mxu0 %v9310_v61  ;;  %v9348_v61 = vld [vmem:[#allocation8 + $0x88] sm:$0xff]  }
  0xac   : > { %8183 = vmatprep.subr.bf16.mxu0 %v9311_v62 }
  0xaf   : > { %8184 = vmatpush3.bf16.msra.mxu0 %v9311_v62 }
  0xb0   : > { %8189 = vmatprep.subr.bf16.mxu0 %v9313_v63 }
  0xb2   : > { %8186 = vmatmul.mubr.bf16.vlgmr.msra.gmra.mrb[0].mxu0 %v656_v32 }
  0xb3   : > { %8190 = vmatpush3.bf16.msra.mxu0 %v9313_v63  ;;  %8205 = vmatprep.mubr.bf16.mxu0 %v799_v3  ;;  %v9352_v3 = vld [vmem:[#allocation8 + $0xa8] sm:$0xff]  }
  0xb4   : > { %8191 = vmatprep.subr.bf16.mxu0 %v9314_v2 }
  0xb7   : > { %8192 = vmatpush3.bf16.msra.mxu0 %v9314_v2  ;;  %v9351_v2 = vld [vmem:[#allocation8 + $0xa0] sm:$0xff]  }
  0xb8   : > { %8193 = vmatprep.subr.bf16.mxu0 %v9315_v4 }
  0xbb   : > { %8194 = vmatpush3.bf16.msra.mxu0 %v9315_v4 }
  0xbc   : > { %8195 = vmatprep.subr.bf16.mxu0 %v9316_v5 }
  0xbf   : > { %8196 = vmatpush3.bf16.msra.mxu0 %v9316_v5  ;;  %v9353_v5 = vld [vmem:[#allocation8 + $0xb0] sm:$0xff]  }
  0xc0   : > { %8197 = vmatprep.subr.bf16.mxu0 %v9317_v6 }
  0xc3   : > { %8198 = vmatpush3.bf16.msra.mxu0 %v9317_v6 }
  0xc4   : > { %8199 = vmatprep.subr.bf16.mxu0 %v9318_v7 }
  0xc7   : > { %8200 = vmatpush3.bf16.msra.mxu0 %v9318_v7 }
  0xc8   : > { %8201 = vmatprep.subr.bf16.mxu0 %v9319_v8 }
  0xcb   : > { %8202 = vmatpush3.bf16.msra.mxu0 %v9319_v8 }
  0xcc   : > { %8203 = vmatprep.subr.bf16.mxu0 %v9320_v10 }
  0xcf   : > { %8204 = vmatpush3.bf16.msra.mxu0 %v9320_v10 }
  0xd0   : > { %8209 = vmatprep.subr.bf16.mxu0 %v9322_v9 }
  0xd2   : > { %8206 = vmatmul.mubr.bf16.vlgmr.msra.gmra.mrb[0].mxu0 %v798_v1  ;;  %v9350_v1 = vld [vmem:[#allocation8 + $0x98] sm:$0xff]  }
  0xd3   : > { %8210 = vmatpush3.bf16.msra.mxu0 %v9322_v9  ;;  %8225 = vmatprep.mubr.bf16.mxu0 %v10068_v49  ;;  %v9354_v9 = vld [vmem:[#allocation8 + $0xb8] sm:$0xff]  }
  0xd4   : > { %8211 = vmatprep.subr.bf16.mxu0 %v9323_v11 }
  0xd7   : > { %8212 = vmatpush3.bf16.msra.mxu0 %v9323_v11 }
  0xd8   : > { %8213 = vmatprep.subr.bf16.mxu0 %v9324_v12 }
  0xdb   : > { %8214 = vmatpush3.bf16.msra.mxu0 %v9324_v12 }
  0xdc   : > { %8215 = vmatprep.subr.bf16.mxu0 %v9325_v13 }
  0xdf   : > { %8216 = vmatpush3.bf16.msra.mxu0 %v9325_v13 }
  0xe0   : > { %8217 = vmatprep.subr.bf16.mxu0 %v9326_v14 }
  0xe3   : > { %8218 = vmatpush3.bf16.msra.mxu0 %v9326_v14 }
  0xe4   : > { %8219 = vmatprep.subr.bf16.mxu0 %v9327_v15 }
  0xe7   : > { %8220 = vmatpush3.bf16.msra.mxu0 %v9327_v15  ;;  %v9355_v15 = vld [vmem:[#allocation8 + $0xc0] sm:$0xff]  }
  0xe8   : > { %8221 = vmatprep.subr.bf16.mxu0 %v9328_v16 }
  0xeb   : > { %8222 = vmatpush3.bf16.msra.mxu0 %v9328_v16 }
  0xec   : > { %8223 = vmatprep.subr.bf16.mxu0 %v9329_v17 }
  0xef   : > { %8224 = vmatpush3.bf16.msra.mxu0 %v9329_v17 }
  0xf2   : > { %8226 = vmatmul.mubr.bf16.vlgmr.msra.gmra.mrb[0].mxu0 %v926_v41 }
 0x1c5   : > { %v8227_v26 = vpop.f32.mrb[0].mxu0 }
 0x1c6   : > { %v1039_v27 = vadd.f32 %v8227_v26, %v7199_v25  ;;  %v1012_v28 = vpop.f32.mrb[1].mxu0 }
 0x1c7   : > { %v1037_v29 = vadd.f32 %v7199_v25, %v1012_v28  ;;  %v8228_v30 = vpop.f32.mrb[2].mxu0 }
 0x1c8   : > { %v1040_v31 = vadd.f32 %v8228_v30, %v7199_v25  ;;  %v1015_v32 = vpop.f32.mrb[3].mxu0  ;;  %v1043_v34 = vmax.f32 %v1039_v27, 0.0  ;;  %v9363_v27 = vld [vmem:[#allocation8 + $0x100] sm:$0xff]   ;;  %v9364_v30 = vld [vmem:[#allocation8 + $0x108] sm:$0xff]  }
 0x1c9   : > { %v1038_v33 = vadd.f32 %v7199_v25, %v1015_v32  ;;  %v1041_v36 = vmax.f32 %v1037_v29, 0.0  ;;  %v9362_v25 = vld [vmem:[#allocation8 + $0xf8] sm:$0xff]   ;;  %v9365_v32 = vld [vmem:[#allocation8 + $0x110] sm:$0xff]  }
 0x1ca   : > { %v1044_v35 = vmax.f32 %v1040_v31, 0.0 }
 0x1cb   : > { %v1042_v37 = vmax.f32 %v1038_v33, 0.0  ;;  %v9366_v33 = vld [vmem:[#allocation8 + $0x118] sm:$0xff]  }
 0x1cc   : > { %v1046_v38 = vpack.c.bf16 %v1044_v35, %v1043_v34  ;;  %v9367_v34 = vld [vmem:[#allocation8 + $0x120] sm:$0xff]   ;;  %v9368_v35 = vld [vmem:[#allocation8 + $0x128] sm:$0xff]  }
 0x1cd   : > { %v1045_v39 = vpack.c.bf16 %v1042_v37, %v1041_v36  ;;  %v9369_v36 = vld [vmem:[#allocation8 + $0x130] sm:$0xff]   ;;  %v9370_v37 = vld [vmem:[#allocation8 + $0x138] sm:$0xff]  }
 0x1ce   : > { %1048 = vst [vmem:[#allocation2 + $0x8] sm:$0x3f] %v1046_v38  ;;  %v9371_v38 = vld [vmem:[#allocation8 + $0x140] sm:$0xff]  }
 0x1cf   : > { %1047 = vst [vmem:[#allocation2] sm:$0xff] %v1045_v39  ;;  %v1090_v40 = vshll.u32 %v1045_v39, 16  ;;  %v1088_v43 = vshrl.u32 %v1045_v39, 16 }
 0x1d1   : > { %v1092_v41 = vrot.slane %v1090_v40, 1  ;;  %v9373_v40 = vld [vmem:[#allocation8 + $0x180] sm:$0xff]  }
 0x1d2   : > { %8329 = vmatprep.subr.bf16.mxu0 %v9373_v40 }
 0x1d3   : > { %v1093_v45 = vor.u32 %v1092_v41, %v1088_v43  ;;  %v9375_v41 = vld [vmem:[#allocation8 + $0x188] sm:$0xff]   ;;  %8330 = vmatpush3.bf16.msra.mxu0 %v9373_v40  ;;  %v9376_v43 = vld [vmem:[#allocation8 + $0x158] sm:$0xff]  }
 0x1d4   : > { %8331 = vmatprep.subr.bf16.mxu0 %v9375_v41 }
 0x1d5   : > { %v10085_v42 = vld [vmem:[#allocation2 + $0x8] sm:$0x1f] }
 0x1d6   : > { %v1095_v44 = vshll.u32 %v10085_v42, 16  ;;  %v1099_v47 = vshrl.u32 %v10085_v42, 16  ;;  %v1296_v57 = vld [vmem:[#allocation2] sm:$0xfe]  ;;  %v1317_v60 = vrot.slane %v10085_v42, 1 }
 0x1d7   : > { %v1316_v59 = vrot.slane %v1296_v57, 1  ;;  %v1052_v62 = vld [vmem:[#allocation2 + $0x8] sm:$0xf]  ;;  %v1439_v6 = vshrl.u32 %v1296_v57, 16  ;;  %v1442_v7 = vshll.u32 %v1296_v57, 16  ;;  %8332 = vmatpush3.bf16.msra.mxu0 %v9375_v41  ;;  %v9386_v57 = vld [vmem:[#allocation8 + $0x200] sm:$0xff]  }
 0x1d8   : > { %v1097_v46 = vrot.slane %v1095_v44, 1  ;;  %v10092_v4 = vld [vmem:[#allocation2 + $0x8] sm:$0x3f]  ;;  %v1556_v26 = vld [vmem:[#allocation2] sm:$0xfc] }
 0x1d9   : > { %v1318_v63 = vsel %vm654_vm2, %v1316_v59, %v1317_v60  ;;  %v1447_v8 = vshrl.u32 %v10092_v4, 16  ;;  %v1450_v10 = vshll.u32 %v10092_v4, 16  ;;  %v1441_v11 = vrot.slane %v1439_v6, 1  ;;  %v9374_v42 = vld [vmem:[#allocation8 + $0x150] sm:$0xff]   ;;  %v10099_v59 = vld [vmem:[#allocation8 + $0x1c0] sm:$0xff]  }
 0x1da   : > { %v1098_v48 = vsel %vm416_vm0, %v1093_v45, %v1097_v46  ;;  %v1101_v49 = vor.u32 %v1099_v47, %v1097_v46  ;;  %v1444_v12 = vrot.slane %v1442_v7, 2  ;;  %v1576_v28 = vrot.slane %v1556_v26, 2  ;;  %v9377_v44 = vld [vmem:[#allocation8 + $0x190] sm:$0xff]   ;;  %v9378_v45 = vld [vmem:[#allocation8 + $0x160] sm:$0xff]  }
 0x1db   : > { %8245 = vmatprep.mubr.bf16.mxu1 %v1098_v48  ;;  %v1449_v13 = vrot.slane %v1447_v8, 1  ;;  %v1452_v14 = vrot.slane %v1450_v10, 2  ;;  %v1577_v29 = vrot.slane %v10092_v4, 2  ;;  %8333 = vmatprep.subr.bf16.mxu0 %v9377_v44  ;;  %v9379_v48 = vld [vmem:[#allocation8 + $0x198] sm:$0xff]  }
 0x1dc   : > { %8246 = vmatmul.mubr.bf16.vlgmr.msra.gmra.mrb[0].mxu1 %v1101_v49  ;;  %v1445_v16 = vor.u32 %v1444_v12, %v1441_v11  ;;  %8334 = vmatpush3.bf16.msra.mxu0 %v9377_v44  ;;  %v9390_v44 = vld [vmem:[#allocation8 + $0x210] sm:$0xff]  }
 0x1dd   : > { %8250 = vmatpush3.bf16.msra.mxu1 %v9339_v24  ;;  %8265 = vmatprep.mubr.bf16.mxu1 %v1045_v39  ;;  %v1453_v17 = vor.u32 %v1452_v14, %v1449_v13  ;;  %v9361_v24 = vld [vmem:[#allocation8 + $0xf0] sm:$0xff]   ;;  %v1578_v31 = vsel %vm924_vm1, %v1576_v28, %v1577_v29  ;;  %v9372_v39 = vld [vmem:[#allocation8 + $0x148] sm:$0xff]  }
 0x1de   : > { %8251 = vmatprep.subr.bf16.mxu1 %v9340_v50  ;;  %8335 = vmatprep.subr.bf16.mxu0 %v9379_v48 }
 0x1df   : > { %v1454_v19 = vsel %vm782_vm3, %v1445_v16, %v1453_v17 }
 0x1e0   : > { %8336 = vmatpush3.bf16.msra.mxu0 %v9379_v48 }
 0x1e1   : > { %8252 = vmatpush3.bf16.msra.mxu1 %v9340_v50 }
 0x1e2   : > { %8253 = vmatprep.subr.bf16.mxu1 %v9341_v51 }
 0x1e5   : > { %8254 = vmatpush3.bf16.msra.mxu1 %v9341_v51  ;;  %v9380_v51 = vld [vmem:[#allocation8 + $0x168] sm:$0xff]  }
 0x1e6   : > { %8255 = vmatprep.subr.bf16.mxu1 %v9342_v52 }
 0x1e9   : > { %8256 = vmatpush3.bf16.msra.mxu1 %v9342_v52  ;;  %v9381_v52 = vld [vmem:[#allocation8 + $0x1a0] sm:$0xff]  }
 0x1ea   : > { %8257 = vmatprep.subr.bf16.mxu1 %v9343_v53  ;;  %8337 = vmatprep.subr.bf16.mxu0 %v9381_v52 }
 0x1eb   : > { %8338 = vmatpush3.bf16.msra.mxu0 %v9381_v52 }
 0x1ed   : > { %8258 = vmatpush3.bf16.msra.mxu1 %v9343_v53  ;;  %v9382_v53 = vld [vmem:[#allocation8 + $0x170] sm:$0xff]  }
 0x1ee   : > { %8259 = vmatprep.subr.bf16.mxu1 %v9344_v54 }
 0x1f1   : > { %8260 = vmatpush3.bf16.msra.mxu1 %v9344_v54  ;;  %v9383_v54 = vld [vmem:[#allocation8 + $0x1a8] sm:$0xff]  }
 0x1f2   : > { %8261 = vmatprep.subr.bf16.mxu1 %v9345_v55  ;;  %8339 = vmatprep.subr.bf16.mxu0 %v9383_v54 }
 0x1f3   : > { %8340 = vmatpush3.bf16.msra.mxu0 %v9383_v54 }
 0x1f5   : > { %8262 = vmatpush3.bf16.msra.mxu1 %v9345_v55  ;;  %v9384_v55 = vld [vmem:[#allocation8 + $0x178] sm:$0xff]  }
 0x1f6   : > { %8263 = vmatprep.subr.bf16.mxu1 %v9346_v56 }
 0x1f9   : > { %8264 = vmatpush3.bf16.msra.mxu1 %v9346_v56  ;;  %v9385_v56 = vld [vmem:[#allocation8 + $0x1b0] sm:$0xff]  }
 0x1fa   : > { %8269 = vmatprep.subr.bf16.mxu1 %v9347_v58  ;;  %8341 = vmatprep.subr.bf16.mxu0 %v9385_v56 }
 0x1fb   : > { %8342 = vmatpush3.bf16.msra.mxu0 %v9385_v56  ;;  %v9391_v56 = vld [vmem:[#allocation8 + $0x1c8] sm:$0xff]  }
 0x1fc   : > { %8266 = vmatmul.mubr.bf16.vlgmr.msra.gmra.mrb[4].mxu1 %v1052_v62 }
 0x1fd   : > { %8270 = vmatpush3.bf16.msra.mxu1 %v9347_v58  ;;  %8285 = vmatprep.mubr.bf16.mxu1 %v1318_v63  ;;  %v9387_v58 = vld [vmem:[#allocation8 + $0x1b8] sm:$0xff]  }
 0x1fe   : > { %8271 = vmatprep.subr.bf16.mxu1 %v9348_v61  ;;  %8343 = vmatprep.subr.bf16.mxu0 %v9387_v58 }
 0x1ff   : > { %8344 = vmatpush3.bf16.msra.mxu0 %v9387_v58 }
 0x200   : > { %8369 = vmatprep.subr.bf16.mxu0 %v10099_v59 }
 0x201   : > { %8272 = vmatpush3.bf16.msra.mxu1 %v9348_v61 }
 0x202   : > { %8273 = vmatprep.subr.bf16.mxu1 %v9349_v0 }
 0x205   : > { %8274 = vmatpush3.bf16.msra.mxu1 %v9349_v0 }
 0x206   : > { %8275 = vmatprep.subr.bf16.mxu1 %v9350_v1 }
 0x209   : > { %8276 = vmatpush3.bf16.msra.mxu1 %v9350_v1 }
 0x20a   : > { %8277 = vmatprep.subr.bf16.mxu1 %v9351_v2 }
 0x20d   : > { %8278 = vmatpush3.bf16.msra.mxu1 %v9351_v2 }
 0x20e   : > { %8279 = vmatprep.subr.bf16.mxu1 %v9352_v3 }
 0x211   : > { %8280 = vmatpush3.bf16.msra.mxu1 %v9352_v3 }
 0x212   : > { %8281 = vmatprep.subr.bf16.mxu1 %v9353_v5 }
 0x215   : > { %8282 = vmatpush3.bf16.msra.mxu1 %v9353_v5 }
 0x216   : > { %8283 = vmatprep.subr.bf16.mxu1 %v9354_v9 }
 0x219   : > { %8284 = vmatpush3.bf16.msra.mxu1 %v9354_v9 }
 0x21a   : > { %8289 = vmatprep.subr.bf16.mxu1 %v9355_v15 }
 0x21c   : > { %8286 = vmatmul.mubr.bf16.vlgmr.msra.gmra.mrb[8].mxu1 %v1317_v60 }
 0x21d   : > { %8290 = vmatpush3.bf16.msra.mxu1 %v9355_v15  ;;  %8305 = vmatprep.mubr.bf16.mxu1 %v1454_v19 }
 0x21e   : > { %8291 = vmatprep.subr.bf16.mxu1 %v9356_v18 }
 0x221   : > { %8292 = vmatpush3.bf16.msra.mxu1 %v9356_v18 }
 0x222   : > { %8293 = vmatprep.subr.bf16.mxu1 %v9357_v20 }
 0x225   : > { %8294 = vmatpush3.bf16.msra.mxu1 %v9357_v20 }
 0x226   : > { %8295 = vmatprep.subr.bf16.mxu1 %v9358_v21 }
 0x229   : > { %8296 = vmatpush3.bf16.msra.mxu1 %v9358_v21 }
 0x22a   : > { %8297 = vmatprep.subr.bf16.mxu1 %v9359_v22 }
 0x22d   : > { %8298 = vmatpush3.bf16.msra.mxu1 %v9359_v22 }
 0x22e   : > { %8299 = vmatprep.subr.bf16.mxu1 %v9360_v23 }
 0x231   : > { %8300 = vmatpush3.bf16.msra.mxu1 %v9360_v23 }
 0x232   : > { %8301 = vmatprep.subr.bf16.mxu1 %v9361_v24 }
 0x235   : > { %8302 = vmatpush3.bf16.msra.mxu1 %v9361_v24 }
 0x236   : > { %8303 = vmatprep.subr.bf16.mxu1 %v9362_v25 }
 0x239   : > { %8304 = vmatpush3.bf16.msra.mxu1 %v9362_v25 }
 0x23a   : > { %8309 = vmatprep.subr.bf16.mxu1 %v9363_v27 }
 0x23c   : > { %8306 = vmatmul.mubr.bf16.vlgmr.msra.gmra.mrb[12].mxu1 %v1453_v17  ;;  %v7241_v17 = vld [vmem:[%s10609_s3 + $0x1] ss:$0 sm:$0xff] }
 0x23d   : > { %8310 = vmatpush3.bf16.msra.mxu1 %v9363_v27  ;;  %8325 = vmatprep.mubr.bf16.mxu1 %v1578_v31 }
 0x23e   : > { %8311 = vmatprep.subr.bf16.mxu1 %v9364_v30 }
 0x241   : > { %8312 = vmatpush3.bf16.msra.mxu1 %v9364_v30 }
 0x242   : > { %8313 = vmatprep.subr.bf16.mxu1 %v9365_v32 }
 0x245   : > { %8314 = vmatpush3.bf16.msra.mxu1 %v9365_v32 }
 0x246   : > { %8315 = vmatprep.subr.bf16.mxu1 %v9366_v33 }
 0x249   : > { %8316 = vmatpush3.bf16.msra.mxu1 %v9366_v33 }
 0x24a   : > { %8317 = vmatprep.subr.bf16.mxu1 %v9367_v34 }
 0x24d   : > { %8318 = vmatpush3.bf16.msra.mxu1 %v9367_v34 }
 0x24e   : > { %8319 = vmatprep.subr.bf16.mxu1 %v9368_v35 }
 0x251   : > { %8320 = vmatpush3.bf16.msra.mxu1 %v9368_v35 }
 0x252   : > { %8321 = vmatprep.subr.bf16.mxu1 %v9369_v36 }
 0x255   : > { %8322 = vmatpush3.bf16.msra.mxu1 %v9369_v36  ;;  %v9388_v36 = vld [vmem:[#allocation8 + $0x208] sm:$0xff]  }
 0x256   : > { %8323 = vmatprep.subr.bf16.mxu1 %v9370_v37 }
 0x259   : > { %8324 = vmatpush3.bf16.msra.mxu1 %v9370_v37 }
 0x25a   : > { %8349 = vmatprep.subr.bf16.mxu1 %v9371_v38 }
 0x25c   : > { %8326 = vmatmul.mubr.bf16.vlgmr.msra.gmra.mrb[16].mxu1 %v1577_v29 }
 0x25d   : > { %8350 = vmatpush3.bf16.msra.mxu1 %v9371_v38 }
 0x25e   : > { %8351 = vmatprep.subr.bf16.mxu1 %v9372_v39 }
 0x261   : > { %8352 = vmatpush3.bf16.msra.mxu1 %v9372_v39 }
 0x262   : > { %8353 = vmatprep.subr.bf16.mxu1 %v9374_v42 }
 0x265   : > { %8354 = vmatpush3.bf16.msra.mxu1 %v9374_v42 }
 0x266   : > { %8355 = vmatprep.subr.bf16.mxu1 %v9376_v43 }
 0x269   : > { %8356 = vmatpush3.bf16.msra.mxu1 %v9376_v43 }
 0x26a   : > { %8357 = vmatprep.subr.bf16.mxu1 %v9378_v45 }
 0x26d   : > { %8358 = vmatpush3.bf16.msra.mxu1 %v9378_v45 }
 0x26e   : > { %8359 = vmatprep.subr.bf16.mxu1 %v9380_v51 }
 0x271   : > { %8360 = vmatpush3.bf16.msra.mxu1 %v9380_v51 }
 0x272   : > { %8361 = vmatprep.subr.bf16.mxu1 %v9382_v53 }
 0x275   : > { %8362 = vmatpush3.bf16.msra.mxu1 %v9382_v53 }
 0x276   : > { %8363 = vmatprep.subr.bf16.mxu1 %v9384_v55 }
 0x279   : > { %8364 = vmatpush3.bf16.msra.mxu1 %v9384_v55 }
 0x27a   : > { %8389 = vmatprep.subr.bf16.mxu1 %v9386_v57 }
 0x2af   : > { %v8247_v46 = vpop.f32.mrb[0].mxu1 }
 0x2b0   : > { %v1186_v47 = vpop.f32.mrb[1].mxu1 }
 0x2b1   : > { %v8248_v49 = vpop.f32.mrb[2].mxu1 }
 0x2b2   : > { %v1189_v50 = vpop.f32.mrb[3].mxu1 }
 0x2cf   : > { %v8267_v60 = vpop.f32.mrb[4].mxu1 }
 0x2d0   : > { %v1291_v61 = vadd.f32 %v8267_v60, %v8247_v46  ;;  %v1282_v62 = vpop.f32.mrb[5].mxu1 }
 0x2d1   : > { %v1283_v63 = vadd.f32 %v1282_v62, %v1186_v47  ;;  %v8268_v0 = vpop.f32.mrb[6].mxu1 }
 0x2d2   : > { %v1285_v1 = vpop.f32.mrb[7].mxu1  ;;  %v9393_v0 = vld [vmem:[#allocation8 + $0x1d0] sm:$0xff]  }
 0x2d3   : > { %v1286_v2 = vadd.f32 %v1285_v1, %v1189_v50 }
 0x2ef   : > { %v8287_v3 = vpop.f32.mrb[8].mxu1 }
 0x2f0   : > { %v1419_v4 = vadd.f32 %v8287_v3, %v1291_v61  ;;  %v1403_v5 = vpop.f32.mrb[9].mxu1  ;;  %v9392_v61 = vld [vmem:[#allocation8 + $0x218] sm:$0xff]  }
 0x2f1   : > { %v1417_v6 = vadd.f32 %v1403_v5, %v1283_v63  ;;  %v8288_v7 = vpop.f32.mrb[10].mxu1  ;;  %v9395_v3 = vld [vmem:[#allocation8 + $0x1d8] sm:$0xff]   ;;  %v9397_v5 = vld [vmem:[#allocation8 + $0x1e0] sm:$0xff]  }
 0x2f2   : > { %v1406_v8 = vpop.f32.mrb[11].mxu1  ;;  %v9400_v7 = vld [vmem:[#allocation8 + $0x238] sm:$0xff]  }
 0x2f3   : > { %v1418_v10 = vadd.f32 %v1406_v8, %v1286_v2  ;;  %v9394_v2 = vld [vmem:[#allocation8 + $0x220] sm:$0xff]   ;;  %v9401_v8 = vld [vmem:[#allocation8 + $0x1f0] sm:$0xff]  }
 0x30f   : > { %v8307_v9 = vpop.f32.mrb[12].mxu1 }
 0x310   : > { %v1555_v11 = vadd.f32 %v8307_v9, %v1419_v4  ;;  %v1539_v12 = vpop.f32.mrb[13].mxu1  ;;  %v9396_v4 = vld [vmem:[#allocation8 + $0x228] sm:$0xff]  }
 0x311   : > { %v1553_v13 = vadd.f32 %v1539_v12, %v1417_v6  ;;  %v8308_v14 = vpop.f32.mrb[14].mxu1  ;;  %v9399_v6 = vld [vmem:[#allocation8 + $0x1e8] sm:$0xff]  }
 0x312   : > { %v1542_v15 = vpop.f32.mrb[15].mxu1  ;;  %v9404_v14 = vld [vmem:[#allocation8 + $0x248] sm:$0xff]  }
 0x313   : > { %v1554_v16 = vadd.f32 %v1542_v15, %v1418_v10  ;;  %v9402_v10 = vld [vmem:[#allocation8 + $0x1f8] sm:$0xff]  }
 0x32f   : > { %v8327_v18 = vpop.f32.mrb[16].mxu1 }
 0x330   : > { %v1679_v19 = vadd.f32 %v8327_v18, %v1555_v11  ;;  %v1663_v20 = vpop.f32.mrb[17].mxu1  ;;  %v9403_v11 = vld [vmem:[#allocation8 + $0x240] sm:$0xff]  }
 0x331   : > { %v1677_v21 = vadd.f32 %v1663_v20, %v1553_v13  ;;  %v8328_v22 = vpop.f32.mrb[18].mxu1  ;;  %v9407_v18 = vld [vmem:[#allocation8 + $0x260] sm:$0xff]   ;;  %v9409_v20 = vld [vmem:[#allocation8 + $0x270] sm:$0xff]  }
 0x332   : > { %v1688_v23 = vadd.f32 %v7241_v17, %v1679_v19  ;;  %v1666_v24 = vpop.f32.mrb[19].mxu1  ;;  %v9408_v19 = vld [vmem:[#allocation8 + $0x268] sm:$0xff]   ;;  %v9411_v22 = vld [vmem:[#allocation8 + $0x280] sm:$0xff]  }
 0x333   : > { %v1686_v25 = vadd.f32 %v7241_v17, %v1677_v21  ;;  %v1678_v26 = vadd.f32 %v1666_v24, %v1554_v16  ;;  %v9405_v16 = vld [vmem:[#allocation8 + $0x250] sm:$0xff]   ;;  %v9410_v21 = vld [vmem:[#allocation8 + $0x278] sm:$0xff]   ;;  %v9857_v24 = vmov 0.0  }
 0x334   : > { %v1691_v27 = vmax.f32 %v1688_v23, 0.0  ;;  %v9413_v23 = vld [vmem:[#allocation8 + $0x2c0] sm:$0xff]  }
 0x335   : > { %v1687_v28 = vadd.f32 %v7241_v17, %v1678_v26  ;;  %v1689_v30 = vmax.f32 %v1686_v25, 0.0  ;;  %v9406_v17 = vld [vmem:[#allocation8 + $0x258] sm:$0xff]   ;;  %v9412_v25 = vld [vmem:[#allocation8 + $0x288] sm:$0xff]  }
 0x336   : > { %v1693_v29 = vpack.c.bf16 %v1691_v27, %v1691_v27  ;;  %v9415_v26 = vld [vmem:[#allocation8 + $0x2c8] sm:$0xff]   ;;  %v9414_v27 = vld [vmem:[#allocation8 + $0x290] sm:$0xff]  }
 0x337   : > { %v1690_v31 = vmax.f32 %v1687_v28, 0.0  ;;  %v9416_v28 = vld [vmem:[#allocation8 + $0x298] sm:$0xff]  }
 0x338   : > { %1695 = vst [vmem:[#allocation2 + $0x8] sm:$0xf] %v1693_v29  ;;  %v9418_v29 = vld [vmem:[#allocation8 + $0x2a0] sm:$0xff]  }
 0x339   : > { %v1692_v32 = vpack.c.bf16 %v1690_v31, %v1689_v30  ;;  %v9417_v30 = vld [vmem:[#allocation8 + $0x2d0] sm:$0xff]   ;;  %v9420_v31 = vld [vmem:[#allocation8 + $0x2a8] sm:$0xff]  }
 0x33b   : > { %1694 = vst [vmem:[#allocation2] sm:$0xff] %v1692_v32  ;;  %v1738_v33 = vshll.u32 %v1692_v32, 16  ;;  %8365 = vmatprep.mubr.bf16.mxu1 %v1692_v32  ;;  %v1736_v35 = vshrl.u32 %v1692_v32, 16  ;;  %v9419_v32 = vld [vmem:[#allocation8 + $0x2d8] sm:$0xff]  }
 0x33d   : > { %v1740_v34 = vrot.slane %v1738_v33, 1  ;;  %v9422_v33 = vld [vmem:[#allocation8 + $0x2b0] sm:$0xff]  }
 0x33f   : > { %v1699_v37 = vld [vmem:[#allocation2 + $0x8] sm:$0x3]  ;;  %v1741_v43 = vor.u32 %v1740_v34, %v1736_v35  ;;  %v9421_v34 = vld [vmem:[#allocation8 + $0x2e0] sm:$0xff]   ;;  %v9424_v35 = vld [vmem:[#allocation8 + $0x2b8] sm:$0xff]  }
 0x340   : > { %v10105_v38 = vld [vmem:[#allocation2 + $0x8] sm:$0x7]  ;;  %8366 = vmatmul.mubr.bf16.vlgmr.msra.gmra.mrb[20].mxu1 %v1699_v37 }
 0x341   : > { %v10107_v39 = vld [vmem:[#allocation2 + $0x8] sm:$0xf]  ;;  %v1743_v40 = vshll.u32 %v10105_v38, 16  ;;  %8390 = vmatpush3.bf16.msra.mxu1 %v9386_v57  ;;  %v1747_v48 = vshrl.u32 %v10105_v38, 16  ;;  %v1965_v49 = vrot.slane %v10105_v38, 1  ;;  %v9427_v38 = vld [vmem:[#allocation8 + $0x2f8] sm:$0xff]  }
 0x342   : > { %v2095_v41 = vshrl.u32 %v10107_v39, 16  ;;  %v2098_v42 = vshll.u32 %v10107_v39, 16  ;;  %8391 = vmatprep.subr.bf16.mxu1 %v9388_v36  ;;  %v1944_v46 = vld [vmem:[#allocation2] sm:$0xfe]  ;;  %v2225_v13 = vrot.slane %v10107_v39, 2 }
 0x343   : > { %v1745_v45 = vrot.slane %v1743_v40, 1  ;;  %v2087_v50 = vshrl.u32 %v1944_v46, 16  ;;  %v2090_v51 = vshll.u32 %v1944_v46, 16  ;;  %v1964_v53 = vrot.slane %v1944_v46, 1  ;;  %v2204_v9 = vld [vmem:[#allocation2] sm:$0xfc] }
 0x344   : > { %v2097_v47 = vrot.slane %v2095_v41, 1  ;;  %v2100_v52 = vrot.slane %v2098_v42, 2  ;;  %v2224_v12 = vrot.slane %v2204_v9, 2  ;;  %v9425_v37 = vld [vmem:[#allocation8 + $0x2f0] sm:$0xff]  }
 0x345   : > { %v1746_v54 = vsel %vm416_vm0, %v1741_v43, %v1745_v45  ;;  %v1749_v55 = vor.u32 %v1747_v48, %v1745_v45  ;;  %8392 = vmatpush3.bf16.msra.mxu1 %v9388_v36  ;;  %v2089_v57 = vrot.slane %v2087_v50, 1  ;;  %v2092_v58 = vrot.slane %v2090_v51, 2  ;;  %v9423_v36 = vld [vmem:[#allocation8 + $0x2e8] sm:$0xff]  }
 0x346   : > { %8345 = vmatprep.mubr.bf16.mxu0 %v1746_v54  ;;  %v1966_v60 = vsel %vm654_vm2, %v1964_v53, %v1965_v49  ;;  %8393 = vmatprep.subr.bf16.mxu1 %v9390_v44  ;;  %v2101_v63 = vor.u32 %v2100_v52, %v2097_v47  ;;  %v2226_v15 = vsel %vm924_vm1, %v2224_v12, %v2225_v13 }
 0x347   : > { %8346 = vmatmul.mubr.bf16.vlgmr.msra.gmra.mrb[4].mxu0 %v1749_v55  ;;  %v2093_v62 = vor.u32 %v2092_v58, %v2089_v57 }
 0x348   : > { %8370 = vmatpush3.bf16.msra.mxu0 %v10099_v59  ;;  %8385 = vmatprep.mubr.bf16.mxu0 %v1966_v60  ;;  %v9398_v59 = vld [vmem:[#allocation8 + $0x230] sm:$0xff]  }
 0x349   : > { %8371 = vmatprep.subr.bf16.mxu0 %v9391_v56  ;;  %v2102_v1 = vsel %vm782_vm3, %v2093_v62, %v2101_v63  ;;  %8394 = vmatpush3.bf16.msra.mxu1 %v9390_v44 }
 0x34a   : > { %8405 = vmatprep.mubr.bf16.mxu1 %v2102_v1  ;;  %8395 = vmatprep.subr.bf16.mxu1 %v9392_v61  ;;  %v7283_v1 = vld [vmem:[%s10609_s3 + $0x2] ss:$0 sm:$0xff] }
 0x34c   : > { %8372 = vmatpush3.bf16.msra.mxu0 %v9391_v56 }
 0x34d   : > { %8373 = vmatprep.subr.bf16.mxu0 %v9393_v0  ;;  %8396 = vmatpush3.bf16.msra.mxu1 %v9392_v61 }
 0x34e   : > { %8397 = vmatprep.subr.bf16.mxu1 %v9394_v2 }
 0x350   : > { %8374 = vmatpush3.bf16.msra.mxu0 %v9393_v0 }
 0x351   : > { %8375 = vmatprep.subr.bf16.mxu0 %v9395_v3  ;;  %8398 = vmatpush3.bf16.msra.mxu1 %v9394_v2 }
 0x352   : > { %8399 = vmatprep.subr.bf16.mxu1 %v9396_v4 }
 0x354   : > { %8376 = vmatpush3.bf16.msra.mxu0 %v9395_v3 }
 0x355   : > { %8377 = vmatprep.subr.bf16.mxu0 %v9397_v5  ;;  %8400 = vmatpush3.bf16.msra.mxu1 %v9396_v4 }
 0x356   : > { %8401 = vmatprep.subr.bf16.mxu1 %v9398_v59 }
 0x358   : > { %8378 = vmatpush3.bf16.msra.mxu0 %v9397_v5 }
 0x359   : > { %8379 = vmatprep.subr.bf16.mxu0 %v9399_v6  ;;  %8402 = vmatpush3.bf16.msra.mxu1 %v9398_v59 }
 0x35a   : > { %8403 = vmatprep.subr.bf16.mxu1 %v9400_v7 }
 0x35c   : > { %8380 = vmatpush3.bf16.msra.mxu0 %v9399_v6 }
 0x35d   : > { %8381 = vmatprep.subr.bf16.mxu0 %v9401_v8  ;;  %8404 = vmatpush3.bf16.msra.mxu1 %v9400_v7 }
 0x35e   : > { %8429 = vmatprep.subr.bf16.mxu1 %v9857_v24 }
 0x360   : > { %8382 = vmatpush3.bf16.msra.mxu0 %v9401_v8  ;;  %8406 = vmatmul.mubr.bf16.vlgmr.msra.gmra.mrb[24].mxu1 %v2101_v63 }
 0x361   : > { %8383 = vmatprep.subr.bf16.mxu0 %v9402_v10  ;;  %8430 = vmatpush3.bf16.msra.mxu1 %v9413_v23  ;;  %v9430_v23 = vld [vmem:[#allocation8 + $0x350] sm:$0xff]  }
 0x362   : > { %8431 = vmatprep.subr.bf16.mxu1 %v9857_v24  ;;  %8445 = vmatprep.mubr.msk.bf16.mxu1 %vm9858_vm4, %v9857_v24 }
 0x364   : > { %8384 = vmatpush3.bf16.msra.mxu0 %v9402_v10 }
 0x365   : > { %8409 = vmatprep.subr.bf16.mxu0 %v9403_v11  ;;  %8432 = vmatpush3.bf16.msra.mxu1 %v9415_v26 }
 0x366   : > { %8433 = vmatprep.subr.bf16.mxu1 %v9857_v24 }
 0x367   : > { %8386 = vmatmul.mubr.bf16.vlgmr.msra.gmra.mrb[8].mxu0 %v1965_v49 }
 0x368   : > { %8410 = vmatpush3.bf16.msra.mxu0 %v9403_v11  ;;  %8425 = vmatprep.mubr.bf16.mxu0 %v2226_v15  ;;  %v9426_v15 = vld [vmem:[#allocation8 + $0x340] sm:$0xff]  }
 0x369   : > { %8411 = vmatprep.subr.bf16.mxu0 %v9404_v14  ;;  %8434 = vmatpush3.bf16.msra.mxu1 %v9417_v30  ;;  %v9431_v30 = vld [vmem:[#allocation8 + $0x308] sm:$0xff]  }
 0x36a   : > { %8435 = vmatprep.subr.bf16.mxu1 %v9857_v24 }
 0x36c   : > { %8412 = vmatpush3.bf16.msra.mxu0 %v9404_v14 }
 0x36d   : > { %8413 = vmatprep.subr.bf16.mxu0 %v9405_v16  ;;  %8436 = vmatpush3.bf16.msra.mxu1 %v9419_v32  ;;  %v9433_v32 = vld [vmem:[#allocation8 + $0x310] sm:$0xff]  }
 0x36e   : > { %8437 = vmatprep.subr.bf16.mxu1 %v9857_v24 }
 0x370   : > { %8414 = vmatpush3.bf16.msra.mxu0 %v9405_v16 }
 0x371   : > { %8415 = vmatprep.subr.bf16.mxu0 %v9406_v17  ;;  %8438 = vmatpush3.bf16.msra.mxu1 %v9421_v34  ;;  %v9436_v34 = vld [vmem:[#allocation8 + $0x368] sm:$0xff]  }
 0x372   : > { %8439 = vmatprep.subr.bf16.mxu1 %v9857_v24 }
 0x374   : > { %8416 = vmatpush3.bf16.msra.mxu0 %v9406_v17 }
 0x375   : > { %8417 = vmatprep.subr.bf16.mxu0 %v9407_v18  ;;  %8440 = vmatpush3.bf16.msra.mxu1 %v9423_v36  ;;  %v9435_v36 = vld [vmem:[#allocation8 + $0x318] sm:$0xff]  }
 0x376   : > { %8441 = vmatprep.subr.bf16.mxu1 %v9857_v24 }
 0x378   : > { %8418 = vmatpush3.bf16.msra.mxu0 %v9407_v18  ;;  %v9428_v18 = vld [vmem:[#allocation8 + $0x348] sm:$0xff]  }
 0x379   : > { %8419 = vmatprep.subr.bf16.mxu0 %v9408_v19  ;;  %8442 = vmatpush3.bf16.msra.mxu1 %v9425_v37 }
 0x37a   : > { %8443 = vmatprep.subr.bf16.mxu1 %v9857_v24 }
 0x37c   : > { %8420 = vmatpush3.bf16.msra.mxu0 %v9408_v19 }
 0x37d   : > { %8421 = vmatprep.subr.bf16.mxu0 %v9409_v20  ;;  %8444 = vmatpush3.bf16.msra.mxu1 %v9427_v38 }
 0x37e   : > { %8469 = vmatprep.subr.bf16.mxu1 %v9857_v24 }
 0x380   : > { %8422 = vmatpush3.bf16.msra.mxu0 %v9409_v20 }
 0x381   : > { %8423 = vmatprep.subr.bf16.mxu0 %v9410_v21 }
 0x384   : > { %8424 = vmatpush3.bf16.msra.mxu0 %v9410_v21 }
 0x385   : > { %8449 = vmatprep.subr.bf16.mxu0 %v9857_v24 }
 0x387   : > { %8426 = vmatmul.mubr.bf16.vlgmr.msra.gmra.mrb[12].mxu0 %v2225_v13 }
 0x388   : > { %8450 = vmatpush3.bf16.msra.mxu0 %v9411_v22  ;;  %8465 = vmatprep.mubr.msk.bf16.mxu0 %vm9858_vm4, %v9857_v24 }
 0x389   : > { %8451 = vmatprep.subr.bf16.mxu0 %v9857_v24 }
 0x38c   : > { %8452 = vmatpush3.bf16.msra.mxu0 %v9412_v25 }
 0x38d   : > { %8453 = vmatprep.subr.bf16.mxu0 %v9857_v24 }
 0x390   : > { %8454 = vmatpush3.bf16.msra.mxu0 %v9414_v27  ;;  %v9429_v27 = vld [vmem:[#allocation8 + $0x300] sm:$0xff]  }
 0x391   : > { %8455 = vmatprep.subr.bf16.mxu0 %v9857_v24 }
 0x394   : > { %8456 = vmatpush3.bf16.msra.mxu0 %v9416_v28 }
 0x395   : > { %8457 = vmatprep.subr.bf16.mxu0 %v9857_v24 }
 0x398   : > { %8458 = vmatpush3.bf16.msra.mxu0 %v9418_v29  ;;  %v9432_v29 = vld [vmem:[#allocation8 + $0x358] sm:$0xff]  }
 0x399   : > { %8459 = vmatprep.subr.bf16.mxu0 %v9857_v24 }
 0x39c   : > { %8460 = vmatpush3.bf16.msra.mxu0 %v9420_v31  ;;  %v9434_v31 = vld [vmem:[#allocation8 + $0x360] sm:$0xff]  }
 0x39d   : > { %8461 = vmatprep.subr.bf16.mxu0 %v9857_v24 }
 0x3a0   : > { %8462 = vmatpush3.bf16.msra.mxu0 %v9422_v33 }
 0x3a1   : > { %8463 = vmatprep.subr.bf16.mxu0 %v9857_v24 }
 0x3a4   : > { %8464 = vmatpush3.bf16.msra.mxu0 %v9424_v35 }
 0x3a5   : > { %8489 = vmatprep.subr.bf16.mxu0 %v9857_v24 }
 0x413   : > { %v8367_v39 = vpop.f32.mrb[20].mxu1 }
 0x414   : > { %v1930_v40 = vpop.f32.mrb[21].mxu1 }
 0x415   : > { %v8368_v41 = vpop.f32.mrb[22].mxu1 }
 0x416   : > { %v1933_v42 = vpop.f32.mrb[23].mxu1 }
 0x41a   : > { %v8347_v43 = vpop.f32.mrb[4].mxu0 }
 0x41b   : > { %v1939_v44 = vadd.f32 %v8367_v39, %v8347_v43  ;;  %v1834_v45 = vpop.f32.mrb[5].mxu0  ;;  %v9438_v39 = vld [vmem:[#allocation8 + $0x370] sm:$0xff]  }
 0x41c   : > { %v1931_v46 = vadd.f32 %v1930_v40, %v1834_v45  ;;  %v8348_v47 = vpop.f32.mrb[6].mxu0  ;;  %v9440_v45 = vld [vmem:[#allocation8 + $0x378] sm:$0xff]  }
 0x41d   : > { %v1837_v48 = vpop.f32.mrb[7].mxu0 }
 0x41e   : > { %v1934_v49 = vadd.f32 %v1933_v42, %v1837_v48  ;;  %v9437_v42 = vld [vmem:[#allocation8 + $0x320] sm:$0xff]   ;;  %v9439_v48 = vld [vmem:[#allocation8 + $0x328] sm:$0xff]  }
 0x433   : > { %v8407_v50 = vpop.f32.mrb[24].mxu1 }
 0x434   : > { %v2187_v51 = vpop.f32.mrb[25].mxu1 }
 0x435   : > { %v8408_v52 = vpop.f32.mrb[26].mxu1 }
 0x436   : > { %v2190_v53 = vpop.f32.mrb[27].mxu1 }
 0x43a   : > { %v8387_v54 = vpop.f32.mrb[8].mxu0 }
 0x43b   : > { %v2067_v55 = vadd.f32 %v8387_v54, %v1939_v44  ;;  %v2051_v56 = vpop.f32.mrb[9].mxu0 }
 0x43c   : > { %v2065_v57 = vadd.f32 %v2051_v56, %v1931_v46  ;;  %v8388_v58 = vpop.f32.mrb[10].mxu0  ;;  %v9443_v56 = vld [vmem:[#allocation8 + $0x380] sm:$0xff]  }
 0x43d   : > { %v2054_v60 = vpop.f32.mrb[11].mxu0  ;;  %v2203_v61 = vadd.f32 %v8407_v50, %v2067_v55  ;;  %v9444_v58 = vld [vmem:[#allocation8 + $0x388] sm:$0xff]  }
 0x43e   : > { %v2066_v62 = vadd.f32 %v2054_v60, %v1934_v49  ;;  %v2201_v63 = vadd.f32 %v2187_v51, %v2065_v57  ;;  %v9441_v51 = vld [vmem:[#allocation8 + $0x330] sm:$0xff]  }
 0x43f   : > { %v9445_v60 = vld [vmem:[#allocation8 + $0x390] sm:$0xff]  }
 0x440   : > { %v2202_v0 = vadd.f32 %v2190_v53, %v2066_v62  ;;  %v9442_v53 = vld [vmem:[#allocation8 + $0x338] sm:$0xff]   ;;  %v9447_v62 = vld [vmem:[#allocation8 + $0x3a0] sm:$0xff]  }
 0x45a   : > { %v8427_v2 = vpop.f32.mrb[12].mxu0 }
 0x45b   : > { %v2327_v3 = vadd.f32 %v8427_v2, %v2203_v61  ;;  %v2311_v4 = vpop.f32.mrb[13].mxu0  ;;  %v9446_v61 = vld [vmem:[#allocation8 + $0x398] sm:$0xff]  }
 0x45c   : > { %v2325_v5 = vadd.f32 %v2311_v4, %v2201_v63  ;;  %v8428_v59 = vpop.f32.mrb[14].mxu0  ;;  %v9448_v63 = vld [vmem:[#allocation8 + $0x3a8] sm:$0xff]   ;;  %v9450_v2 = vld [vmem:[#allocation8 + $0x3b8] sm:$0xff]  }
 0x45d   : > { %v2336_v6 = vadd.f32 %v7283_v1, %v2327_v3  ;;  %v2314_v7 = vpop.f32.mrb[15].mxu0  ;;  %v9451_v59 = vld [vmem:[#allocation8 + $0x3c0] sm:$0xff]  }
 0x45e   : > { %v2334_v8 = vadd.f32 %v7283_v1, %v2325_v5  ;;  %v2326_v10 = vadd.f32 %v2314_v7, %v2202_v0  ;;  %v9449_v0 = vld [vmem:[#allocation8 + $0x3b0] sm:$0xff]   ;;  %v9452_v7 = vld [vmem:[#allocation8 + $0x3c8] sm:$0xff]  }
 0x45f   : > { %v2339_v9 = vmax.f32 %v2336_v6, 0.0  ;;  %v9453_v6 = vld [vmem:[#allocation8 + $0x400] sm:$0xff]  }
 0x460   : > { %v2335_v11 = vadd.f32 %v7283_v1, %v2326_v10  ;;  %v2337_v13 = vmax.f32 %v2334_v8, 0.0  ;;  %v9455_v8 = vld [vmem:[#allocation8 + $0x408] sm:$0xff]   ;;  %v9454_v10 = vld [vmem:[#allocation8 + $0x3d0] sm:$0xff]  }
 0x461   : > { %v2341_v12 = vpack.c.bf16 %v2339_v9, %v2339_v9  ;;  %v9456_v9 = vld [vmem:[#allocation8 + $0x3d8] sm:$0xff]  }
 0x462   : > { %v2338_v14 = vmax.f32 %v2335_v11, 0.0  ;;  %v9457_v11 = vld [vmem:[#allocation8 + $0x410] sm:$0xff]  }
 0x463   : > { %2343 = vst [vmem:[#allocation2 + $0x8] sm:$0x3] %v2341_v12  ;;  %v9458_v12 = vld [vmem:[#allocation8 + $0x3e0] sm:$0xff]  }
 0x464   : > { %v2340_v16 = vpack.c.bf16 %v2338_v14, %v2337_v13  ;;  %v9459_v13 = vld [vmem:[#allocation8 + $0x418] sm:$0xff]   ;;  %v9460_v14 = vld [vmem:[#allocation8 + $0x3e8] sm:$0xff]  }
 0x466   : > { %2342 = vst [vmem:[#allocation2] sm:$0xff] %v2340_v16  ;;  %8466 = vmatmul.mubr.bf16.vlgmr.msra.gmra.mrb[16].mxu0 %v2340_v16  ;;  %v2386_v17 = vshll.u32 %v2340_v16, 16  ;;  %v2384_v21 = vshrl.u32 %v2340_v16, 16  ;;  %v9462_v16 = vld [vmem:[#allocation8 + $0x3f0] sm:$0xff]  }
 0x467   : > { %8490 = vmatpush3.bf16.msra.mxu0 %v9426_v15  ;;  %8505 = vmatprep.mubr.msk.bf16.mxu0 %vm9858_vm4, %v9857_v24  ;;  %v9461_v15 = vld [vmem:[#allocation8 + $0x420] sm:$0xff]  }
 0x468   : > { %8491 = vmatprep.subr.bf16.mxu0 %v9857_v24  ;;  %v2388_v19 = vrot.slane %v2386_v17, 1  ;;  %v9463_v17 = vld [vmem:[#allocation8 + $0x428] sm:$0xff]  }
 0x46a   : > { %v10152_v20 = vld [vmem:[#allocation2 + $0x8] sm:$0x1]  ;;  %v2389_v25 = vor.u32 %v2388_v19, %v2384_v21 }
 0x46b   : > { %8492 = vmatpush3.bf16.msra.mxu0 %v9428_v18  ;;  %v2391_v22 = vshll.u32 %v10152_v20, 16  ;;  %v10164_v35 = vld [vmem:[#allocation2 + $0x8] sm:$0x3]  ;;  %v2595_v55 = vrot.slane %v10152_v20, 1  ;;  %v9464_v18 = vld [vmem:[#allocation8 + $0x3f8] sm:$0xff]  }
 0x46c   : > { %8493 = vmatprep.subr.bf16.mxu0 %v9857_v24  ;;  %v2716_v40 = vshrl.u32 %v10164_v35, 16  ;;  %v2719_v41 = vshll.u32 %v10164_v35, 16  ;;  %v2837_v4 = vrot.slane %v10164_v35, 2  ;;  %v9465_v19 = vld [vmem:[#allocation8 + $0x430] sm:$0xff]   ;;  %v9467_v20 = vld [vmem:[#allocation8 + $0x438] sm:$0xff]  }
 0x46d   : > { %v2393_v26 = vrot.slane %v2391_v22, 1  ;;  %v2574_v33 = vld [vmem:[#allocation2] sm:$0xfe] }
 0x46e   : > { %v2708_v37 = vshrl.u32 %v2574_v33, 16  ;;  %v2711_v38 = vshll.u32 %v2574_v33, 16  ;;  %v2718_v46 = vrot.slane %v2716_v40, 1  ;;  %v2721_v47 = vrot.slane %v2719_v41, 2  ;;  %v2816_v1 = vld [vmem:[#allocation2] sm:$0xfc] }
 0x46f   : > { %v2394_v28 = vsel %vm416_vm0, %v2389_v25, %v2393_v26  ;;  %8494 = vmatpush3.bf16.msra.mxu0 %v9430_v23  ;;  %v2594_v54 = vrot.slane %v2574_v33, 1  ;;  %v2836_v3 = vrot.slane %v2816_v1, 2 }
 0x470   : > { %8446 = vmatmul.mubr.bf16.vlgmr.msra.gmra.mrb[28].mxu1 %v2394_v28  ;;  %8495 = vmatprep.subr.bf16.mxu0 %v9857_v24  ;;  %v2710_v43 = vrot.slane %v2708_v37, 1  ;;  %v2713_v44 = vrot.slane %v2711_v38, 2  ;;  %v2722_v50 = vor.u32 %v2721_v47, %v2718_v46 }
 0x471   : > { %8470 = vmatpush3.bf16.msra.mxu1 %v9429_v27  ;;  %8485 = vmatprep.mubr.msk.bf16.mxu1 %vm9858_vm4, %v9857_v24  ;;  %v2596_v57 = vsel %vm654_vm2, %v2594_v54, %v2595_v55  ;;  %v2838_v5 = vsel %vm924_vm1, %v2836_v3, %v2837_v4  ;;  %v9471_v3 = vld [vmem:[#allocation8 + $0x448] sm:$0xff]   ;;  %v9472_v4 = vld [vmem:[#allocation8 + $0x498] sm:$0xff]  }
 0x472   : > { %8471 = vmatprep.subr.bf16.mxu1 %v9857_v24  ;;  %v2714_v49 = vor.u32 %v2713_v44, %v2710_v43  ;;  %v7325_v44 = vld [vmem:[%s10609_s3 + $0x3] ss:$0 sm:$0xff] }
 0x473   : > { %8496 = vmatpush3.bf16.msra.mxu0 %v9432_v29 }
 0x474   : > { %8497 = vmatprep.subr.bf16.mxu0 %v9857_v24  ;;  %v2723_v52 = vsel %vm782_vm3, %v2714_v49, %v2722_v50 }
 0x475   : > { %8472 = vmatpush3.bf16.msra.mxu1 %v9431_v30 }
 0x476   : > { %8473 = vmatprep.subr.bf16.mxu1 %v9857_v24 }
 0x477   : > { %8498 = vmatpush3.bf16.msra.mxu0 %v9434_v31 }
 0x478   : > { %8499 = vmatprep.subr.bf16.mxu0 %v9857_v24 }
 0x479   : > { %8474 = vmatpush3.bf16.msra.mxu1 %v9433_v32 }
 0x47a   : > { %8475 = vmatprep.subr.bf16.mxu1 %v9857_v24 }
 0x47b   : > { %8500 = vmatpush3.bf16.msra.mxu0 %v9436_v34 }
 0x47c   : > { %8501 = vmatprep.subr.bf16.mxu0 %v9857_v24 }
 0x47d   : > { %8476 = vmatpush3.bf16.msra.mxu1 %v9435_v36 }
 0x47e   : > { %8477 = vmatprep.subr.bf16.mxu1 %v9857_v24 }
 0x47f   : > { %8502 = vmatpush3.bf16.msra.mxu0 %v9438_v39 }
 0x480   : > { %8503 = vmatprep.subr.bf16.mxu0 %v9857_v24 }
 0x481   : > { %8478 = vmatpush3.bf16.msra.mxu1 %v9437_v42 }
 0x482   : > { %8479 = vmatprep.subr.bf16.mxu1 %v9857_v24 }
 0x483   : > { %8504 = vmatpush3.bf16.msra.mxu0 %v9440_v45 }
 0x484   : > { %8529 = vmatprep.subr.bf16.mxu0 %v9857_v24 }
 0x485   : > { %8480 = vmatpush3.bf16.msra.mxu1 %v9439_v48 }
 0x486   : > { %8481 = vmatprep.subr.bf16.mxu1 %v9857_v24  ;;  %8506 = vmatmul.mubr.bf16.vlgmr.msra.gmra.mrb[20].mxu0 %v2723_v52 }
 0x487   : > { %8545 = vmatprep.mubr.msk.bf16.mxu0 %vm9858_vm4, %v9857_v24  ;;  %8530 = vmatpush3.bf16.msra.mxu0 %v9453_v6  ;;  %v10225_v6 = vld [vmem:[%s10034_s27 + $0x14] sm:$0xf] }
 0x488   : > { %8531 = vmatprep.subr.bf16.mxu0 %v9857_v24 }
 0x489   : > { %8482 = vmatpush3.bf16.msra.mxu1 %v9441_v51 }
 0x48a   : > { %8483 = vmatprep.subr.bf16.mxu1 %v9857_v24 }
 0x48b   : > { %8532 = vmatpush3.bf16.msra.mxu0 %v9455_v8 }
 0x48c   : > { %8533 = vmatprep.subr.bf16.mxu0 %v9857_v24 }
 0x48d   : > { %8484 = vmatpush3.bf16.msra.mxu1 %v9442_v53 }
 0x48e   : > { %8509 = vmatprep.subr.bf16.mxu1 %v9857_v24 }
 0x48f   : > { %8534 = vmatpush3.bf16.msra.mxu0 %v9457_v11  ;;  %v7372_v11 = vld [vmem:[%s10034_s27 + $0x1c] sm:$0x7] }
 0x490   : > { %8486 = vmatmul.mubr.bf16.vlgmr.msra.gmra.mrb[32].mxu1 %v2596_v57  ;;  %8535 = vmatprep.subr.bf16.mxu0 %v9857_v24 }
 0x491   : > { %8510 = vmatpush3.bf16.msra.mxu1 %v9443_v56  ;;  %8525 = vmatprep.mubr.msk.bf16.mxu1 %vm9858_vm4, %v9857_v24  ;;  %v9466_v56 = vld [vmem:[#allocation8 + $0x480] sm:$0xff]  }
 0x492   : > { %8511 = vmatprep.subr.bf16.mxu1 %v9857_v24 }
 0x493   : > { %8536 = vmatpush3.bf16.msra.mxu0 %v9459_v13 }
 0x494   : > { %8537 = vmatprep.subr.bf16.mxu0 %v9857_v24 }
 0x495   : > { %8512 = vmatpush3.bf16.msra.mxu1 %v9444_v58 }
 0x496   : > { %8513 = vmatprep.subr.bf16.mxu1 %v9857_v24 }
 0x497   : > { %8538 = vmatpush3.bf16.msra.mxu0 %v9461_v15  ;;  %v9477_v15 = vld [vmem:[#allocation8 + $0x460] sm:$0xff]  }
 0x498   : > { %8539 = vmatprep.subr.bf16.mxu0 %v9857_v24 }
 0x499   : > { %8514 = vmatpush3.bf16.msra.mxu1 %v9445_v60 }
 0x49a   : > { %8515 = vmatprep.subr.bf16.mxu1 %v9857_v24 }
 0x49b   : > { %8540 = vmatpush3.bf16.msra.mxu0 %v9463_v17  ;;  %v9478_v17 = vld [vmem:[#allocation8 + $0x4b0] sm:$0xff]  }
 0x49c   : > { %8541 = vmatprep.subr.bf16.mxu0 %v9857_v24 }
 0x49d   : > { %8516 = vmatpush3.bf16.msra.mxu1 %v9446_v61  ;;  %v9468_v61 = vld [vmem:[#allocation8 + $0x488] sm:$0xff]  }
 0x49e   : > { %8517 = vmatprep.subr.bf16.mxu1 %v9857_v24 }
 0x49f   : > { %8542 = vmatpush3.bf16.msra.mxu0 %v9465_v19 }
 0x4a0   : > { %8543 = vmatprep.subr.bf16.mxu0 %v9857_v24 }
 0x4a1   : > { %8518 = vmatpush3.bf16.msra.mxu1 %v9447_v62 }
 0x4a2   : > { %8519 = vmatprep.subr.bf16.mxu1 %v9857_v24 }
 0x4a3   : > { %8544 = vmatpush3.bf16.msra.mxu0 %v9467_v20 }
 0x4a4   : > { %8569 = vmatprep.subr.bf16.mxu0 %v9857_v24 }
 0x4a5   : > { %8520 = vmatpush3.bf16.msra.mxu1 %v9448_v63 }
 0x4a6   : > { %8521 = vmatprep.subr.bf16.mxu1 %v9857_v24 }
 0x4a9   : > { %8522 = vmatpush3.bf16.msra.mxu1 %v9449_v0  ;;  %v9469_v0 = vld [vmem:[#allocation8 + $0x440] sm:$0xff]  }
 0x4aa   : > { %8523 = vmatprep.subr.bf16.mxu1 %v9857_v24 }
 0x4ad   : > { %8524 = vmatpush3.bf16.msra.mxu1 %v9450_v2  ;;  %v9470_v2 = vld [vmem:[#allocation8 + $0x490] sm:$0xff]  }
 0x4ae   : > { %8549 = vmatprep.subr.bf16.mxu1 %v9857_v24 }
 0x4b0   : > { %8526 = vmatmul.mubr.bf16.vlgmr.msra.gmra.mrb[36].mxu1 %v2838_v5  ;;  %v9473_v5 = vld [vmem:[#allocation8 + $0x450] sm:$0xff]  }
 0x4b1   : > { %8565 = vmatprep.mubr.msk.bf16.mxu1 %vm9858_vm4, %v9857_v24  ;;  %8550 = vmatpush3.bf16.msra.mxu1 %v9451_v59  ;;  %v7368_v59 = vld [vmem:[%s10034_s27 + $0x10] sm:$0xf] }
 0x4b2   : > { %8551 = vmatprep.subr.bf16.mxu1 %v9857_v24  ;;  %v10230_v8 = vcombine.low %v7368_v59, %v10225_v6 }
 0x4b5   : > { %8552 = vmatpush3.bf16.msra.mxu1 %v9452_v7  ;;  %v9474_v7 = vld [vmem:[#allocation8 + $0x4a0] sm:$0xff]  }
 0x4b6   : > { %8553 = vmatprep.subr.bf16.mxu1 %v9857_v24 }
 0x4b9   : > { %8554 = vmatpush3.bf16.msra.mxu1 %v9454_v10  ;;  %v9475_v10 = vld [vmem:[#allocation8 + $0x458] sm:$0xff]  }
 0x4ba   : > { %8555 = vmatprep.subr.bf16.mxu1 %v9857_v24 }
 0x4bd   : > { %8556 = vmatpush3.bf16.msra.mxu1 %v9456_v9  ;;  %v10233_v9 = vld [vmem:[%s10034_s27 + $0x18] sm:$0xf] }
 0x4be   : > { %8557 = vmatprep.subr.bf16.mxu1 %v9857_v24  ;;  %v10239_v13 = vcombine.low %v10233_v9, %v7372_v11  ;;  %v9512_v11 = vld [vmem:[#allocation5 + $0x90] sm:$0xff]  }
 0x4c0   : > { %v3841_v59 = vrot.slane %v10239_v13, 1 }
 0x4c1   : > { %8558 = vmatpush3.bf16.msra.mxu1 %v9458_v12  ;;  %v9476_v12 = vld [vmem:[#allocation8 + $0x4a8] sm:$0xff]  }
 0x4c2   : > { %8559 = vmatprep.subr.bf16.mxu1 %v9857_v24 }
 0x4c5   : > { %8560 = vmatpush3.bf16.msra.mxu1 %v9460_v14  ;;  %v3607_v14 = vshll.u32 %v10230_v8, 16 }
 0x4c6   : > { %8561 = vmatprep.subr.bf16.mxu1 %v9857_v24 }
 0x4c9   : > { %8562 = vmatpush3.bf16.msra.mxu1 %v9462_v16 }
 0x4ca   : > { %8563 = vmatprep.subr.bf16.mxu1 %v9857_v24 }
 0x4cd   : > { %8564 = vmatpush3.bf16.msra.mxu1 %v9464_v18  ;;  %v3605_v18 = vshrl.u32 %v10230_v8, 16 }
 0x4ce   : > { %8589 = vmatprep.subr.bf16.mxu1 %v9857_v24 }
 0x539   : > { %v2567_v21 = vpop.f32.mrb[16].mxu0 }
 0x53a   : > { %v8467_v22 = vpop.f32.mrb[17].mxu0 }
 0x53b   : > { %v2570_v23 = vpop.f32.mrb[18].mxu0  ;;  %v3612_v22 = vshll.u32 %v10239_v13, 16 }
 0x53c   : > { %v8468_v25 = vpop.f32.mrb[19].mxu0 }
 0x53d   : > { %v9480_v25 = vld [vmem:[#allocation8 + $0x4b8] sm:$0xff]  }
 0x543   : > { %v2478_v26 = vpop.f32.mrb[28].mxu1 }
 0x544   : > { %v2568_v27 = vadd.f32 %v2567_v21, %v2478_v26  ;;  %v8447_v28 = vpop.f32.mrb[29].mxu1  ;;  %v3609_v21 = vrot.slane %v3607_v14, 1  ;;  %v9514_v14 = vld [vmem:[#allocation5 + $0xa0] sm:$0xff]  }
 0x545   : > { %v2481_v29 = vpop.f32.mrb[30].mxu1  ;;  %v9482_v28 = vld [vmem:[#allocation5 + $0x40] sm:$0xff]  }
 0x546   : > { %v2571_v30 = vadd.f32 %v2570_v23, %v2481_v29  ;;  %v8448_v31 = vpop.f32.mrb[31].mxu1  ;;  %v9479_v23 = vld [vmem:[#allocation8 + $0x468] sm:$0xff]   ;;  %v3610_v29 = vor.u32 %v3609_v21, %v3605_v18 }
 0x547   : > { %v9481_v31 = vld [vmem:[#allocation8 + $0x470] sm:$0xff]  }
 0x559   : > { %v2807_v32 = vpop.f32.mrb[20].mxu0 }
 0x55a   : > { %v8507_v33 = vpop.f32.mrb[21].mxu0 }
 0x55b   : > { %v2810_v34 = vpop.f32.mrb[22].mxu0  ;;  %v9484_v33 = vld [vmem:[#allocation5 + $0x48] sm:$0xff]  }
 0x55c   : > { %v8508_v35 = vpop.f32.mrb[23].mxu0 }
 0x55d   : > { %v9483_v35 = vld [vmem:[#allocation8 + $0x478] sm:$0xff]  }
 0x563   : > { %v2680_v36 = vpop.f32.mrb[32].mxu1 }
 0x564   : > { %v2687_v37 = vadd.f32 %v2680_v36, %v2568_v27  ;;  %v8487_v38 = vpop.f32.mrb[33].mxu1 }
 0x565   : > { %v2683_v39 = vpop.f32.mrb[34].mxu1  ;;  %v9485_v38 = vld [vmem:[#allocation8 + $0x4c0] sm:$0xff]  }
 0x566   : > { %v2688_v40 = vadd.f32 %v2683_v39, %v2571_v30  ;;  %v8488_v41 = vpop.f32.mrb[35].mxu1  ;;  %v2814_v42 = vadd.f32 %v2807_v32, %v2687_v37  ;;  %v3614_v30 = vrot.slane %v3612_v22, 1  ;;  %v9486_v37 = vld [vmem:[#allocation5 + $0x50] sm:$0xff]   ;;  %v9517_v22 = vld [vmem:[#allocation5 + $0xb8] sm:$0xff]  }
 0x567   : > { %v9487_v41 = vld [vmem:[#allocation8 + $0x4c8] sm:$0xff]  }
 0x568   : > { %v2815_v43 = vadd.f32 %v2810_v34, %v2688_v40  ;;  %v3615_v34 = vsel %vm416_vm0, %v3610_v29, %v3614_v30  ;;  %v9488_v40 = vld [vmem:[#allocation5 + $0x58] sm:$0xff]  }
 0x583   : > { %v2922_v45 = vpop.f32.mrb[36].mxu1 }
 0x584   : > { %v2929_v46 = vadd.f32 %v2922_v45, %v2814_v42  ;;  %v8527_v47 = vpop.f32.mrb[37].mxu1  ;;  %v9490_v42 = vld [vmem:[#allocation5 + $0x60] sm:$0xff]   ;;  %v9491_v45 = vld [vmem:[#allocation8 + $0x4d8] sm:$0xff]  }
 0x585   : > { %v2925_v48 = vpop.f32.mrb[38].mxu1  ;;  %v9493_v47 = vld [vmem:[#allocation8 + $0x4e0] sm:$0xff]  }
 0x586   : > { %v2937_v49 = vadd.f32 %v7325_v44, %v2929_v46  ;;  %v2930_v50 = vadd.f32 %v2925_v48, %v2815_v43  ;;  %v8528_v51 = vpop.f32.mrb[39].mxu1  ;;  %v9489_v43 = vld [vmem:[#allocation8 + $0x4d0] sm:$0xff]   ;;  %v9496_v48 = vld [vmem:[#allocation5 + $0x78] sm:$0xff]  }
 0x587   : > { %v9494_v46 = vld [vmem:[#allocation5 + $0x70] sm:$0xff]   ;;  %v9500_v51 = vld [vmem:[#allocation5] sm:$0xff]  }
 0x588   : > { %v2938_v52 = vadd.f32 %v7325_v44, %v2930_v50  ;;  %v2939_v53 = vmax.f32 %v2937_v49, 0.0  ;;  %v9492_v44 = vld [vmem:[#allocation5 + $0x68] sm:$0xff]   ;;  %v3616_v50 = vshrl.u32 %v10239_v13, 16 }
 0x589   : > { %v9495_v49 = vld [vmem:[#allocation8 + $0x4e8] sm:$0xff]  }
 0x58a   : > { %v2940_v54 = vmax.f32 %v2938_v52, 0.0  ;;  %v9497_v52 = vld [vmem:[#allocation8 + $0x4f0] sm:$0xff]   ;;  %v7402_v13 = vld [vmem:[%s10034_s27 + $0x1c] sm:$0xf] }
 0x58c   : > { %v2941_v55 = vpack.c.bf16 %v2940_v54, %v2939_v53  ;;  %v3618_v53 = vor.u32 %v3616_v50, %v3614_v30  ;;  %v9502_v54 = vld [vmem:[#allocation5 + $0x8] sm:$0xff]   ;;  %v9537_v50 = vld [vmem:[#allocation8 + $0x40] sm:$0xff]  }
 0x58d   : > { %v9520_v30 = vld [vmem:[#allocation5 + $0xc8] sm:$0xff]  }
 0x58e   : > { %2942 = vst [vmem:[#allocation2] sm:$0xff] %v2941_v55  ;;  %v9501_v55 = vld [vmem:[#allocation8 + $0x4f8] sm:$0xff]  }
 0x595   : > { %v2945_v57 = vld [vmem:[#allocation2] sm:$0x3f] }
 0x596   : > { %v2963_v58 = vld [vmem:[#allocation2] sm:$0x7f]  ;;  %8566 = vmatmul.mubr.bf16.vlgmr.msra.gmra.mrb[40].mxu1 %v2945_v57 }
 0x597   : > { %v2984_v60 = vshll.u32 %v2963_v58, 16  ;;  %8590 = vmatpush3.bf16.msra.mxu1 %v9466_v56  ;;  %8605 = vmatprep.mubr.msk.bf16.mxu1 %vm9858_vm4, %v9857_v24  ;;  %v2982_v62 = vshrl.u32 %v2963_v58, 16  ;;  %v3279_v16 = vld [vmem:[#allocation2] sm:$0xfe] }
 0x598   : > { %8591 = vmatprep.subr.bf16.mxu1 %v9857_v24  ;;  %v3298_v19 = vshrl.u32 %v3279_v16, 16  ;;  %v3301_v20 = vshll.u32 %v3279_v16, 16  ;;  %v3167_v36 = vld [vmem:[#allocation2] sm:$0x7e]  ;;  %v10271_v16 = vcombine.low %v10233_v9, %v7402_v13  ;;  %v9541_v13 = vld [vmem:[#allocation8 + $0x60] sm:$0xff]  }
 0x599   : > { %v2986_v63 = vrot.slane %v2984_v60, 1  ;;  %v3186_v39 = vrot.slane %v3167_v36, 1  ;;  %v3397_v56 = vld [vmem:[#allocation2] sm:$0xfc]  ;;  %v9504_v60 = vld [vmem:[#allocation5 + $0x18] sm:$0xff]  }
 0x59a   : > { %v3300_v26 = vrot.slane %v3298_v19, 1  ;;  %v3303_v27 = vrot.slane %v3301_v20, 2  ;;  %v9503_v57 = vld [vmem:[#allocation5 + $0x10] sm:$0xff]   ;;  %v3416_v58 = vrot.slane %v3397_v56, 2  ;;  %v3975_v20 = vshrl.u32 %v10271_v16, 16 }
 0x59b   : > { %v2987_v1 = vor.u32 %v2986_v63, %v2982_v62  ;;  %8592 = vmatpush3.bf16.msra.mxu1 %v9468_v61  ;;  %v9505_v61 = vld [vmem:[#allocation5 + $0x20] sm:$0xff]   ;;  %v9506_v62 = vld [vmem:[#allocation5 + $0x28] sm:$0xff]   ;;  %v9507_v63 = vld [vmem:[#allocation5 + $0x30] sm:$0xff]   ;;  %v3978_v21 = vshll.u32 %v10271_v16, 16 }
 0x59c   : > { %8593 = vmatprep.subr.bf16.mxu1 %v9857_v24  ;;  %v3304_v32 = vor.u32 %v3303_v27, %v3300_v26  ;;  %v3977_v26 = vrot.slane %v3975_v20, 1  ;;  %v9525_v36 = vld [vmem:[#allocation5 + $0xf0] sm:$0xff]  }
 0x59d   : > { %8546 = vmatmul.mubr.bf16.vlgmr.msra.gmra.mrb[24].mxu0 %v2987_v1  ;;  %v9508_v1 = vld [vmem:[#allocation5 + $0x38] sm:$0xff]   ;;  %v3980_v27 = vrot.slane %v3978_v21, 2 }
 0x59e   : > { %8570 = vmatpush3.bf16.msra.mxu0 %v9469_v0  ;;  %8585 = vmatprep.mubr.msk.bf16.mxu0 %vm9858_vm4, %v9857_v24  ;;  %v7392_v0 = vld [vmem:[%s10034_s27 + $0x10] sm:$0xe] }
 0x59f   : > { %8571 = vmatprep.subr.bf16.mxu0 %v9857_v24  ;;  %8594 = vmatpush3.bf16.msra.mxu1 %v9470_v2  ;;  %v7393_v2 = vcombine.low %v7392_v0, %v10225_v6  ;;  %v3981_v29 = vor.u32 %v3980_v27, %v3977_v26 }
 0x5a0   : > { %8595 = vmatprep.subr.bf16.mxu1 %v9857_v24 }
 0x5a1   : > { %v3967_v18 = vshrl.u32 %v7393_v2, 16  ;;  %v3970_v19 = vshll.u32 %v7393_v2, 16 }
 0x5a2   : > { %8572 = vmatpush3.bf16.msra.mxu0 %v9471_v3  ;;  %v7371_v3 = vld [vmem:[%s10034_s27 + $0x1c] sm:$0x3] }
 0x5a3   : > { %8573 = vmatprep.subr.bf16.mxu0 %v9857_v24  ;;  %8596 = vmatpush3.bf16.msra.mxu1 %v9472_v4  ;;  %v9509_v4 = vld [vmem:[#allocation5 + $0x80] sm:$0xff]  }
 0x5a4   : > { %8597 = vmatprep.subr.bf16.mxu1 %v9857_v24 }
 0x5a6   : > { %8574 = vmatpush3.bf16.msra.mxu0 %v9473_v5  ;;  %v3840_v5 = vrot.slane %v7393_v2, 1 }
 0x5a7   : > { %8575 = vmatprep.subr.bf16.mxu0 %v9857_v24  ;;  %8598 = vmatpush3.bf16.msra.mxu1 %v9474_v7  ;;  %v7383_v7 = vcombine.low %v10233_v9, %v7371_v3  ;;  %v9519_v9 = vld [vmem:[#allocation5 + $0xc0] sm:$0xff]  }
 0x5a8   : > { %8599 = vmatprep.subr.bf16.mxu1 %v9857_v24 }
 0x5aa   : > { %8576 = vmatpush3.bf16.msra.mxu0 %v9475_v10  ;;  %v3842_v10 = vsel %vm654_vm2, %v3840_v5, %v3841_v59 }
 0x5ab   : > { %8577 = vmatprep.subr.bf16.mxu0 %v9857_v24  ;;  %8600 = vmatpush3.bf16.msra.mxu1 %v9476_v12  ;;  %v9513_v12 = vld [vmem:[#allocation5 + $0x98] sm:$0xff]  }
 0x5ac   : > { %8601 = vmatprep.subr.bf16.mxu1 %v9857_v24 }
 0x5ae   : > { %8578 = vmatpush3.bf16.msra.mxu0 %v9477_v15  ;;  %v9515_v15 = vld [vmem:[#allocation5 + $0xa8] sm:$0xff]  }
 0x5af   : > { %8579 = vmatprep.subr.bf16.mxu0 %v9857_v24  ;;  %8602 = vmatpush3.bf16.msra.mxu1 %v9478_v17  ;;  %v9516_v17 = vld [vmem:[#allocation5 + $0xb0] sm:$0xff]  }
 0x5b0   : > { %8603 = vmatprep.subr.bf16.mxu1 %v9857_v24 }
 0x5b2   : > { %8580 = vmatpush3.bf16.msra.mxu0 %v9479_v23  ;;  %v3969_v23 = vrot.slane %v3967_v18, 1 }
 0x5b3   : > { %8581 = vmatprep.subr.bf16.mxu0 %v9857_v24  ;;  %8604 = vmatpush3.bf16.msra.mxu1 %v9480_v25  ;;  %v3972_v25 = vrot.slane %v3970_v19, 2 }
 0x5b4   : > { %8629 = vmatprep.subr.bf16.mxu1 %v9482_v28 }
 0x5b6   : > { %8582 = vmatpush3.bf16.msra.mxu0 %v9481_v31  ;;  %8606 = vmatmul.mubr.bf16.vlgmr.msra.gmra.mrb[44].mxu1 %v3304_v32  ;;  %v9521_v32 = vld [vmem:[#allocation5 + $0xd0] sm:$0xff]  }
 0x5b7   : > { %8583 = vmatprep.subr.bf16.mxu0 %v9857_v24  ;;  %8630 = vmatpush3.bf16.msra.mxu1 %v9482_v28  ;;  %v3973_v28 = vor.u32 %v3972_v25, %v3969_v23  ;;  %v9542_v23 = vld [vmem:[#allocation8 + $0x68] sm:$0xff]   ;;  %v9543_v25 = vld [vmem:[#allocation8 + $0x70] sm:$0xff]  }
 0x5b8   : > { %8645 = vmatprep.mubr.bf16.mxu1 %v3615_v34  ;;  %8631 = vmatprep.subr.bf16.mxu1 %v9484_v33  ;;  %v9523_v34 = vld [vmem:[#allocation5 + $0xe0] sm:$0xff]  }
 0x5b9   : > { %v3982_v31 = vsel %vm782_vm3, %v3973_v28, %v3981_v29  ;;  %v9544_v28 = vld [vmem:[#allocation8 + $0x78] sm:$0xff]  }
 0x5ba   : > { %8584 = vmatpush3.bf16.msra.mxu0 %v9483_v35  ;;  %v9524_v35 = vld [vmem:[#allocation5 + $0xe8] sm:$0xff]  }
 0x5bb   : > { %8609 = vmatprep.subr.bf16.mxu0 %v9857_v24  ;;  %8632 = vmatpush3.bf16.msra.mxu1 %v9484_v33  ;;  %v9522_v33 = vld [vmem:[#allocation5 + $0xd8] sm:$0xff]  }
 0x5bc   : > { %8633 = vmatprep.subr.bf16.mxu1 %v9486_v37 }
 0x5bd   : > { %8586 = vmatmul.mubr.bf16.vlgmr.msra.gmra.mrb[28].mxu0 %v3186_v39 }
 0x5be   : > { %8610 = vmatpush3.bf16.msra.mxu0 %v9485_v38  ;;  %8625 = vmatprep.mubr.msk.bf16.mxu0 %vm9858_vm4, %v9857_v24  ;;  %v9526_v38 = vld [vmem:[#allocation5 + $0xf8] sm:$0xff]  }
 0x5bf   : > { %8611 = vmatprep.subr.bf16.mxu0 %v9857_v24  ;;  %8634 = vmatpush3.bf16.msra.mxu1 %v9486_v37  ;;  %v7412_v37 = vld [vmem:[%s10034_s27 + $0x10] sm:$0xc]  ;;  %s7618_s27 = sshll.u32 %s9931_s13, 5  ;;  %s9781_s13 = scalar_lea.vmem %s10566_s29, 32 }
 0x5c0   : > { %8635 = vmatprep.subr.bf16.mxu1 %v9488_v40  ;;  %v7413_v39 = vcombine.low %v7412_v37, %v10225_v6  ;;  %v9532_v6 = vld [vmem:[#allocation5 + $0x120] sm:$0xff]   ;;  %s10564_s17 = scalar_lea.hbm %s10615_s9, %s7618_s27  ;;  %p9782_p12 = scmp.ne.s32.totalorder %s10566_s29, %s9781_s13 }
 0x5c1   : > { %p9789_p7 = scmp.lt.s32.totalorder %s9787_s11, %s9781_s13 }
 0x5c2   : > { %8612 = vmatpush3.bf16.msra.mxu0 %v9487_v41  ;;  %v4106_v41 = vrot.slane %v7413_v39, 2  ;;  %p9783_p2 = pnand %p9782_p12, %p10634_p1 }
 0x5c3   : > { %8613 = vmatprep.subr.bf16.mxu0 %v9857_v24  ;;  %8636 = vmatpush3.bf16.msra.mxu1 %v9488_v40  ;;  %v9528_v40 = vld [vmem:[#allocation5 + $0x100] sm:$0xff]   ;;  %p9790_p8 = por %p9789_p7, %p9788_p4 }
 0x5c4   : > { %8637 = vmatprep.subr.bf16.mxu1 %v9490_v42  ;;  %p9784_p3 = pneg %p9783_p2 }
 0x5c6   : > { %8614 = vmatpush3.bf16.msra.mxu0 %v9489_v43  ;;  %v9529_v43 = vld [vmem:[#allocation5 + $0x108] sm:$0xff]   ;;  %p9791_p11 = pnand %p9790_p8, %p9784_p3 }
 0x5c7   : > { %8615 = vmatprep.subr.bf16.mxu0 %v9857_v24  ;;  %8638 = vmatpush3.bf16.msra.mxu1 %v9490_v42  ;;  %v4107_v42 = vrot.slane %v10271_v16, 2 }
 0x5c8   : > { %8639 = vmatprep.subr.bf16.mxu1 %v9492_v44 }
 0x5ca   : > { %8616 = vmatpush3.bf16.msra.mxu0 %v9491_v45  ;;  %v9530_v45 = vld [vmem:[#allocation5 + $0x110] sm:$0xff]  }
 0x5cb   : > { %8617 = vmatprep.subr.bf16.mxu0 %v9857_v24  ;;  %8640 = vmatpush3.bf16.msra.mxu1 %v9492_v44  ;;  %v4108_v44 = vsel %vm924_vm1, %v4106_v41, %v4107_v42 }
 0x5cc   : > { %8641 = vmatprep.subr.bf16.mxu1 %v9494_v46 }
 0x5ce   : > { %8618 = vmatpush3.bf16.msra.mxu0 %v9493_v47  ;;  %v9533_v47 = vld [vmem:[#allocation5 + $0x128] sm:$0xff]  }
 0x5cf   : > { %8619 = vmatprep.subr.bf16.mxu0 %v9857_v24  ;;  %8642 = vmatpush3.bf16.msra.mxu1 %v9494_v46  ;;  %v9531_v46 = vld [vmem:[#allocation5 + $0x118] sm:$0xff]  }
 0x5d0   : > { %8643 = vmatprep.subr.bf16.mxu1 %v9496_v48 }
 0x5d2   : > { %8620 = vmatpush3.bf16.msra.mxu0 %v9495_v49  ;;  %v9535_v49 = vld [vmem:[#allocation5 + $0x138] sm:$0xff]  }
 0x5d3   : > { %8621 = vmatprep.subr.bf16.mxu0 %v9857_v24  ;;  %8644 = vmatpush3.bf16.msra.mxu1 %v9496_v48  ;;  %v9534_v48 = vld [vmem:[#allocation5 + $0x130] sm:$0xff]  }
 0x5d4   : > { %8649 = vmatprep.subr.bf16.mxu1 %v9500_v51 }
 0x5d6   : > { %8622 = vmatpush3.bf16.msra.mxu0 %v9497_v52  ;;  %8646 = vmatmul.mubr.bf16.vlgmr.msra.gmra.mrb[48].mxu1 %v3618_v53 }
 0x5d7   : > { %8623 = vmatprep.subr.bf16.mxu0 %v9857_v24  ;;  %8650 = vmatpush3.bf16.msra.mxu1 %v9500_v51  ;;  %v9538_v51 = vld [vmem:[#allocation8 + $0x48] sm:$0xff]  }
 0x5d8   : > { %8665 = vmatprep.mubr.bf16.mxu1 %v10230_v8  ;;  %8651 = vmatprep.subr.bf16.mxu1 %v9502_v54  ;;  %v9511_v8 = vld [vmem:[#allocation5 + $0x88] sm:$0xff]  }
 0x5da   : > { %8624 = vmatpush3.bf16.msra.mxu0 %v9501_v55 }
 0x5db   : > { %8652 = vmatpush3.bf16.msra.mxu1 %v9502_v54  ;;  %8729 = vmatprep.subr.bf16.mxu0 %v9537_v50 }
 0x5dc   : > { %8653 = vmatprep.subr.bf16.mxu1 %v9503_v57 }
 0x5dd   : > { %8626 = vmatmul.mubr.bf16.vlgmr.msra.gmra.mrb[32].mxu0 %v3416_v58 }
 0x5de   : > { %8730 = vmatpush3.bf16.msra.mxu0 %v9537_v50 }
 0x5df   : > { %8654 = vmatpush3.bf16.msra.mxu1 %v9503_v57  ;;  %8731 = vmatprep.subr.bf16.mxu0 %v9538_v51 }
 0x5e0   : > { %8655 = vmatprep.subr.bf16.mxu1 %v9504_v60 }
 0x5e2   : > { %8732 = vmatpush3.bf16.msra.mxu0 %v9538_v51 }
 0x5e3   : > { %8656 = vmatpush3.bf16.msra.mxu1 %v9504_v60 }
 0x5e4   : > { %8657 = vmatprep.subr.bf16.mxu1 %v9505_v61 }
 0x5e7   : > { %8658 = vmatpush3.bf16.msra.mxu1 %v9505_v61 }
 0x5e8   : > { %8659 = vmatprep.subr.bf16.mxu1 %v9506_v62 }
 0x5eb   : > { %8660 = vmatpush3.bf16.msra.mxu1 %v9506_v62 }
 0x5ec   : > { %8661 = vmatprep.subr.bf16.mxu1 %v9507_v63 }
 0x5ef   : > { %8662 = vmatpush3.bf16.msra.mxu1 %v9507_v63 }
 0x5f0   : > { %8663 = vmatprep.subr.bf16.mxu1 %v9508_v1 }
 0x5f3   : > { %8664 = vmatpush3.bf16.msra.mxu1 %v9508_v1 }
 0x5f4   : > { %8669 = vmatprep.subr.bf16.mxu1 %v9509_v4 }
 0x5f6   : > { %8666 = vmatmul.mubr.bf16.vlgmr.msra.gmra.mrb[48].mxu1 %v7383_v7 }
 0x5f7   : > { %8670 = vmatpush3.bf16.msra.mxu1 %v9509_v4  ;;  %8685 = vmatprep.mubr.bf16.mxu1 %v3842_v10 }
 0x5f8   : > { %8671 = vmatprep.subr.bf16.mxu1 %v9511_v8 }
 0x5fb   : > { %8672 = vmatpush3.bf16.msra.mxu1 %v9511_v8 }
 0x5fc   : > { %8673 = vmatprep.subr.bf16.mxu1 %v9512_v11 }
 0x5ff   : > { %8674 = vmatpush3.bf16.msra.mxu1 %v9512_v11 }
 0x600   : > { %8675 = vmatprep.subr.bf16.mxu1 %v9513_v12 }
 0x603   : > { %8676 = vmatpush3.bf16.msra.mxu1 %v9513_v12  ;;  %v9539_v12 = vld [vmem:[#allocation8 + $0x50] sm:$0xff]  }
 0x604   : > { %8677 = vmatprep.subr.bf16.mxu1 %v9514_v14  ;;  %8733 = vmatprep.subr.bf16.mxu0 %v9539_v12 }
 0x605   : > { %8734 = vmatpush3.bf16.msra.mxu0 %v9539_v12 }
 0x607   : > { %8678 = vmatpush3.bf16.msra.mxu1 %v9514_v14  ;;  %v9540_v14 = vld [vmem:[#allocation8 + $0x58] sm:$0xff]  }
 0x608   : > { %8679 = vmatprep.subr.bf16.mxu1 %v9515_v15  ;;  %8735 = vmatprep.subr.bf16.mxu0 %v9540_v14 }
 0x609   : > { %8736 = vmatpush3.bf16.msra.mxu0 %v9540_v14 }
 0x60a   : > { %8737 = vmatprep.subr.bf16.mxu0 %v9541_v13 }
 0x60b   : > { %8680 = vmatpush3.bf16.msra.mxu1 %v9515_v15  ;;  %v7367_v15 = vld [vmem:[%s10609_s3 + $0x4] ss:$0 sm:$0xff] }
 0x60c   : > { %8681 = vmatprep.subr.bf16.mxu1 %v9516_v17 }
 0x60d   : > { %8738 = vmatpush3.bf16.msra.mxu0 %v9541_v13 }
 0x60e   : > { %8739 = vmatprep.subr.bf16.mxu0 %v9542_v23 }
 0x60f   : > { %8682 = vmatpush3.bf16.msra.mxu1 %v9516_v17 }
 0x610   : > { %8683 = vmatprep.subr.bf16.mxu1 %v9517_v22 }
 0x611   : > { %8740 = vmatpush3.bf16.msra.mxu0 %v9542_v23  ;;  %v9548_v23 = vld [vmem:[#allocation8 + $0x18] sm:$0xff]  }
 0x612   : > { %8741 = vmatprep.subr.bf16.mxu0 %v9543_v25 }
 0x613   : > { %8684 = vmatpush3.bf16.msra.mxu1 %v9517_v22 }
 0x614   : > { %8689 = vmatprep.subr.bf16.mxu1 %v9519_v9 }
 0x615   : > { %8742 = vmatpush3.bf16.msra.mxu0 %v9543_v25  ;;  %v9549_v25 = vld [vmem:[#allocation8 + $0x20] sm:$0xff]  }
 0x616   : > { %8686 = vmatmul.mubr.bf16.vlgmr.msra.gmra.mrb[48].mxu1 %v3841_v59  ;;  %8743 = vmatprep.subr.bf16.mxu0 %v9544_v28 }
 0x617   : > { %8690 = vmatpush3.bf16.msra.mxu1 %v9519_v9  ;;  %8705 = vmatprep.mubr.bf16.mxu1 %v3982_v31 }
 0x618   : > { %8691 = vmatprep.subr.bf16.mxu1 %v9520_v30 }
 0x619   : > { %8744 = vmatpush3.bf16.msra.mxu0 %v9544_v28 }
 0x61b   : > { %8692 = vmatpush3.bf16.msra.mxu1 %v9520_v30 }
 0x61c   : > { %8693 = vmatprep.subr.bf16.mxu1 %v9521_v32 }
 0x61f   : > { %8694 = vmatpush3.bf16.msra.mxu1 %v9521_v32 }
 0x620   : > { %8695 = vmatprep.subr.bf16.mxu1 %v9522_v33 }
 0x623   : > { %8696 = vmatpush3.bf16.msra.mxu1 %v9522_v33 }
 0x624   : > { %8697 = vmatprep.subr.bf16.mxu1 %v9523_v34 }
 0x627   : > { %8698 = vmatpush3.bf16.msra.mxu1 %v9523_v34 }
 0x628   : > { %8699 = vmatprep.subr.bf16.mxu1 %v9524_v35 }
 0x62b   : > { %8700 = vmatpush3.bf16.msra.mxu1 %v9524_v35 }
 0x62c   : > { %8701 = vmatprep.subr.bf16.mxu1 %v9525_v36 }
 0x62f   : > { %8702 = vmatpush3.bf16.msra.mxu1 %v9525_v36 }
 0x630   : > { %8703 = vmatprep.subr.bf16.mxu1 %v9526_v38 }
 0x633   : > { %8704 = vmatpush3.bf16.msra.mxu1 %v9526_v38  ;;  %v9545_v38 = vld [vmem:[#allocation8] sm:$0xff]  }
 0x634   : > { %8709 = vmatprep.subr.bf16.mxu1 %v9528_v40  ;;  %8749 = vmatprep.subr.bf16.mxu0 %v9545_v38 }
 0x636   : > { %8706 = vmatmul.mubr.bf16.vlgmr.msra.gmra.mrb[48].mxu1 %v3981_v29 }
 0x637   : > { %8710 = vmatpush3.bf16.msra.mxu1 %v9528_v40  ;;  %8725 = vmatprep.mubr.bf16.mxu1 %v4108_v44 }
 0x638   : > { %8711 = vmatprep.subr.bf16.mxu1 %v9529_v43 }
 0x63b   : > { %8712 = vmatpush3.bf16.msra.mxu1 %v9529_v43 }
 0x63c   : > { %8713 = vmatprep.subr.bf16.mxu1 %v9530_v45 }
 0x63f   : > { %8714 = vmatpush3.bf16.msra.mxu1 %v9530_v45 }
 0x640   : > { %8715 = vmatprep.subr.bf16.mxu1 %v9531_v46 }
 0x643   : > { %8716 = vmatpush3.bf16.msra.mxu1 %v9531_v46 }
 0x644   : > { %8717 = vmatprep.subr.bf16.mxu1 %v9532_v6 }
 0x647   : > { %8718 = vmatpush3.bf16.msra.mxu1 %v9532_v6 }
 0x648   : > { %8719 = vmatprep.subr.bf16.mxu1 %v9533_v47 }
 0x64b   : > { %8720 = vmatpush3.bf16.msra.mxu1 %v9533_v47 }
 0x64c   : > { %8721 = vmatprep.subr.bf16.mxu1 %v9534_v48 }
 0x64f   : > { %8722 = vmatpush3.bf16.msra.mxu1 %v9534_v48 }
 0x650   : > { %8723 = vmatprep.subr.bf16.mxu1 %v9535_v49 }
 0x653   : > { %8724 = vmatpush3.bf16.msra.mxu1 %v9535_v49 }
 0x656   : > { %8726 = vmatmul.mubr.bf16.vlgmr.msra.gmra.mrb[48].mxu1 %v4107_v42 }
 0x669   : > { %v3160_v52 = vpop.f32.mrb[40].mxu1 }
 0x66a   : > { %v8567_v53 = vpop.f32.mrb[41].mxu1 }
 0x66b   : > { %v3163_v54 = vpop.f32.mrb[42].mxu1 }
 0x66c   : > { %v8568_v55 = vpop.f32.mrb[43].mxu1 }
 0x670   : > { %v3071_v56 = vpop.f32.mrb[24].mxu0 }
 0x671   : > { %v3161_v57 = vadd.f32 %v3160_v52, %v3071_v56  ;;  %v8547_v58 = vpop.f32.mrb[25].mxu0 }
 0x672   : > { %v3074_v60 = vpop.f32.mrb[26].mxu0  ;;  %v7422_v58 = vld [vmem:[%s10609_s3] ss:$0 sm:$0xff] }
 0x673   : > { %v3164_v61 = vadd.f32 %v3163_v54, %v3074_v60  ;;  %v8548_v62 = vpop.f32.mrb[27].mxu0 }
 0x689   : > { %v3388_v63 = vpop.f32.mrb[44].mxu1 }
 0x68a   : > { %v8607_v0 = vpop.f32.mrb[45].mxu1 }
 0x68b   : > { %v3391_v1 = vpop.f32.mrb[46].mxu1 }
 0x68c   : > { %v8608_v2 = vpop.f32.mrb[47].mxu1 }
 0x690   : > { %v3270_v3 = vpop.f32.mrb[28].mxu0 }
 0x691   : > { %v3277_v4 = vadd.f32 %v3270_v3, %v3161_v57  ;;  %v8587_v5 = vpop.f32.mrb[29].mxu0 }
 0x692   : > { %v3273_v59 = vpop.f32.mrb[30].mxu0 }
 0x693   : > { %v3278_v7 = vadd.f32 %v3273_v59, %v3164_v61  ;;  %v8588_v8 = vpop.f32.mrb[31].mxu0  ;;  %v3395_v10 = vadd.f32 %v3388_v63, %v3277_v4 }
 0x695   : > { %v3396_v11 = vadd.f32 %v3391_v1, %v3278_v7 }
 0x6b0   : > { %v3500_v16 = vpop.f32.mrb[32].mxu0 }
 0x6b1   : > { %v3507_v17 = vadd.f32 %v3500_v16, %v3395_v10  ;;  %v8627_v18 = vpop.f32.mrb[33].mxu0 }
 0x6b2   : > { %v3503_v19 = vpop.f32.mrb[34].mxu0 }
 0x6b3   : > { %v3515_v20 = vadd.f32 %v7367_v15, %v3507_v17  ;;  %v3508_v21 = vadd.f32 %v3503_v19, %v3396_v11  ;;  %v8628_v22 = vpop.f32.mrb[35].mxu0 }
 0x6b4   : > { %v9547_v22 = vld [vmem:[#allocation8 + $0x10] sm:$0xff]  }
 0x6b5   : > { %v3516_v26 = vadd.f32 %v7367_v15, %v3508_v21  ;;  %v3517_v27 = vmax.f32 %v3515_v20, 0.0  ;;  %v9546_v21 = vld [vmem:[#allocation8 + $0x8] sm:$0xff]  }
 0x6b7   : > { %v3518_v9 = vmax.f32 %v3516_v26, 0.0  ;;  %v3529_v31 = vmul.f32 %v3517_v27, %v3517_v27  ;;  %v9550_v26 = vld [vmem:[#allocation8 + $0x28] sm:$0xff]  }
 0x6b9   : > { %v3520_v29 = vsel %vm3519_vm5, %v3518_v9, 0.0  ;;  %v3530_v30 = vmul.f32 %v3518_v9, %v3518_v9  ;;  %v9552_v9 = vld [vmem:[#allocation8 + $0x38] sm:$0xff]  }
 0x6ba   : > { %v3521_v32 = vadd.f32 %v3520_v29, %v3517_v27  ;;  %v9551_v27 = vld [vmem:[#allocation8 + $0x30] sm:$0xff]   ;;  %v9553_v29 = vld [vmem:[#allocation8 + $0x80] sm:$0xff]  }
 0x6bb   : > { %v3531_v33 = vsel %vm3519_vm5, %v3530_v30, 0.0 }
 0x6bc   : > { %v3522_v34 = vrot.slane %v3521_v32, 4  ;;  %v3532_v35 = vadd.f32 %v3531_v33, %v3529_v31 }
 0x6be   : > { %v3523_v36 = vadd.f32 %v3522_v34, %v3521_v32  ;;  %v3533_v37 = vrot.slane %v3532_v35, 4  ;;  %v9554_v32 = vld [vmem:[#allocation8 + $0x88] sm:$0xff]  }
 0x6c0   : > { %v3524_v39 = vrot.slane %v3523_v36, 2  ;;  %v3534_v40 = vadd.f32 %v3533_v37, %v3532_v35  ;;  %v9555_v35 = vld [vmem:[#allocation8 + $0x90] sm:$0xff]   ;;  %v9557_v37 = vld [vmem:[#allocation8 + $0xa0] sm:$0xff]  }
 0x6c2   : > { %v3525_v41 = vadd.f32 %v3524_v39, %v3523_v36  ;;  %v3535_v42 = vrot.slane %v3534_v40, 2  ;;  %v9556_v36 = vld [vmem:[#allocation8 + $0x98] sm:$0xff]  }
 0x6c4   : > { %v3526_v43 = vrot.slane %v3525_v41, 1  ;;  %v3536_v44 = vadd.f32 %v3535_v42, %v3534_v40  ;;  %v9559_v40 = vld [vmem:[#allocation8 + $0xb0] sm:$0xff]  }
 0x6c6   : > { %v3527_v45 = vadd.f32 %v3526_v43, %v3525_v41  ;;  %v3537_v46 = vrot.slane %v3536_v44, 1 }
 0x6c8   : > { %v3540_v6 = vmul.f32 0.083333336, %v3527_v45  ;;  %v3538_v48 = vadd.f32 %v3537_v46, %v3536_v44  ;;  %v9560_v45 = vld [vmem:[#allocation8 + $0xb8] sm:$0xff]  }
 0x6ca   : > { %v3541_v47 = vmul.f32 12.0, %v3540_v6  ;;  %3553 = vst [vmem:[#allocation3] sm:$0x1] %v3540_v6 }
 0x6cc   : > { %v3542_v49 = vmul.f32 %v3541_v47, %v3540_v6 }
 0x6ce   : > { %v3543_v50 = vsub.f32 %v3538_v48, %v3542_v49  ;;  %v9561_v49 = vld [vmem:[#allocation8 + $0xc0] sm:$0xff]  }
 0x6d0   : > { %v3544_v51 = vmul.f32 0.09090909, %v3543_v50 }
 0x6d2   : > { %v3545_v52 = vmax.f32 %v3544_v51, 0.0 }
 0x6d4   : > { %9721 = vrsqrt.f32 %v3545_v52  ;;  %vm3548_vm6 = vcmp.eq.f32.partialorder %v3545_v52, inf  ;;  %v3551_v55 = vand.u32 2147483648, %v3545_v52  ;;  %vm3550_vm7 = vcmp.eq.f32.partialorder %v3545_v52, 0.0 }
 0x6de   : > { %v9722_v53 = vpop.eup %9721 }
 0x6df   : > { %v3547_v54 = vmul.f32 %v9722_v53, %v3545_v52 }
 0x6e1   : > { %v3549_v56 = vsel %vm3548_vm6, %v3545_v52, %v3547_v54  ;;  %v9562_v52 = vld [vmem:[#allocation8 + $0xc8] sm:$0xff]   ;;  %v9563_v54 = vld [vmem:[#allocation8 + $0xd0] sm:$0xff]  }
 0x6e2   : > { %v3552_v57 = vsel %vm3550_vm7, %v3551_v55, %v3549_v56  ;;  %v9564_v55 = vld [vmem:[#allocation8 + $0xd8] sm:$0xff]   ;;  %v9565_v56 = vld [vmem:[#allocation8 + $0xe0] sm:$0xff]  }
 0x6e3   : > { %3554 = vst [vmem:[#allocation4] sm:$0x1] %v3552_v57  ;;  %v9566_v57 = vld [vmem:[#allocation8 + $0xe8] sm:$0xff]  }
 0x729   : > { %v8727_v60 = vpop.f32.mrb[48].mxu1 }
 0x72a   : > { %v4220_v61 = vadd.f32 %v8727_v60, %v7422_v58  ;;  %v4193_v62 = vpop.f32.mrb[49].mxu1  ;;  %v9568_v60 = vld [vmem:[#allocation8 + $0xf8] sm:$0xff]  }
 0x72b   : > { %v4218_v63 = vadd.f32 %v7422_v58, %v4193_v62  ;;  %v8728_v0 = vpop.f32.mrb[50].mxu1  ;;  %v9569_v62 = vld [vmem:[#allocation8 + $0x100] sm:$0xff]  }
 0x72c   : > { %v4221_v1 = vadd.f32 %v8728_v0, %v7422_v58  ;;  %v4196_v2 = vpop.f32.mrb[51].mxu1  ;;  %v4224_v4 = vmax.f32 %v4220_v61, 0.0 }
 0x72d   : > { %v4219_v3 = vadd.f32 %v7422_v58, %v4196_v2  ;;  %v4222_v59 = vmax.f32 %v4218_v63, 0.0  ;;  %v9567_v58 = vld [vmem:[#allocation8 + $0xf0] sm:$0xff]  }
 0x72e   : > { %v4225_v5 = vmax.f32 %v4221_v1, 0.0  ;;  %v9570_v1 = vld [vmem:[#allocation8 + $0x108] sm:$0xff]  }
 0x72f   : > { %v4223_v7 = vmax.f32 %v4219_v3, 0.0  ;;  %v9571_v3 = vld [vmem:[#allocation8 + $0x110] sm:$0xff]  }
 0x730   : > { %v4227_v8 = vpack.c.bf16 %v4225_v5, %v4224_v4  ;;  %v9572_v4 = vld [vmem:[#allocation8 + $0x118] sm:$0xff]   ;;  %v9573_v5 = vld [vmem:[#allocation8 + $0x120] sm:$0xff]  }
 0x731   : > { %v4226_v10 = vpack.c.bf16 %v4223_v7, %v4222_v59  ;;  %v9574_v59 = vld [vmem:[#allocation8 + $0x128] sm:$0xff]   ;;  %v9575_v7 = vld [vmem:[#allocation8 + $0x130] sm:$0xff]  }
 0x732   : > { %4229 = vst [vmem:[#allocation2 + $0x8] sm:$0x3f] %v4227_v8  ;;  %v9576_v8 = vld [vmem:[#allocation8 + $0x138] sm:$0xff]  }
 0x733   : > { %4228 = vst [vmem:[#allocation2] sm:$0xff] %v4226_v10  ;;  %v4269_v11 = vshll.u32 %v4226_v10, 16  ;;  %v4267_v13 = vshrl.u32 %v4226_v10, 16 }
 0x735   : > { %v4271_v12 = vrot.slane %v4269_v11, 1  ;;  %v9578_v11 = vld [vmem:[#allocation8 + $0x148] sm:$0xff]  }
 0x737   : > { %v4272_v16 = vor.u32 %v4271_v12, %v4267_v13  ;;  %v9579_v12 = vld [vmem:[#allocation8 + $0x180] sm:$0xff]   ;;  %v9580_v13 = vld [vmem:[#allocation8 + $0x150] sm:$0xff]  }
 0x738   : > { %8829 = vmatprep.subr.bf16.mxu1 %v9579_v12 }
 0x739   : > { %v10288_v14 = vld [vmem:[#allocation2 + $0x8] sm:$0x1f]  ;;  %8830 = vmatpush3.bf16.msra.mxu1 %v9579_v12 }
 0x73a   : > { %v4274_v15 = vshll.u32 %v10288_v14, 16  ;;  %v4278_v18 = vshrl.u32 %v10288_v14, 16  ;;  %v4475_v28 = vld [vmem:[#allocation2] sm:$0xfe]  ;;  %v4495_v31 = vrot.slane %v10288_v14, 1 }
 0x73b   : > { %v4494_v30 = vrot.slane %v4475_v28, 1  ;;  %v4232_v33 = vld [vmem:[#allocation2 + $0x8] sm:$0xf]  ;;  %v4616_v41 = vshrl.u32 %v4475_v28, 16  ;;  %v4619_v42 = vshll.u32 %v4475_v28, 16  ;;  %v9581_v14 = vld [vmem:[#allocation8 + $0x188] sm:$0xff]  }
 0x73c   : > { %v4276_v17 = vrot.slane %v4274_v15, 1  ;;  %v10295_v39 = vld [vmem:[#allocation2 + $0x8] sm:$0x3f]  ;;  %v4733_v61 = vld [vmem:[#allocation2] sm:$0xfc]  ;;  %8831 = vmatprep.subr.bf16.mxu1 %v9581_v14 }
 0x73d   : > { %v4496_v34 = vsel %vm654_vm2, %v4494_v30, %v4495_v31  ;;  %v4624_v43 = vshrl.u32 %v10295_v39, 16  ;;  %v4627_v44 = vshll.u32 %v10295_v39, 16  ;;  %v4618_v46 = vrot.slane %v4616_v41, 1  ;;  %8832 = vmatpush3.bf16.msra.mxu1 %v9581_v14  ;;  %v9582_v15 = vld [vmem:[#allocation8 + $0x158] sm:$0xff]   ;;  %v9591_v28 = vld [vmem:[#allocation8 + $0x1b0] sm:$0xff]  }
 0x73e   : > { %v4277_v19 = vsel %vm416_vm0, %v4272_v16, %v4276_v17  ;;  %v4280_v20 = vor.u32 %v4278_v18, %v4276_v17  ;;  %v4621_v6 = vrot.slane %v4619_v42, 2  ;;  %v4752_v63 = vrot.slane %v4733_v61, 2  ;;  %v9583_v16 = vld [vmem:[#allocation8 + $0x190] sm:$0xff]   ;;  %v9584_v17 = vld [vmem:[#allocation8 + $0x160] sm:$0xff]   ;;  %v9593_v30 = vld [vmem:[#allocation8 + $0x1b8] sm:$0xff]  }
 0x73f   : > { %8745 = vmatprep.mubr.bf16.mxu0 %v4277_v19  ;;  %v4626_v47 = vrot.slane %v4624_v43, 1  ;;  %v4629_v48 = vrot.slane %v4627_v44, 2  ;;  %v4753_v0 = vrot.slane %v10295_v39, 2  ;;  %8833 = vmatprep.subr.bf16.mxu1 %v9583_v16 }
 0x740   : > { %8746 = vmatmul.mubr.bf16.vlgmr.msra.gmra.mrb[36].mxu0 %v4280_v20  ;;  %v4622_v50 = vor.u32 %v4621_v6, %v4618_v46  ;;  %v9585_v20 = vld [vmem:[#allocation8 + $0x198] sm:$0xff]  }
 0x741   : > { %8750 = vmatpush3.bf16.msra.mxu0 %v9545_v38  ;;  %8765 = vmatprep.mubr.bf16.mxu0 %v4226_v10  ;;  %v9558_v38 = vld [vmem:[#allocation8 + $0xa8] sm:$0xff]   ;;  %v4630_v51 = vor.u32 %v4629_v48, %v4626_v47  ;;  %v4754_v2 = vsel %vm924_vm1, %v4752_v63, %v4753_v0  ;;  %v9577_v10 = vld [vmem:[#allocation8 + $0x140] sm:$0xff]  }
 0x742   : > { %8751 = vmatprep.subr.bf16.mxu0 %v9546_v21  ;;  %8834 = vmatpush3.bf16.msra.mxu1 %v9583_v16 }
 0x743   : > { %v4631_v53 = vsel %vm782_vm3, %v4622_v50, %v4630_v51  ;;  %8835 = vmatprep.subr.bf16.mxu1 %v9585_v20 }
 0x745   : > { %8752 = vmatpush3.bf16.msra.mxu0 %v9546_v21 }
 0x746   : > { %8753 = vmatprep.subr.bf16.mxu0 %v9547_v22  ;;  %8836 = vmatpush3.bf16.msra.mxu1 %v9585_v20 }
 0x749   : > { %8754 = vmatpush3.bf16.msra.mxu0 %v9547_v22 }
 0x74a   : > { %8755 = vmatprep.subr.bf16.mxu0 %v9548_v23 }
 0x74d   : > { %8756 = vmatpush3.bf16.msra.mxu0 %v9548_v23  ;;  %v9586_v23 = vld [vmem:[#allocation8 + $0x168] sm:$0xff]  }
 0x74e   : > { %8757 = vmatprep.subr.bf16.mxu0 %v9549_v25 }
 0x751   : > { %8758 = vmatpush3.bf16.msra.mxu0 %v9549_v25  ;;  %v9587_v25 = vld [vmem:[#allocation8 + $0x1a0] sm:$0xff]  }
 0x752   : > { %8759 = vmatprep.subr.bf16.mxu0 %v9550_v26  ;;  %8837 = vmatprep.subr.bf16.mxu1 %v9587_v25 }
 0x753   : > { %8838 = vmatpush3.bf16.msra.mxu1 %v9587_v25 }
 0x755   : > { %8760 = vmatpush3.bf16.msra.mxu0 %v9550_v26  ;;  %v9588_v26 = vld [vmem:[#allocation8 + $0x170] sm:$0xff]  }
 0x756   : > { %8761 = vmatprep.subr.bf16.mxu0 %v9551_v27 }
 0x759   : > { %8762 = vmatpush3.bf16.msra.mxu0 %v9551_v27  ;;  %v9589_v27 = vld [vmem:[#allocation8 + $0x1a8] sm:$0xff]  }
 0x75a   : > { %8763 = vmatprep.subr.bf16.mxu0 %v9552_v9  ;;  %8839 = vmatprep.subr.bf16.mxu1 %v9589_v27 }
 0x75b   : > { %8840 = vmatpush3.bf16.msra.mxu1 %v9589_v27 }
 0x75c   : > { %8841 = vmatprep.subr.bf16.mxu1 %v9591_v28 }
 0x75d   : > { %8764 = vmatpush3.bf16.msra.mxu0 %v9552_v9  ;;  %v9590_v9 = vld [vmem:[#allocation8 + $0x178] sm:$0xff]  }
 0x75e   : > { %8769 = vmatprep.subr.bf16.mxu0 %v9553_v29 }
 0x75f   : > { %8842 = vmatpush3.bf16.msra.mxu1 %v9591_v28 }
 0x760   : > { %8766 = vmatmul.mubr.bf16.vlgmr.msra.gmra.mrb[40].mxu0 %v4232_v33  ;;  %8843 = vmatprep.subr.bf16.mxu1 %v9593_v30 }
 0x761   : > { %8770 = vmatpush3.bf16.msra.mxu0 %v9553_v29  ;;  %8785 = vmatprep.mubr.bf16.mxu0 %v4496_v34  ;;  %v9592_v29 = vld [vmem:[#allocation8 + $0x200] sm:$0xff]  }
 0x762   : > { %8771 = vmatprep.subr.bf16.mxu0 %v9554_v32 }
 0x763   : > { %8844 = vmatpush3.bf16.msra.mxu1 %v9593_v30  ;;  %v9597_v30 = vld [vmem:[#allocation8 + $0x1c8] sm:$0xff]  }
 0x765   : > { %8772 = vmatpush3.bf16.msra.mxu0 %v9554_v32 }
 0x766   : > { %8773 = vmatprep.subr.bf16.mxu0 %v9555_v35 }
 0x769   : > { %8774 = vmatpush3.bf16.msra.mxu0 %v9555_v35 }
 0x76a   : > { %8775 = vmatprep.subr.bf16.mxu0 %v9556_v36 }
 0x76d   : > { %8776 = vmatpush3.bf16.msra.mxu0 %v9556_v36 }
 0x76e   : > { %8777 = vmatprep.subr.bf16.mxu0 %v9557_v37 }
 0x771   : > { %8778 = vmatpush3.bf16.msra.mxu0 %v9557_v37 }
 0x772   : > { %8779 = vmatprep.subr.bf16.mxu0 %v9558_v38 }
 0x775   : > { %8780 = vmatpush3.bf16.msra.mxu0 %v9558_v38 }
 0x776   : > { %8781 = vmatprep.subr.bf16.mxu0 %v9559_v40 }
 0x779   : > { %8782 = vmatpush3.bf16.msra.mxu0 %v9559_v40 }
 0x77a   : > { %8783 = vmatprep.subr.bf16.mxu0 %v9560_v45 }
 0x77d   : > { %8784 = vmatpush3.bf16.msra.mxu0 %v9560_v45 }
 0x77e   : > { %8789 = vmatprep.subr.bf16.mxu0 %v9561_v49 }
 0x780   : > { %8786 = vmatmul.mubr.bf16.vlgmr.msra.gmra.mrb[44].mxu0 %v4495_v31  ;;  %v10302_v31 = vld [vmem:[#allocation8 + $0x1c0] sm:$0xff]  }
 0x781   : > { %8790 = vmatpush3.bf16.msra.mxu0 %v9561_v49  ;;  %8805 = vmatprep.mubr.bf16.mxu0 %v4631_v53 }
 0x782   : > { %8791 = vmatprep.subr.bf16.mxu0 %v9562_v52  ;;  %8869 = vmatprep.subr.bf16.mxu1 %v10302_v31 }
 0x785   : > { %8792 = vmatpush3.bf16.msra.mxu0 %v9562_v52  ;;  %v7464_v52 = vld [vmem:[%s10609_s3 + $0x1] ss:$0 sm:$0xff] }
 0x786   : > { %8793 = vmatprep.subr.bf16.mxu0 %v9563_v54 }
 0x789   : > { %8794 = vmatpush3.bf16.msra.mxu0 %v9563_v54 }
 0x78a   : > { %8795 = vmatprep.subr.bf16.mxu0 %v9564_v55 }
 0x78d   : > { %8796 = vmatpush3.bf16.msra.mxu0 %v9564_v55 }
 0x78e   : > { %8797 = vmatprep.subr.bf16.mxu0 %v9565_v56 }
 0x791   : > { %8798 = vmatpush3.bf16.msra.mxu0 %v9565_v56 }
 0x792   : > { %8799 = vmatprep.subr.bf16.mxu0 %v9566_v57 }
 0x795   : > { %8800 = vmatpush3.bf16.msra.mxu0 %v9566_v57 }
 0x796   : > { %8801 = vmatprep.subr.bf16.mxu0 %v9567_v58 }
 0x799   : > { %8802 = vmatpush3.bf16.msra.mxu0 %v9567_v58 }
 0x79a   : > { %8803 = vmatprep.subr.bf16.mxu0 %v9568_v60 }
 0x79d   : > { %8804 = vmatpush3.bf16.msra.mxu0 %v9568_v60 }
 0x79e   : > { %8809 = vmatprep.subr.bf16.mxu0 %v9569_v62 }
 0x7a0   : > { %8806 = vmatmul.mubr.bf16.vlgmr.msra.gmra.mrb[48].mxu0 %v4630_v51 }
 0x7a1   : > { %8810 = vmatpush3.bf16.msra.mxu0 %v9569_v62  ;;  %8825 = vmatprep.mubr.bf16.mxu0 %v4754_v2 }
 0x7a2   : > { %8811 = vmatprep.subr.bf16.mxu0 %v9570_v1 }
 0x7a5   : > { %8812 = vmatpush3.bf16.msra.mxu0 %v9570_v1 }
 0x7a6   : > { %8813 = vmatprep.subr.bf16.mxu0 %v9571_v3 }
 0x7a9   : > { %8814 = vmatpush3.bf16.msra.mxu0 %v9571_v3 }
 0x7aa   : > { %8815 = vmatprep.subr.bf16.mxu0 %v9572_v4 }
 0x7ad   : > { %8816 = vmatpush3.bf16.msra.mxu0 %v9572_v4 }
 0x7ae   : > { %8817 = vmatprep.subr.bf16.mxu0 %v9573_v5 }
 0x7b1   : > { %8818 = vmatpush3.bf16.msra.mxu0 %v9573_v5 }
 0x7b2   : > { %8819 = vmatprep.subr.bf16.mxu0 %v9574_v59 }
 0x7b5   : > { %8820 = vmatpush3.bf16.msra.mxu0 %v9574_v59 }
 0x7b6   : > { %8821 = vmatprep.subr.bf16.mxu0 %v9575_v7 }
 0x7b9   : > { %8822 = vmatpush3.bf16.msra.mxu0 %v9575_v7 }
 0x7ba   : > { %8823 = vmatprep.subr.bf16.mxu0 %v9576_v8 }
 0x7bd   : > { %8824 = vmatpush3.bf16.msra.mxu0 %v9576_v8  ;;  %v9594_v8 = vld [vmem:[#allocation8 + $0x208] sm:$0xff]  }
 0x7be   : > { %8849 = vmatprep.subr.bf16.mxu0 %v9577_v10 }
 0x7c0   : > { %8826 = vmatmul.mubr.bf16.vlgmr.msra.gmra.mrb[52].mxu0 %v4753_v0 }
 0x7c1   : > { %8850 = vmatpush3.bf16.msra.mxu0 %v9577_v10 }
 0x7c2   : > { %8851 = vmatprep.subr.bf16.mxu0 %v9578_v11 }
 0x7c5   : > { %8852 = vmatpush3.bf16.msra.mxu0 %v9578_v11 }
 0x7c6   : > { %8853 = vmatprep.subr.bf16.mxu0 %v9580_v13 }
 0x7c9   : > { %8854 = vmatpush3.bf16.msra.mxu0 %v9580_v13 }
 0x7ca   : > { %8855 = vmatprep.subr.bf16.mxu0 %v9582_v15 }
 0x7cd   : > { %8856 = vmatpush3.bf16.msra.mxu0 %v9582_v15 }
 0x7ce   : > { %8857 = vmatprep.subr.bf16.mxu0 %v9584_v17 }
 0x7d1   : > { %8858 = vmatpush3.bf16.msra.mxu0 %v9584_v17  ;;  %v9596_v17 = vld [vmem:[#allocation8 + $0x210] sm:$0xff]  }
 0x7d2   : > { %8859 = vmatprep.subr.bf16.mxu0 %v9586_v23 }
 0x7d5   : > { %8860 = vmatpush3.bf16.msra.mxu0 %v9586_v23 }
 0x7d6   : > { %8861 = vmatprep.subr.bf16.mxu0 %v9588_v26 }
 0x7d9   : > { %8862 = vmatpush3.bf16.msra.mxu0 %v9588_v26 }
 0x7da   : > { %8863 = vmatprep.subr.bf16.mxu0 %v9590_v9 }
 0x7dd   : > { %8864 = vmatpush3.bf16.msra.mxu0 %v9590_v9 }
 0x7de   : > { %8889 = vmatprep.subr.bf16.mxu0 %v9592_v29 }
 0x813   : > { %v8747_v18 = vpop.f32.mrb[36].mxu0 }
 0x814   : > { %v4365_v19 = vpop.f32.mrb[37].mxu0 }
 0x815   : > { %v8748_v21 = vpop.f32.mrb[38].mxu0 }
 0x816   : > { %v4368_v22 = vpop.f32.mrb[39].mxu0 }
 0x833   : > { %v8767_v32 = vpop.f32.mrb[40].mxu0 }
 0x834   : > { %v4470_v33 = vadd.f32 %v8767_v32, %v8747_v18  ;;  %v4461_v34 = vpop.f32.mrb[41].mxu0 }
 0x835   : > { %v4462_v35 = vadd.f32 %v4461_v34, %v4365_v19  ;;  %v8768_v36 = vpop.f32.mrb[42].mxu0  ;;  %v9598_v34 = vld [vmem:[#allocation8 + $0x218] sm:$0xff]  }
 0x836   : > { %v4464_v37 = vpop.f32.mrb[43].mxu0 }
 0x837   : > { %v4465_v38 = vadd.f32 %v4464_v37, %v4368_v22  ;;  %v9599_v37 = vld [vmem:[#allocation8 + $0x1d0] sm:$0xff]  }
 0x853   : > { %v8787_v39 = vpop.f32.mrb[44].mxu0 }
 0x854   : > { %v4597_v40 = vadd.f32 %v8787_v39, %v4470_v33  ;;  %v4581_v41 = vpop.f32.mrb[45].mxu0  ;;  %v9600_v39 = vld [vmem:[#allocation8 + $0x220] sm:$0xff]  }
 0x855   : > { %v4595_v42 = vadd.f32 %v4581_v41, %v4462_v35  ;;  %v8788_v43 = vpop.f32.mrb[46].mxu0  ;;  %v9602_v41 = vld [vmem:[#allocation8 + $0x228] sm:$0xff]  }
 0x856   : > { %v4584_v44 = vpop.f32.mrb[47].mxu0  ;;  %v9605_v43 = vld [vmem:[#allocation8 + $0x1e8] sm:$0xff]  }
 0x857   : > { %v4596_v45 = vadd.f32 %v4584_v44, %v4465_v38  ;;  %v9606_v44 = vld [vmem:[#allocation8 + $0x238] sm:$0xff]  }
 0x873   : > { %v8807_v46 = vpop.f32.mrb[48].mxu0 }
 0x874   : > { %v4732_v6 = vadd.f32 %v8807_v46, %v4597_v40  ;;  %v4716_v47 = vpop.f32.mrb[49].mxu0  ;;  %v9601_v40 = vld [vmem:[#allocation8 + $0x1d8] sm:$0xff]  }
 0x875   : > { %v4730_v48 = vadd.f32 %v4716_v47, %v4595_v42  ;;  %v8808_v49 = vpop.f32.mrb[50].mxu0  ;;  %v9603_v42 = vld [vmem:[#allocation8 + $0x1e0] sm:$0xff]   ;;  %v9608_v46 = vld [vmem:[#allocation8 + $0x1f8] sm:$0xff]  }
 0x876   : > { %v4719_v50 = vpop.f32.mrb[51].mxu0  ;;  %v9609_v47 = vld [vmem:[#allocation8 + $0x240] sm:$0xff]  }
 0x877   : > { %v4731_v51 = vadd.f32 %v4719_v50, %v4596_v45  ;;  %v9607_v45 = vld [vmem:[#allocation8 + $0x1f0] sm:$0xff]   ;;  %v9610_v50 = vld [vmem:[#allocation8 + $0x248] sm:$0xff]  }
 0x893   : > { %v8827_v53 = vpop.f32.mrb[52].mxu0 }
 0x894   : > { %v4855_v54 = vadd.f32 %v8827_v53, %v4732_v6  ;;  %v4839_v55 = vpop.f32.mrb[53].mxu0  ;;  %v9612_v53 = vld [vmem:[#allocation8 + $0x258] sm:$0xff]  }
 0x895   : > { %v4853_v56 = vadd.f32 %v4839_v55, %v4730_v48  ;;  %v8828_v57 = vpop.f32.mrb[54].mxu0  ;;  %v9614_v55 = vld [vmem:[#allocation8 + $0x268] sm:$0xff]  }
 0x896   : > { %v4864_v58 = vadd.f32 %v7464_v52, %v4855_v54  ;;  %v4842_v60 = vpop.f32.mrb[55].mxu0  ;;  %v9613_v54 = vld [vmem:[#allocation8 + $0x260] sm:$0xff]   ;;  %v9616_v57 = vld [vmem:[#allocation8 + $0x278] sm:$0xff]  }
 0x897   : > { %v4862_v61 = vadd.f32 %v7464_v52, %v4853_v56  ;;  %v4854_v62 = vadd.f32 %v4842_v60, %v4731_v51  ;;  %v9615_v56 = vld [vmem:[#allocation8 + $0x270] sm:$0xff]   ;;  %v9619_v60 = vld [vmem:[#allocation8 + $0x2c0] sm:$0xff]  }
 0x898   : > { %v4867_v63 = vmax.f32 %v4864_v58, 0.0  ;;  %v9617_v58 = vld [vmem:[#allocation8 + $0x280] sm:$0xff]  }
 0x899   : > { %v4863_v0 = vadd.f32 %v7464_v52, %v4854_v62  ;;  %v4865_v2 = vmax.f32 %v4862_v61, 0.0  ;;  %v9611_v52 = vld [vmem:[#allocation8 + $0x250] sm:$0xff]   ;;  %v9618_v61 = vld [vmem:[#allocation8 + $0x288] sm:$0xff]  }
 0x89a   : > { %v4869_v1 = vpack.c.bf16 %v4867_v63, %v4867_v63  ;;  %v9621_v62 = vld [vmem:[#allocation8 + $0x2c8] sm:$0xff]   ;;  %v9620_v63 = vld [vmem:[#allocation8 + $0x290] sm:$0xff]  }
 0x89b   : > { %v4866_v3 = vmax.f32 %v4863_v0, 0.0  ;;  %v9622_v0 = vld [vmem:[#allocation8 + $0x298] sm:$0xff]  }
 0x89c   : > { %4871 = vst [vmem:[#allocation2 + $0x8] sm:$0xf] %v4869_v1  ;;  %v9624_v1 = vld [vmem:[#allocation8 + $0x2a0] sm:$0xff]  }
 0x89d   : > { %v4868_v4 = vpack.c.bf16 %v4866_v3, %v4865_v2  ;;  %v9623_v2 = vld [vmem:[#allocation8 + $0x2d0] sm:$0xff]   ;;  %v9626_v3 = vld [vmem:[#allocation8 + $0x2a8] sm:$0xff]  }
 0x89f   : > { %4870 = vst [vmem:[#allocation2] sm:$0xff] %v4868_v4  ;;  %v4911_v5 = vshll.u32 %v4868_v4, 16  ;;  %8865 = vmatprep.mubr.bf16.mxu0 %v4868_v4  ;;  %v4909_v7 = vshrl.u32 %v4868_v4, 16  ;;  %v9625_v4 = vld [vmem:[#allocation8 + $0x2d8] sm:$0xff]  }
 0x8a1   : > { %v4913_v59 = vrot.slane %v4911_v5, 1  ;;  %v9628_v5 = vld [vmem:[#allocation8 + $0x2b0] sm:$0xff]  }
 0x8a3   : > { %v4874_v10 = vld [vmem:[#allocation2 + $0x8] sm:$0x3]  ;;  %v4914_v16 = vor.u32 %v4913_v59, %v4909_v7  ;;  %v9627_v59 = vld [vmem:[#allocation8 + $0x2e0] sm:$0xff]   ;;  %v9630_v7 = vld [vmem:[#allocation8 + $0x2b8] sm:$0xff]  }
 0x8a4   : > { %v10308_v11 = vld [vmem:[#allocation2 + $0x8] sm:$0x7]  ;;  %8866 = vmatmul.mubr.bf16.vlgmr.msra.gmra.mrb[56].mxu0 %v4874_v10 }
 0x8a5   : > { %v10310_v12 = vld [vmem:[#allocation2 + $0x8] sm:$0xf]  ;;  %v4916_v14 = vshll.u32 %v10308_v11, 16  ;;  %8890 = vmatpush3.bf16.msra.mxu0 %v9592_v29  ;;  %v4920_v21 = vshrl.u32 %v10308_v11, 16  ;;  %v5137_v22 = vrot.slane %v10308_v11, 1  ;;  %v9633_v11 = vld [vmem:[#allocation8 + $0x2f8] sm:$0xff]  }
 0x8a6   : > { %v5266_v13 = vshrl.u32 %v10310_v12, 16  ;;  %v5269_v15 = vshll.u32 %v10310_v12, 16  ;;  %8891 = vmatprep.subr.bf16.mxu0 %v9594_v8  ;;  %v5117_v19 = vld [vmem:[#allocation2] sm:$0xfe]  ;;  %v5395_v49 = vrot.slane %v10310_v12, 2 }
 0x8a7   : > { %v4918_v18 = vrot.slane %v4916_v14, 1  ;;  %v5258_v23 = vshrl.u32 %v5117_v19, 16  ;;  %v5261_v25 = vshll.u32 %v5117_v19, 16  ;;  %v5136_v27 = vrot.slane %v5117_v19, 1  ;;  %v5375_v6 = vld [vmem:[#allocation2] sm:$0xfc] }
 0x8a8   : > { %v5268_v20 = vrot.slane %v5266_v13, 1  ;;  %v5271_v26 = vrot.slane %v5269_v15, 2  ;;  %v5394_v48 = vrot.slane %v5375_v6, 2  ;;  %v9631_v10 = vld [vmem:[#allocation8 + $0x2f0] sm:$0xff]  }
 0x8a9   : > { %v4919_v9 = vsel %vm416_vm0, %v4914_v16, %v4918_v18  ;;  %v4922_v28 = vor.u32 %v4920_v21, %v4918_v18  ;;  %8892 = vmatpush3.bf16.msra.mxu0 %v9594_v8  ;;  %v5260_v29 = vrot.slane %v5258_v23, 1  ;;  %v5263_v32 = vrot.slane %v5261_v25, 2  ;;  %v9629_v8 = vld [vmem:[#allocation8 + $0x2e8] sm:$0xff]  }
 0x8aa   : > { %8845 = vmatprep.mubr.bf16.mxu1 %v4919_v9  ;;  %v5138_v33 = vsel %vm654_vm2, %v5136_v27, %v5137_v22  ;;  %8893 = vmatprep.subr.bf16.mxu0 %v9596_v17  ;;  %v5272_v36 = vor.u32 %v5271_v26, %v5268_v20  ;;  %v5396_v51 = vsel %vm924_vm1, %v5394_v48, %v5395_v49 }
 0x8ab   : > { %8846 = vmatmul.mubr.bf16.vlgmr.msra.gmra.mrb[52].mxu1 %v4922_v28  ;;  %v5264_v35 = vor.u32 %v5263_v32, %v5260_v29 }
 0x8ac   : > { %8870 = vmatpush3.bf16.msra.mxu1 %v10302_v31  ;;  %8885 = vmatprep.mubr.bf16.mxu1 %v5138_v33  ;;  %v9604_v31 = vld [vmem:[#allocation8 + $0x230] sm:$0xff]  }
 0x8ad   : > { %8871 = vmatprep.subr.bf16.mxu1 %v9597_v30  ;;  %v5273_v38 = vsel %vm782_vm3, %v5264_v35, %v5272_v36  ;;  %8894 = vmatpush3.bf16.msra.mxu0 %v9596_v17 }
 0x8ae   : > { %8905 = vmatprep.mubr.bf16.mxu0 %v5273_v38  ;;  %8895 = vmatprep.subr.bf16.mxu0 %v9598_v34  ;;  %v7506_v38 = vld [vmem:[%s10609_s3 + $0x2] ss:$0 sm:$0xff] }
 0x8b0   : > { %8872 = vmatpush3.bf16.msra.mxu1 %v9597_v30 }
 0x8b1   : > { %8873 = vmatprep.subr.bf16.mxu1 %v9599_v37  ;;  %8896 = vmatpush3.bf16.msra.mxu0 %v9598_v34 }
 0x8b2   : > { %8897 = vmatprep.subr.bf16.mxu0 %v9600_v39 }
 0x8b4   : > { %8874 = vmatpush3.bf16.msra.mxu1 %v9599_v37 }
 0x8b5   : > { %8875 = vmatprep.subr.bf16.mxu1 %v9601_v40  ;;  %8898 = vmatpush3.bf16.msra.mxu0 %v9600_v39 }
 0x8b6   : > { %8899 = vmatprep.subr.bf16.mxu0 %v9602_v41 }
 0x8b8   : > { %8876 = vmatpush3.bf16.msra.mxu1 %v9601_v40 }
 0x8b9   : > { %8877 = vmatprep.subr.bf16.mxu1 %v9603_v42  ;;  %8900 = vmatpush3.bf16.msra.mxu0 %v9602_v41 }
 0x8ba   : > { %8901 = vmatprep.subr.bf16.mxu0 %v9604_v31 }
 0x8bc   : > { %8878 = vmatpush3.bf16.msra.mxu1 %v9603_v42 }
 0x8bd   : > { %8879 = vmatprep.subr.bf16.mxu1 %v9605_v43  ;;  %8902 = vmatpush3.bf16.msra.mxu0 %v9604_v31 }
 0x8be   : > { %8903 = vmatprep.subr.bf16.mxu0 %v9606_v44 }
 0x8c0   : > { %8880 = vmatpush3.bf16.msra.mxu1 %v9605_v43 }
 0x8c1   : > { %8881 = vmatprep.subr.bf16.mxu1 %v9607_v45  ;;  %8904 = vmatpush3.bf16.msra.mxu0 %v9606_v44 }
 0x8c2   : > { %8929 = vmatprep.subr.bf16.mxu0 %v9857_v24 }
 0x8c4   : > { %8882 = vmatpush3.bf16.msra.mxu1 %v9607_v45  ;;  %8906 = vmatmul.mubr.bf16.vlgmr.msra.gmra.mrb[60].mxu0 %v5272_v36 }
 0x8c5   : > { %8883 = vmatprep.subr.bf16.mxu1 %v9608_v46  ;;  %8945 = vmatprep.mubr.msk.bf16.mxu0 %vm9858_vm4, %v9857_v24 }
 0x8c6   : > { %8930 = vmatpush3.bf16.msra.mxu0 %v9619_v60  ;;  %v9636_v60 = vld [vmem:[#allocation8 + $0x350] sm:$0xff]  }
 0x8c7   : > { %8931 = vmatprep.subr.bf16.mxu0 %v9857_v24 }
 0x8c8   : > { %8884 = vmatpush3.bf16.msra.mxu1 %v9608_v46 }
 0x8c9   : > { %8909 = vmatprep.subr.bf16.mxu1 %v9609_v47 }
 0x8ca   : > { %8932 = vmatpush3.bf16.msra.mxu0 %v9621_v62 }
 0x8cb   : > { %8886 = vmatmul.mubr.bf16.vlgmr.msra.gmra.mrb[56].mxu1 %v5137_v22  ;;  %8933 = vmatprep.subr.bf16.mxu0 %v9857_v24 }
 0x8cc   : > { %8910 = vmatpush3.bf16.msra.mxu1 %v9609_v47  ;;  %8925 = vmatprep.mubr.bf16.mxu1 %v5396_v51  ;;  %v9632_v51 = vld [vmem:[#allocation8 + $0x340] sm:$0xff]  }
 0x8cd   : > { %8911 = vmatprep.subr.bf16.mxu1 %v9610_v50 }
 0x8ce   : > { %8934 = vmatpush3.bf16.msra.mxu0 %v9623_v2  ;;  %v9637_v2 = vld [vmem:[#allocation8 + $0x308] sm:$0xff]  }
 0x8cf   : > { %8935 = vmatprep.subr.bf16.mxu0 %v9857_v24 }
 0x8d0   : > { %8912 = vmatpush3.bf16.msra.mxu1 %v9610_v50 }
 0x8d1   : > { %8913 = vmatprep.subr.bf16.mxu1 %v9611_v52 }
 0x8d2   : > { %8936 = vmatpush3.bf16.msra.mxu0 %v9625_v4  ;;  %v9639_v4 = vld [vmem:[#allocation8 + $0x310] sm:$0xff]  }
 0x8d3   : > { %8937 = vmatprep.subr.bf16.mxu0 %v9857_v24 }
 0x8d4   : > { %8914 = vmatpush3.bf16.msra.mxu1 %v9611_v52 }
 0x8d5   : > { %8915 = vmatprep.subr.bf16.mxu1 %v9612_v53 }
 0x8d6   : > { %8938 = vmatpush3.bf16.msra.mxu0 %v9627_v59  ;;  %v9642_v59 = vld [vmem:[#allocation8 + $0x368] sm:$0xff]  }
 0x8d7   : > { %8939 = vmatprep.subr.bf16.mxu0 %v9857_v24 }
 0x8d8   : > { %8916 = vmatpush3.bf16.msra.mxu1 %v9612_v53 }
 0x8d9   : > { %8917 = vmatprep.subr.bf16.mxu1 %v9613_v54 }
 0x8da   : > { %8940 = vmatpush3.bf16.msra.mxu0 %v9629_v8  ;;  %v9641_v8 = vld [vmem:[#allocation8 + $0x318] sm:$0xff]  }
 0x8db   : > { %8941 = vmatprep.subr.bf16.mxu0 %v9857_v24 }
 0x8dc   : > { %8918 = vmatpush3.bf16.msra.mxu1 %v9613_v54  ;;  %v9634_v54 = vld [vmem:[#allocation8 + $0x348] sm:$0xff]  }
 0x8dd   : > { %8919 = vmatprep.subr.bf16.mxu1 %v9614_v55 }
 0x8de   : > { %8942 = vmatpush3.bf16.msra.mxu0 %v9631_v10 }
 0x8df   : > { %8943 = vmatprep.subr.bf16.mxu0 %v9857_v24 }
 0x8e0   : > { %8920 = vmatpush3.bf16.msra.mxu1 %v9614_v55 }
 0x8e1   : > { %8921 = vmatprep.subr.bf16.mxu1 %v9615_v56 }
 0x8e2   : > { %8944 = vmatpush3.bf16.msra.mxu0 %v9633_v11 }
 0x8e3   : > { %8969 = vmatprep.subr.bf16.mxu0 %v9857_v24 }
 0x8e4   : > { %8922 = vmatpush3.bf16.msra.mxu1 %v9615_v56 }
 0x8e5   : > { %8923 = vmatprep.subr.bf16.mxu1 %v9616_v57 }
 0x8e8   : > { %8924 = vmatpush3.bf16.msra.mxu1 %v9616_v57 }
 0x8e9   : > { %8949 = vmatprep.subr.bf16.mxu1 %v9857_v24 }
 0x8eb   : > { %8926 = vmatmul.mubr.bf16.vlgmr.msra.gmra.mrb[60].mxu1 %v5395_v49 }
 0x8ec   : > { %8965 = vmatprep.mubr.msk.bf16.mxu1 %vm9858_vm4, %v9857_v24  ;;  %8950 = vmatpush3.bf16.msra.mxu1 %v9617_v58 }
 0x8ed   : > { %8951 = vmatprep.subr.bf16.mxu1 %v9857_v24 }
 0x8f0   : > { %8952 = vmatpush3.bf16.msra.mxu1 %v9618_v61 }
 0x8f1   : > { %8953 = vmatprep.subr.bf16.mxu1 %v9857_v24 }
 0x8f4   : > { %8954 = vmatpush3.bf16.msra.mxu1 %v9620_v63  ;;  %v9635_v63 = vld [vmem:[#allocation8 + $0x300] sm:$0xff]  }
 0x8f5   : > { %8955 = vmatprep.subr.bf16.mxu1 %v9857_v24 }
 0x8f8   : > { %8956 = vmatpush3.bf16.msra.mxu1 %v9622_v0 }
 0x8f9   : > { %8957 = vmatprep.subr.bf16.mxu1 %v9857_v24 }
 0x8fc   : > { %8958 = vmatpush3.bf16.msra.mxu1 %v9624_v1  ;;  %v9638_v1 = vld [vmem:[#allocation8 + $0x358] sm:$0xff]  }
 0x8fd   : > { %8959 = vmatprep.subr.bf16.mxu1 %v9857_v24 }
 0x900   : > { %8960 = vmatpush3.bf16.msra.mxu1 %v9626_v3  ;;  %v9640_v3 = vld [vmem:[#allocation8 + $0x360] sm:$0xff]  }
 0x901   : > { %8961 = vmatprep.subr.bf16.mxu1 %v9857_v24 }
 0x904   : > { %8962 = vmatpush3.bf16.msra.mxu1 %v9628_v5 }
 0x905   : > { %8963 = vmatprep.subr.bf16.mxu1 %v9857_v24 }
 0x908   : > { %8964 = vmatpush3.bf16.msra.mxu1 %v9630_v7 }
 0x909   : > { %8989 = vmatprep.subr.bf16.mxu1 %v9857_v24 }
 0x977   : > { %v8867_v12 = vpop.f32.mrb[56].mxu0 }
 0x978   : > { %v5103_v14 = vpop.f32.mrb[57].mxu0 }
 0x979   : > { %v8868_v13 = vpop.f32.mrb[58].mxu0 }
 0x97a   : > { %v5106_v15 = vpop.f32.mrb[59].mxu0 }
 0x97e   : > { %v8847_v16 = vpop.f32.mrb[52].mxu1 }
 0x97f   : > { %v5112_v17 = vadd.f32 %v8867_v12, %v8847_v16  ;;  %v5007_v18 = vpop.f32.mrb[53].mxu1  ;;  %v9644_v12 = vld [vmem:[#allocation8 + $0x370] sm:$0xff]  }
 0x980   : > { %v5104_v19 = vadd.f32 %v5103_v14, %v5007_v18  ;;  %v8848_v20 = vpop.f32.mrb[54].mxu1  ;;  %v9646_v18 = vld [vmem:[#allocation8 + $0x378] sm:$0xff]  }
 0x981   : > { %v5010_v21 = vpop.f32.mrb[55].mxu1 }
 0x982   : > { %v5107_v22 = vadd.f32 %v5106_v15, %v5010_v21  ;;  %v9643_v15 = vld [vmem:[#allocation8 + $0x320] sm:$0xff]   ;;  %v9645_v21 = vld [vmem:[#allocation8 + $0x328] sm:$0xff]  }
 0x997   : > { %v8907_v23 = vpop.f32.mrb[60].mxu0 }
 0x998   : > { %v5358_v25 = vpop.f32.mrb[61].mxu0 }
 0x999   : > { %v8908_v26 = vpop.f32.mrb[62].mxu0 }
 0x99a   : > { %v5361_v27 = vpop.f32.mrb[63].mxu0 }
 0x99e   : > { %v8887_v9 = vpop.f32.mrb[56].mxu1 }
 0x99f   : > { %v5239_v28 = vadd.f32 %v8887_v9, %v5112_v17  ;;  %v5223_v30 = vpop.f32.mrb[57].mxu1 }
 0x9a0   : > { %v5237_v29 = vadd.f32 %v5223_v30, %v5104_v19  ;;  %v8888_v32 = vpop.f32.mrb[58].mxu1  ;;  %v9649_v30 = vld [vmem:[#allocation8 + $0x380] sm:$0xff]  }
 0x9a1   : > { %v5226_v33 = vpop.f32.mrb[59].mxu1  ;;  %v5374_v34 = vadd.f32 %v8907_v23, %v5239_v28  ;;  %v9650_v32 = vld [vmem:[#allocation8 + $0x388] sm:$0xff]  }
 0x9a2   : > { %v5238_v35 = vadd.f32 %v5226_v33, %v5107_v22  ;;  %v5372_v36 = vadd.f32 %v5358_v25, %v5237_v29  ;;  %v9647_v25 = vld [vmem:[#allocation8 + $0x330] sm:$0xff]  }
 0x9a3   : > { %v9651_v33 = vld [vmem:[#allocation8 + $0x390] sm:$0xff]  }
 0x9a4   : > { %v5373_v37 = vadd.f32 %v5361_v27, %v5238_v35  ;;  %v9648_v27 = vld [vmem:[#allocation8 + $0x338] sm:$0xff]   ;;  %v9653_v35 = vld [vmem:[#allocation8 + $0x3a0] sm:$0xff]  }
 0x9be   : > { %v8927_v39 = vpop.f32.mrb[60].mxu1 }
 0x9bf   : > { %v5497_v40 = vadd.f32 %v8927_v39, %v5374_v34  ;;  %v5481_v41 = vpop.f32.mrb[61].mxu1  ;;  %v9652_v34 = vld [vmem:[#allocation8 + $0x398] sm:$0xff]  }
 0x9c0   : > { %v5495_v42 = vadd.f32 %v5481_v41, %v5372_v36  ;;  %v8928_v31 = vpop.f32.mrb[62].mxu1  ;;  %v9654_v36 = vld [vmem:[#allocation8 + $0x3a8] sm:$0xff]   ;;  %v9656_v39 = vld [vmem:[#allocation8 + $0x3b8] sm:$0xff]  }
 0x9c1   : > { %v5506_v43 = vadd.f32 %v7506_v38, %v5497_v40  ;;  %v5484_v44 = vpop.f32.mrb[63].mxu1  ;;  %v9657_v31 = vld [vmem:[#allocation8 + $0x3c0] sm:$0xff]  }
 0x9c2   : > { %v5504_v45 = vadd.f32 %v7506_v38, %v5495_v42  ;;  %v5496_v46 = vadd.f32 %v5484_v44, %v5373_v37  ;;  %v9655_v37 = vld [vmem:[#allocation8 + $0x3b0] sm:$0xff]   ;;  %v9658_v44 = vld [vmem:[#allocation8 + $0x3c8] sm:$0xff]  }
 0x9c3   : > { %v5509_v6 = vmax.f32 %v5506_v43, 0.0  ;;  %v9659_v43 = vld [vmem:[#allocation8 + $0x400] sm:$0xff]  }
 0x9c4   : > { %v5505_v47 = vadd.f32 %v7506_v38, %v5496_v46  ;;  %v5507_v49 = vmax.f32 %v5504_v45, 0.0  ;;  %v9661_v45 = vld [vmem:[#allocation8 + $0x408] sm:$0xff]   ;;  %v9660_v46 = vld [vmem:[#allocation8 + $0x3d0] sm:$0xff]  }
 0x9c5   : > { %v5511_v48 = vpack.c.bf16 %v5509_v6, %v5509_v6  ;;  %v9662_v6 = vld [vmem:[#allocation8 + $0x3d8] sm:$0xff]  }
 0x9c6   : > { %v5508_v50 = vmax.f32 %v5505_v47, 0.0  ;;  %v9663_v47 = vld [vmem:[#allocation8 + $0x410] sm:$0xff]  }
 0x9c7   : > { %5513 = vst [vmem:[#allocation2 + $0x8] sm:$0x3] %v5511_v48  ;;  %v9664_v48 = vld [vmem:[#allocation8 + $0x3e0] sm:$0xff]  }
 0x9c8   : > { %v5510_v52 = vpack.c.bf16 %v5508_v50, %v5507_v49  ;;  %v9665_v49 = vld [vmem:[#allocation8 + $0x418] sm:$0xff]   ;;  %v9666_v50 = vld [vmem:[#allocation8 + $0x3e8] sm:$0xff]  }
 0x9ca   : > { %5512 = vst [vmem:[#allocation2] sm:$0xff] %v5510_v52  ;;  %8966 = vmatmul.mubr.bf16.vlgmr.msra.gmra.mrb[64].mxu1 %v5510_v52  ;;  %v5553_v53 = vshll.u32 %v5510_v52, 16  ;;  %v5551_v57 = vshrl.u32 %v5510_v52, 16  ;;  %v9668_v52 = vld [vmem:[#allocation8 + $0x3f0] sm:$0xff]  }
 0x9cb   : > { %8990 = vmatpush3.bf16.msra.mxu1 %v9632_v51  ;;  %9005 = vmatprep.mubr.msk.bf16.mxu1 %vm9858_vm4, %v9857_v24  ;;  %v9667_v51 = vld [vmem:[#allocation8 + $0x420] sm:$0xff]  }
 0x9cc   : > { %8991 = vmatprep.subr.bf16.mxu1 %v9857_v24  ;;  %v5555_v55 = vrot.slane %v5553_v53, 1  ;;  %v9669_v53 = vld [vmem:[#allocation8 + $0x428] sm:$0xff]  }
 0x9ce   : > { %v10355_v56 = vld [vmem:[#allocation2 + $0x8] sm:$0x1]  ;;  %v5556_v61 = vor.u32 %v5555_v55, %v5551_v57 }
 0x9cf   : > { %8992 = vmatpush3.bf16.msra.mxu1 %v9634_v54  ;;  %v5558_v58 = vshll.u32 %v10355_v56, 16  ;;  %v10367_v7 = vld [vmem:[#allocation2 + $0x8] sm:$0x3]  ;;  %v5761_v28 = vrot.slane %v10355_v56, 1  ;;  %v9670_v54 = vld [vmem:[#allocation8 + $0x3f8] sm:$0xff]  }
 0x9d0   : > { %8993 = vmatprep.subr.bf16.mxu1 %v9857_v24  ;;  %v5881_v14 = vshrl.u32 %v10367_v7, 16  ;;  %v5884_v13 = vshll.u32 %v10367_v7, 16  ;;  %v6001_v41 = vrot.slane %v10367_v7, 2  ;;  %v9671_v55 = vld [vmem:[#allocation8 + $0x430] sm:$0xff]   ;;  %v9673_v56 = vld [vmem:[#allocation8 + $0x438] sm:$0xff]  }
 0x9d1   : > { %v5560_v62 = vrot.slane %v5558_v58, 1  ;;  %v5741_v5 = vld [vmem:[#allocation2] sm:$0xfe] }
 0x9d2   : > { %v5873_v10 = vshrl.u32 %v5741_v5, 16  ;;  %v5876_v11 = vshll.u32 %v5741_v5, 16  ;;  %v5883_v19 = vrot.slane %v5881_v14, 1  ;;  %v5886_v20 = vrot.slane %v5884_v13, 2  ;;  %v5981_v38 = vld [vmem:[#allocation2] sm:$0xfc] }
 0x9d3   : > { %v5561_v0 = vsel %vm416_vm0, %v5556_v61, %v5560_v62  ;;  %8994 = vmatpush3.bf16.msra.mxu1 %v9636_v60  ;;  %v5760_v9 = vrot.slane %v5741_v5, 1  ;;  %v6000_v40 = vrot.slane %v5981_v38, 2 }
 0x9d4   : > { %8946 = vmatmul.mubr.bf16.vlgmr.msra.gmra.mrb[64].mxu0 %v5561_v0  ;;  %8995 = vmatprep.subr.bf16.mxu1 %v9857_v24  ;;  %v5875_v16 = vrot.slane %v5873_v10, 1  ;;  %v5878_v17 = vrot.slane %v5876_v11, 2  ;;  %v5887_v23 = vor.u32 %v5886_v20, %v5883_v19 }
 0x9d5   : > { %8970 = vmatpush3.bf16.msra.mxu0 %v9635_v63  ;;  %8985 = vmatprep.mubr.msk.bf16.mxu0 %vm9858_vm4, %v9857_v24  ;;  %v5762_v29 = vsel %vm654_vm2, %v5760_v9, %v5761_v28  ;;  %v6002_v42 = vsel %vm924_vm1, %v6000_v40, %v6001_v41  ;;  %v9677_v40 = vld [vmem:[#allocation8 + $0x448] sm:$0xff]   ;;  %v9678_v41 = vld [vmem:[#allocation8 + $0x498] sm:$0xff]  }
 0x9d6   : > { %8971 = vmatprep.subr.bf16.mxu0 %v9857_v24  ;;  %v5879_v22 = vor.u32 %v5878_v17, %v5875_v16  ;;  %v7548_v17 = vld [vmem:[%s10609_s3 + $0x3] ss:$0 sm:$0xff] }
 0x9d7   : > { %8996 = vmatpush3.bf16.msra.mxu1 %v9638_v1 }
 0x9d8   : > { %8997 = vmatprep.subr.bf16.mxu1 %v9857_v24  ;;  %v5888_v26 = vsel %vm782_vm3, %v5879_v22, %v5887_v23 }
 0x9d9   : > { %8972 = vmatpush3.bf16.msra.mxu0 %v9637_v2 }
 0x9da   : > { %8973 = vmatprep.subr.bf16.mxu0 %v9857_v24 }
 0x9db   : > { %8998 = vmatpush3.bf16.msra.mxu1 %v9640_v3 }
 0x9dc   : > { %8999 = vmatprep.subr.bf16.mxu1 %v9857_v24 }
 0x9dd   : > { %8974 = vmatpush3.bf16.msra.mxu0 %v9639_v4 }
 0x9de   : > { %8975 = vmatprep.subr.bf16.mxu0 %v9857_v24 }
 0x9df   : > { %9000 = vmatpush3.bf16.msra.mxu1 %v9642_v59 }
 0x9e0   : > { %9001 = vmatprep.subr.bf16.mxu1 %v9857_v24 }
 0x9e1   : > { %8976 = vmatpush3.bf16.msra.mxu0 %v9641_v8 }
 0x9e2   : > { %8977 = vmatprep.subr.bf16.mxu0 %v9857_v24 }
 0x9e3   : > { %9002 = vmatpush3.bf16.msra.mxu1 %v9644_v12 }
 0x9e4   : > { %9003 = vmatprep.subr.bf16.mxu1 %v9857_v24 }
 0x9e5   : > { %8978 = vmatpush3.bf16.msra.mxu0 %v9643_v15 }
 0x9e6   : > { %8979 = vmatprep.subr.bf16.mxu0 %v9857_v24 }
 0x9e7   : > { %9004 = vmatpush3.bf16.msra.mxu1 %v9646_v18 }
 0x9e8   : > { %9029 = vmatprep.subr.bf16.mxu1 %v9857_v24 }
 0x9e9   : > { %8980 = vmatpush3.bf16.msra.mxu0 %v9645_v21 }
 0x9ea   : > { %8981 = vmatprep.subr.bf16.mxu0 %v9857_v24  ;;  %9006 = vmatmul.mubr.bf16.vlgmr.msra.gmra.mrb[68].mxu1 %v5888_v26 }
 0x9eb   : > { %9045 = vmatprep.mubr.msk.bf16.mxu1 %vm9858_vm4, %v9857_v24  ;;  %9030 = vmatpush3.bf16.msra.mxu1 %v9659_v43  ;;  %v9681_v43 = vld [vmem:[#allocation8 + $0x458] sm:$0xff]  }
 0x9ec   : > { %9031 = vmatprep.subr.bf16.mxu1 %v9857_v24 }
 0x9ed   : > { %8982 = vmatpush3.bf16.msra.mxu0 %v9647_v25 }
 0x9ee   : > { %8983 = vmatprep.subr.bf16.mxu0 %v9857_v24 }
 0x9ef   : > { %9032 = vmatpush3.bf16.msra.mxu1 %v9661_v45  ;;  %v9683_v45 = vld [vmem:[#allocation8 + $0x460] sm:$0xff]  }
 0x9f0   : > { %9033 = vmatprep.subr.bf16.mxu1 %v9857_v24 }
 0x9f1   : > { %8984 = vmatpush3.bf16.msra.mxu0 %v9648_v27 }
 0x9f2   : > { %9009 = vmatprep.subr.bf16.mxu0 %v9857_v24 }
 0x9f3   : > { %9034 = vmatpush3.bf16.msra.mxu1 %v9663_v47 }
 0x9f4   : > { %8986 = vmatmul.mubr.bf16.vlgmr.msra.gmra.mrb[68].mxu0 %v5762_v29  ;;  %9035 = vmatprep.subr.bf16.mxu1 %v9857_v24 }
 0x9f5   : > { %9010 = vmatpush3.bf16.msra.mxu0 %v9649_v30  ;;  %9025 = vmatprep.mubr.msk.bf16.mxu0 %vm9858_vm4, %v9857_v24  ;;  %v9672_v30 = vld [vmem:[#allocation8 + $0x480] sm:$0xff]  }
 0x9f6   : > { %9011 = vmatprep.subr.bf16.mxu0 %v9857_v24 }
 0x9f7   : > { %9036 = vmatpush3.bf16.msra.mxu1 %v9665_v49  ;;  %v9685_v49 = vld [vmem:[#allocation8 + $0x468] sm:$0xff]  }
 0x9f8   : > { %9037 = vmatprep.subr.bf16.mxu1 %v9857_v24 }
 0x9f9   : > { %9012 = vmatpush3.bf16.msra.mxu0 %v9650_v32 }
 0x9fa   : > { %9013 = vmatprep.subr.bf16.mxu0 %v9857_v24 }
 0x9fb   : > { %9038 = vmatpush3.bf16.msra.mxu1 %v9667_v51 }
 0x9fc   : > { %9039 = vmatprep.subr.bf16.mxu1 %v9857_v24 }
 0x9fd   : > { %9014 = vmatpush3.bf16.msra.mxu0 %v9651_v33 }
 0x9fe   : > { %9015 = vmatprep.subr.bf16.mxu0 %v9857_v24 }
 0x9ff   : > { %9040 = vmatpush3.bf16.msra.mxu1 %v9669_v53  ;;  %v9687_v53 = vld [vmem:[#allocation8 + $0x470] sm:$0xff]  }
 0xa00   : > { %9041 = vmatprep.subr.bf16.mxu1 %v9857_v24 }
 0xa01   : > { %9016 = vmatpush3.bf16.msra.mxu0 %v9652_v34  ;;  %v9674_v34 = vld [vmem:[#allocation8 + $0x488] sm:$0xff]  }
 0xa02   : > { %9017 = vmatprep.subr.bf16.mxu0 %v9857_v24 }
 0xa03   : > { %9042 = vmatpush3.bf16.msra.mxu1 %v9671_v55  ;;  %v9688_v55 = vld [vmem:[#allocation8 + $0x478] sm:$0xff]  }
 0xa04   : > { %9043 = vmatprep.subr.bf16.mxu1 %v9857_v24 }
 0xa05   : > { %9018 = vmatpush3.bf16.msra.mxu0 %v9653_v35 }
 0xa06   : > { %9019 = vmatprep.subr.bf16.mxu0 %v9857_v24 }
 0xa07   : > { %9044 = vmatpush3.bf16.msra.mxu1 %v9673_v56 }
 0xa08   : > { %9069 = vmatprep.subr.bf16.mxu1 %v9857_v24 }
 0xa09   : > { %9020 = vmatpush3.bf16.msra.mxu0 %v9654_v36 }
 0xa0a   : > { %9021 = vmatprep.subr.bf16.mxu0 %v9857_v24 }
 0xa0d   : > { %9022 = vmatpush3.bf16.msra.mxu0 %v9655_v37  ;;  %v9675_v37 = vld [vmem:[#allocation8 + $0x440] sm:$0xff]  }
 0xa0e   : > { %9023 = vmatprep.subr.bf16.mxu0 %v9857_v24 }
 0xa11   : > { %9024 = vmatpush3.bf16.msra.mxu0 %v9656_v39  ;;  %v9676_v39 = vld [vmem:[#allocation8 + $0x490] sm:$0xff]  }
 0xa12   : > { %9049 = vmatprep.subr.bf16.mxu0 %v9857_v24 }
 0xa14   : > { %9026 = vmatmul.mubr.bf16.vlgmr.msra.gmra.mrb[72].mxu0 %v6002_v42  ;;  %v9679_v42 = vld [vmem:[#allocation8 + $0x450] sm:$0xff]  }
 0xa15   : > { %9065 = vmatprep.mubr.msk.bf16.mxu0 %vm9858_vm4, %v9857_v24  ;;  %9050 = vmatpush3.bf16.msra.mxu0 %v9657_v31  ;;  %v9680_v31 = vld [vmem:[#allocation8 + $0x4a0] sm:$0xff]  }
 0xa16   : > { %9051 = vmatprep.subr.bf16.mxu0 %v9857_v24 }
 0xa19   : > { %9052 = vmatpush3.bf16.msra.mxu0 %v9658_v44  ;;  %v9682_v44 = vld [vmem:[#allocation8 + $0x4a8] sm:$0xff]  }
 0xa1a   : > { %9053 = vmatprep.subr.bf16.mxu0 %v9857_v24 }
 0xa1d   : > { %9054 = vmatpush3.bf16.msra.mxu0 %v9660_v46 }
 0xa1e   : > { %9055 = vmatprep.subr.bf16.mxu0 %v9857_v24 }
 0xa21   : > { %9056 = vmatpush3.bf16.msra.mxu0 %v9662_v6  ;;  %v9684_v6 = vld [vmem:[#allocation8 + $0x4b0] sm:$0xff]  }
 0xa22   : > { %9057 = vmatprep.subr.bf16.mxu0 %v9857_v24 }
 0xa25   : > { %9058 = vmatpush3.bf16.msra.mxu0 %v9664_v48 }
 0xa26   : > { %9059 = vmatprep.subr.bf16.mxu0 %v9857_v24 }
 0xa29   : > { %9060 = vmatpush3.bf16.msra.mxu0 %v9666_v50  ;;  %v9686_v50 = vld [vmem:[#allocation8 + $0x4b8] sm:$0xff]  }
 0xa2a   : > { %9061 = vmatprep.subr.bf16.mxu0 %v9857_v24 }
 0xa2d   : > { %9062 = vmatpush3.bf16.msra.mxu0 %v9668_v52 }
 0xa2e   : > { %9063 = vmatprep.subr.bf16.mxu0 %v9857_v24 }
 0xa31   : > { %9064 = vmatpush3.bf16.msra.mxu0 %v9670_v54 }
 0xa32   : > { %9089 = vmatprep.subr.bf16.mxu0 %v9857_v24 }
 0xa9d   : > { %v5734_v57 = vpop.f32.mrb[64].mxu1 }
 0xa9e   : > { %v8967_v58 = vpop.f32.mrb[65].mxu1 }
 0xa9f   : > { %v5737_v60 = vpop.f32.mrb[66].mxu1 }
 0xaa0   : > { %v8968_v61 = vpop.f32.mrb[67].mxu1 }
 0xaa1   : > { %v9691_v61 = vld [vmem:[#allocation8 + $0x4d0] sm:$0xff]  }
 0xaa7   : > { %v5645_v62 = vpop.f32.mrb[64].mxu0 }
 0xaa8   : > { %v5735_v63 = vadd.f32 %v5734_v57, %v5645_v62  ;;  %v8947_v0 = vpop.f32.mrb[65].mxu0  ;;  %v9689_v57 = vld [vmem:[#allocation8 + $0x4c0] sm:$0xff]   ;;  %v9692_v62 = vld [vmem:[#allocation8 + $0x4d8] sm:$0xff]  }
 0xaa9   : > { %v5648_v1 = vpop.f32.mrb[66].mxu0  ;;  %v9694_v0 = vld [vmem:[#allocation8 + $0x4e8] sm:$0xff]  }
 0xaaa   : > { %v5738_v2 = vadd.f32 %v5737_v60, %v5648_v1  ;;  %v8948_v3 = vpop.f32.mrb[67].mxu0  ;;  %v9690_v60 = vld [vmem:[#allocation8 + $0x4c8] sm:$0xff]   ;;  %v9695_v1 = vld [vmem:[#allocation8 + $0x4f0] sm:$0xff]  }
 0xabd   : > { %v5972_v4 = vpop.f32.mrb[68].mxu1 }
 0xabe   : > { %v9007_v5 = vpop.f32.mrb[69].mxu1 }
 0xabf   : > { %v5975_v59 = vpop.f32.mrb[70].mxu1  ;;  %v9697_v5 = vld [vmem:[%s10610_s4] sm:$0xff]  }
 0xac0   : > { %v9008_v7 = vpop.f32.mrb[71].mxu1 }
 0xac1   : > { %v9699_v7 = vld [vmem:[%s10610_s4 + $0x10] sm:$0xff]  }
 0xac7   : > { %v5846_v8 = vpop.f32.mrb[68].mxu0 }
 0xac8   : > { %v5853_v10 = vadd.f32 %v5846_v8, %v5735_v63  ;;  %v8987_v11 = vpop.f32.mrb[69].mxu0  ;;  %v9693_v63 = vld [vmem:[#allocation8 + $0x4e0] sm:$0xff]  }
 0xac9   : > { %v5849_v12 = vpop.f32.mrb[70].mxu0  ;;  %v9700_v8 = vld [vmem:[%s10610_s4 + $0x18] sm:$0xff]   ;;  %v9702_v11 = vld [vmem:[%s10610_s4 + $0x28] sm:$0xff]  }
 0xaca   : > { %v5854_v14 = vadd.f32 %v5849_v12, %v5738_v2  ;;  %v8988_v13 = vpop.f32.mrb[71].mxu0  ;;  %v5979_v15 = vadd.f32 %v5972_v4, %v5853_v10  ;;  %v9696_v2 = vld [vmem:[#allocation8 + $0x4f8] sm:$0xff]   ;;  %v9701_v10 = vld [vmem:[%s10610_s4 + $0x20] sm:$0xff]  }
 0xacb   : > { %v9703_v12 = vld [vmem:[%s10610_s4 + $0x30] sm:$0xff]   ;;  %v9705_v13 = vld [vmem:[%s10610_s4 + $0x38] sm:$0xff]  }
 0xacc   : > { %v5980_v16 = vadd.f32 %v5975_v59, %v5854_v14  ;;  %v9698_v59 = vld [vmem:[%s10610_s4 + $0x8] sm:$0xff]   ;;  %v9704_v14 = vld [vmem:[%s10611_s5] sm:$0xff]  }
 0xae7   : > { %v6086_v18 = vpop.f32.mrb[72].mxu0 }
 0xae8   : > { %v6093_v19 = vadd.f32 %v6086_v18, %v5979_v15  ;;  %v9027_v20 = vpop.f32.mrb[73].mxu0  ;;  %v9706_v15 = vld [vmem:[%s10611_s5 + $0x8] sm:$0xff]   ;;  %v9709_v18 = vld [vmem:[%s10611_s5 + $0x20] sm:$0xff]  }
 0xae9   : > { %v6089_v21 = vpop.f32.mrb[74].mxu0  ;;  %v9711_v20 = vld [vmem:[%s10611_s5 + $0x30] sm:$0xff]  }
 0xaea   : > { %v6101_v22 = vadd.f32 %v7548_v17, %v6093_v19  ;;  %v6094_v23 = vadd.f32 %v6089_v21, %v5980_v16  ;;  %v9028_v25 = vpop.f32.mrb[75].mxu0  ;;  %v9707_v16 = vld [vmem:[%s10611_s5 + $0x10] sm:$0xff]   ;;  %v9710_v19 = vld [vmem:[%s10611_s5 + $0x28] sm:$0xff]   ;;  %v9712_v21 = vld [vmem:[%s10611_s5 + $0x38] sm:$0xff]  }
 0xaec   : > { %v6102_v26 = vadd.f32 %v7548_v17, %v6094_v23  ;;  %v6103_v27 = vmax.f32 %v6101_v22, 0.0  ;;  %v9708_v17 = vld [vmem:[%s10611_s5 + $0x18] sm:$0xff]  }
 0xaee   : > { %v6104_v9 = vmax.f32 %v6102_v26, 0.0 }
 0xaf0   : > { %v6105_v28 = vpack.c.bf16 %v6104_v9, %v6103_v27 }
 0xaf2   : > { %6106 = vst [vmem:[#allocation2] sm:$0xff] %v6105_v28 }
 0xaf9   : > { %v6108_v29 = vld [vmem:[#allocation2] sm:$0x3f] }
 0xafa   : > { %v6125_v32 = vld [vmem:[#allocation2] sm:$0x7f]  ;;  %9066 = vmatmul.mubr.bf16.vlgmr.msra.gmra.mrb[76].mxu0 %v6108_v29 }
 0xafb   : > { %v6145_v33 = vshll.u32 %v6125_v32, 16  ;;  %9090 = vmatpush3.bf16.msra.mxu0 %v9672_v30  ;;  %9105 = vmatprep.mubr.msk.bf16.mxu0 %vm9858_vm4, %v9857_v24  ;;  %v6143_v35 = vshrl.u32 %v6125_v32, 16  ;;  %v6439_v46 = vld [vmem:[#allocation2] sm:$0xfe] }
 0xafc   : > { %9091 = vmatprep.subr.bf16.mxu0 %v9857_v24  ;;  %v6457_v47 = vshrl.u32 %v6439_v46, 16  ;;  %v6460_v48 = vshll.u32 %v6439_v46, 16  ;;  %v6328_v56 = vld [vmem:[#allocation2] sm:$0x7e] }
 0xafd   : > { %v6147_v36 = vrot.slane %v6145_v33, 1  ;;  %v6346_v58 = vrot.slane %v6328_v56, 1  ;;  %v6556_v3 = vld [vmem:[#allocation2] sm:$0xfc] }
 0xafe   : > { %v6459_v51 = vrot.slane %v6457_v47, 1  ;;  %v6462_v52 = vrot.slane %v6460_v48, 2  ;;  %v6574_v4 = vrot.slane %v6556_v3, 2 }
 0xaff   : > { %v6148_v38 = vor.u32 %v6147_v36, %v6143_v35  ;;  %9092 = vmatpush3.bf16.msra.mxu0 %v9674_v34 }
 0xb00   : > { %9093 = vmatprep.subr.bf16.mxu0 %v9857_v24  ;;  %v6463_v54 = vor.u32 %v6462_v52, %v6459_v51 }
 0xb01   : > { %9046 = vmatmul.mubr.bf16.vlgmr.msra.gmra.mrb[72].mxu1 %v6148_v38 }
 0xb02   : > { %9070 = vmatpush3.bf16.msra.mxu1 %v9675_v37  ;;  %9085 = vmatprep.mubr.msk.bf16.mxu1 %vm9858_vm4, %v9857_v24 }
 0xb03   : > { %9071 = vmatprep.subr.bf16.mxu1 %v9857_v24  ;;  %9094 = vmatpush3.bf16.msra.mxu0 %v9676_v39 }
 0xb04   : > { %9095 = vmatprep.subr.bf16.mxu0 %v9857_v24 }
 0xb06   : > { %9072 = vmatpush3.bf16.msra.mxu1 %v9677_v40 }
 0xb07   : > { %9073 = vmatprep.subr.bf16.mxu1 %v9857_v24  ;;  %9096 = vmatpush3.bf16.msra.mxu0 %v9678_v41 }
 0xb08   : > { %9097 = vmatprep.subr.bf16.mxu0 %v9857_v24 }
 0xb0a   : > { %9074 = vmatpush3.bf16.msra.mxu1 %v9679_v42 }
 0xb0b   : > { %9075 = vmatprep.subr.bf16.mxu1 %v9857_v24  ;;  %9098 = vmatpush3.bf16.msra.mxu0 %v9680_v31 }
 0xb0c   : > { %9099 = vmatprep.subr.bf16.mxu0 %v9857_v24 }
 0xb0e   : > { %9076 = vmatpush3.bf16.msra.mxu1 %v9681_v43 }
 0xb0f   : > { %9077 = vmatprep.subr.bf16.mxu1 %v9857_v24  ;;  %9100 = vmatpush3.bf16.msra.mxu0 %v9682_v44  ;;  %v7590_v44 = vld [vmem:[%s10609_s3 + $0x4] ss:$0 sm:$0xff] }
 0xb10   : > { %9101 = vmatprep.subr.bf16.mxu0 %v9857_v24 }
 0xb12   : > { %9078 = vmatpush3.bf16.msra.mxu1 %v9683_v45 }
 0xb13   : > { %9079 = vmatprep.subr.bf16.mxu1 %v9857_v24  ;;  %9102 = vmatpush3.bf16.msra.mxu0 %v9684_v6 }
 0xb14   : > { %9103 = vmatprep.subr.bf16.mxu0 %v9857_v24 }
 0xb16   : > { %9080 = vmatpush3.bf16.msra.mxu1 %v9685_v49 }
 0xb17   : > { %9081 = vmatprep.subr.bf16.mxu1 %v9857_v24  ;;  %9104 = vmatpush3.bf16.msra.mxu0 %v9686_v50 }
 0xb18   : > { %9129 = vmatprep.subr.bf16.mxu0 %v9857_v24 }
 0xb1a   : > { %9082 = vmatpush3.bf16.msra.mxu1 %v9687_v53  ;;  %9106 = vmatmul.mubr.bf16.vlgmr.msra.gmra.mrb[80].mxu0 %v6463_v54 }
 0xb1b   : > { %9083 = vmatprep.subr.bf16.mxu1 %v9857_v24  ;;  %9145 = vmatprep.mubr.msk.bf16.mxu0 %vm9858_vm4, %v9857_v24 }
 0xb1c   : > { %9130 = vmatpush3.bf16.msra.mxu0 %v9704_v14 }
 0xb1d   : > { %9131 = vmatprep.subr.bf16.mxu0 %v9857_v24 }
 0xb1e   : > { %9084 = vmatpush3.bf16.msra.mxu1 %v9688_v55 }
 0xb1f   : > { %9109 = vmatprep.subr.bf16.mxu1 %v9857_v24 }
 0xb20   : > { %9132 = vmatpush3.bf16.msra.mxu0 %v9706_v15 }
 0xb21   : > { %9086 = vmatmul.mubr.bf16.vlgmr.msra.gmra.mrb[76].mxu1 %v6346_v58  ;;  %9133 = vmatprep.subr.bf16.mxu0 %v9857_v24 }
 0xb22   : > { %9110 = vmatpush3.bf16.msra.mxu1 %v9689_v57  ;;  %9125 = vmatprep.mubr.msk.bf16.mxu1 %vm9858_vm4, %v9857_v24 }
 0xb23   : > { %9111 = vmatprep.subr.bf16.mxu1 %v9857_v24 }
 0xb24   : > { %9134 = vmatpush3.bf16.msra.mxu0 %v9707_v16 }
 0xb25   : > { %9135 = vmatprep.subr.bf16.mxu0 %v9857_v24 }
 0xb26   : > { %9112 = vmatpush3.bf16.msra.mxu1 %v9690_v60 }
 0xb27   : > { %9113 = vmatprep.subr.bf16.mxu1 %v9857_v24 }
 0xb28   : > { %9136 = vmatpush3.bf16.msra.mxu0 %v9708_v17 }
 0xb29   : > { %9137 = vmatprep.subr.bf16.mxu0 %v9857_v24 }
 0xb2a   : > { %9114 = vmatpush3.bf16.msra.mxu1 %v9691_v61 }
 0xb2b   : > { %9115 = vmatprep.subr.bf16.mxu1 %v9857_v24 }
 0xb2c   : > { %9138 = vmatpush3.bf16.msra.mxu0 %v9709_v18 }
 0xb2d   : > { %9139 = vmatprep.subr.bf16.mxu0 %v9857_v24 }
 0xb2e   : > { %9116 = vmatpush3.bf16.msra.mxu1 %v9692_v62 }
 0xb2f   : > { %9117 = vmatprep.subr.bf16.mxu1 %v9857_v24 }
 0xb30   : > { %9140 = vmatpush3.bf16.msra.mxu0 %v9710_v19 }
 0xb31   : > { %9141 = vmatprep.subr.bf16.mxu0 %v9857_v24 }
 0xb32   : > { %9118 = vmatpush3.bf16.msra.mxu1 %v9693_v63 }
 0xb33   : > { %9119 = vmatprep.subr.bf16.mxu1 %v9857_v24 }
 0xb34   : > { %9142 = vmatpush3.bf16.msra.mxu0 %v9711_v20 }
 0xb35   : > { %9143 = vmatprep.subr.bf16.mxu0 %v9857_v24 }
 0xb36   : > { %9120 = vmatpush3.bf16.msra.mxu1 %v9694_v0 }
 0xb37   : > { %9121 = vmatprep.subr.bf16.mxu1 %v9857_v24 }
 0xb38   : > { %9144 = vmatpush3.bf16.msra.mxu0 %v9712_v21 }
 0xb39   : > { %9169 = vmatprep.subr.bf16.mxu0 %v9857_v24 }
 0xb3a   : > { %9122 = vmatpush3.bf16.msra.mxu1 %v9695_v1 }
 0xb3b   : > { %9123 = vmatprep.subr.bf16.mxu1 %v9857_v24 }
 0xb3e   : > { %9124 = vmatpush3.bf16.msra.mxu1 %v9696_v2 }
 0xb3f   : > { %9149 = vmatprep.subr.bf16.mxu1 %v9857_v24 }
 0xb41   : > { %9126 = vmatmul.mubr.bf16.vlgmr.msra.gmra.mrb[80].mxu1 %v6574_v4 }
 0xb42   : > { %9165 = vmatprep.mubr.msk.bf16.mxu1 %vm9858_vm4, %v9857_v24  ;;  %9150 = vmatpush3.bf16.msra.mxu1 %v9697_v5 }
 0xb43   : > { %9151 = vmatprep.subr.bf16.mxu1 %v9857_v24 }
 0xb46   : > { %9152 = vmatpush3.bf16.msra.mxu1 %v9698_v59 }
 0xb47   : > { %9153 = vmatprep.subr.bf16.mxu1 %v9857_v24 }
 0xb4a   : > { %9154 = vmatpush3.bf16.msra.mxu1 %v9699_v7 }
 0xb4b   : > { %9155 = vmatprep.subr.bf16.mxu1 %v9857_v24 }
 0xb4e   : > { %9156 = vmatpush3.bf16.msra.mxu1 %v9700_v8 }
 0xb4f   : > { %9157 = vmatprep.subr.bf16.mxu1 %v9857_v24 }
 0xb52   : > { %9158 = vmatpush3.bf16.msra.mxu1 %v9701_v10 }
 0xb53   : > { %9159 = vmatprep.subr.bf16.mxu1 %v9857_v24 }
 0xb56   : > { %9160 = vmatpush3.bf16.msra.mxu1 %v9702_v11 }
 0xb57   : > { %9161 = vmatprep.subr.bf16.mxu1 %v9857_v24 }
 0xb5a   : > { %9162 = vmatpush3.bf16.msra.mxu1 %v9703_v12 }
 0xb5b   : > { %9163 = vmatprep.subr.bf16.mxu1 %v9857_v24 }
 0xb5e   : > { %9164 = vmatpush3.bf16.msra.mxu1 %v9705_v13 }
 0xbcd   : > { %v6321_v22 = vpop.f32.mrb[76].mxu0 }
 0xbce   : > { %v9067_v23 = vpop.f32.mrb[77].mxu0 }
 0xbcf   : > { %v6324_v25 = vpop.f32.mrb[78].mxu0 }
 0xbd0   : > { %v9068_v26 = vpop.f32.mrb[79].mxu0 }
 0xbd1   : > { %v9713_v26 = vld [vmem:[%s10613_s7] sm:$0xff]  }
 0xbd4   : > { %v6232_v27 = vpop.f32.mrb[72].mxu1 }
 0xbd5   : > { %v6322_v9 = vadd.f32 %v6321_v22, %v6232_v27  ;;  %v9047_v28 = vpop.f32.mrb[73].mxu1  ;;  %v9714_v27 = vld [vmem:[%s10613_s7 + $0x8] sm:$0xff]  }
 0xbd6   : > { %v6235_v30 = vpop.f32.mrb[74].mxu1  ;;  %v9716_v28 = vld [vmem:[%s10613_s7 + $0x18] sm:$0xff]  }
 0xbd7   : > { %v6325_v29 = vadd.f32 %v6324_v25, %v6235_v30  ;;  %v9048_v32 = vpop.f32.mrb[75].mxu1  ;;  %v9717_v30 = vld [vmem:[%s10613_s7 + $0x20] sm:$0xff]  }
 0xbd8   : > { %v9719_v32 = vld [vmem:[%s10613_s7 + $0x30] sm:$0xff]  }
 0xbed   : > { %v6547_v33 = vpop.f32.mrb[80].mxu0 }
 0xbee   : > { %v9107_v34 = vpop.f32.mrb[81].mxu0 }
 0xbef   : > { %v6550_v35 = vpop.f32.mrb[82].mxu0 }
 0xbf0   : > { %v9108_v36 = vpop.f32.mrb[83].mxu0 }
 0xbf4   : > { %v6430_v37 = vpop.f32.mrb[76].mxu1 }
 0xbf5   : > { %v6437_v38 = vadd.f32 %v6430_v37, %v6322_v9  ;;  %v9087_v39 = vpop.f32.mrb[77].mxu1  ;;  %v9715_v9 = vld [vmem:[%s10613_s7 + $0x10] sm:$0xff]  }
 0xbf6   : > { %v6433_v40 = vpop.f32.mrb[78].mxu1  ;;  %v7607_v39 = vld [vmem:[%s10612_s6] ss:$0 sm:$0xff] }
 0xbf7   : > { %v6438_v41 = vadd.f32 %v6433_v40, %v6325_v29  ;;  %v9088_v42 = vpop.f32.mrb[79].mxu1  ;;  %v6554_v31 = vadd.f32 %v6547_v33, %v6437_v38  ;;  %v9718_v29 = vld [vmem:[%s10613_s7 + $0x28] sm:$0xff]   ;;  %v9720_v33 = vld [vmem:[%s10613_s7 + $0x38] sm:$0xff]  }
 0xbf9   : > { %v6555_v43 = vadd.f32 %v6550_v35, %v6438_v41 }
 0xc14   : > { %v6658_v45 = vpop.f32.mrb[80].mxu1 }
 0xc15   : > { %v6665_v46 = vadd.f32 %v6658_v45, %v6554_v31  ;;  %v9127_v6 = vpop.f32.mrb[81].mxu1  ;;  %v7608_v45 = vld [vmem:[%s10614_s8] ss:$0 sm:$0xff] }
 0xc16   : > { %v6661_v47 = vpop.f32.mrb[82].mxu1 }
 0xc17   : > { %v6673_v48 = vadd.f32 %v7590_v44, %v6665_v46  ;;  %v6666_v49 = vadd.f32 %v6661_v47, %v6555_v43  ;;  %v9128_v50 = vpop.f32.mrb[83].mxu1 }
 0xc19   : > { %v6674_v51 = vadd.f32 %v7590_v44, %v6666_v49  ;;  %v6675_v52 = vmax.f32 %v6673_v48, 0.0 }
 0xc1b   : > { %v6676_v53 = vmax.f32 %v6674_v51, 0.0  ;;  %v6686_v56 = vmul.f32 %v6675_v52, %v6675_v52 }
 0xc1d   : > { %v6677_v54 = vsel %vm3519_vm5, %v6676_v53, 0.0  ;;  %v6687_v55 = vmul.f32 %v6676_v53, %v6676_v53 }
 0xc1e   : > { %v6678_v57 = vadd.f32 %v6677_v54, %v6675_v52 }
 0xc1f   : > { %v6688_v58 = vsel %vm3519_vm5, %v6687_v55, 0.0 }
 0xc20   : > { %v6679_v60 = vrot.slane %v6678_v57, 4  ;;  %v6689_v61 = vadd.f32 %v6688_v58, %v6686_v56 }
 0xc22   : > { %v6680_v62 = vadd.f32 %v6679_v60, %v6678_v57  ;;  %v6690_v63 = vrot.slane %v6689_v61, 4 }
 0xc24   : > { %v6681_v0 = vrot.slane %v6680_v62, 2  ;;  %v6691_v1 = vadd.f32 %v6690_v63, %v6689_v61 }
 0xc26   : > { %v6682_v2 = vadd.f32 %v6681_v0, %v6680_v62  ;;  %v6692_v3 = vrot.slane %v6691_v1, 2 }
 0xc28   : > { %v6683_v4 = vrot.slane %v6682_v2, 1  ;;  %v6693_v5 = vadd.f32 %v6692_v3, %v6691_v1 }
 0xc2a   : > { %v6684_v59 = vadd.f32 %v6683_v4, %v6682_v2  ;;  %v6694_v7 = vrot.slane %v6693_v5, 1 }
 0xc2c   : > { %v6697_v8 = vmul.f32 0.083333336, %v6684_v59  ;;  %v6695_v11 = vadd.f32 %v6694_v7, %v6693_v5 }
 0xc2e   : > { %v6698_v10 = vmul.f32 12.0, %v6697_v8  ;;  %6710 = vst [vmem:[#allocation3 + $0x1] sm:$0x1] %v6697_v8 }
 0xc30   : > { %v6699_v12 = vmul.f32 %v6698_v10, %v6697_v8 }
 0xc32   : > { %v6700_v14 = vsub.f32 %v6695_v11, %v6699_v12 }
 0xc34   : > { %v6701_v13 = vmul.f32 0.09090909, %v6700_v14 }
 0xc35   : > { %v6712_v15 = vld [vmem:[#allocation3] sm:$0x3] }
 0xc36   : > { %v6702_v16 = vmax.f32 %v6701_v13, 0.0  ;;  %v6713_v17 = vpack.c.bf16 %v6712_v15, %v6712_v15 }
 0xc38   : > { %9723 = vrsqrt.f32 %v6702_v16  ;;  %9166 = vmatmul.mubr.bf16.vlgmr.msra.gmra.mrb[84].mxu1 %v6713_v17  ;;  %vm6705_vm8 = vcmp.eq.f32.partialorder %v6702_v16, inf  ;;  %v6708_v20 = vand.u32 2147483648, %v6702_v16  ;;  %vm6707_vm9 = vcmp.eq.f32.partialorder %v6702_v16, 0.0 }
 0xc42   : > { %v9724_v18 = vpop.eup %9723 }
 0xc43   : > { %v6704_v19 = vmul.f32 %v9724_v18, %v6702_v16 }
 0xc45   : > { %v6706_v21 = vsel %vm6705_vm8, %v6702_v16, %v6704_v19 }
 0xc46   : > { %v6709_v22 = vsel %vm6707_vm9, %v6708_v20, %v6706_v21 }
 0xc47   : > { %6711 = vst [vmem:[#allocation4 + $0x1] sm:$0x1] %v6709_v22 }
 0xc4e   : > { %v6730_v23 = vld [vmem:[#allocation4] sm:$0x3] }
 0xc4f   : > { %v6731_v25 = vpack.c.bf16 %v6730_v23, %v6730_v23 }
 0xc51   : > { %9146 = vmatmul.mubr.bf16.vlgmr.msra.gmra.mrb[84].mxu0 %v6731_v25 }
 0xc52   : > { %9185 = vmatprep.mubr.msk.bf16.mxu0 %vm9858_vm4, %v9857_v24  ;;  %9170 = vmatpush3.bf16.msra.mxu0 %v9713_v26 }
 0xc53   : > { %9171 = vmatprep.subr.bf16.mxu0 %v9857_v24 }
 0xc56   : > { %9172 = vmatpush3.bf16.msra.mxu0 %v9714_v27 }
 0xc57   : > { %9173 = vmatprep.subr.bf16.mxu0 %v9857_v24 }
 0xc5a   : > { %9174 = vmatpush3.bf16.msra.mxu0 %v9715_v9 }
 0xc5b   : > { %9175 = vmatprep.subr.bf16.mxu0 %v9857_v24 }
 0xc5e   : > { %9176 = vmatpush3.bf16.msra.mxu0 %v9716_v28 }
 0xc5f   : > { %9177 = vmatprep.subr.bf16.mxu0 %v9857_v24 }
 0xc62   : > { %9178 = vmatpush3.bf16.msra.mxu0 %v9717_v30 }
 0xc63   : > { %9179 = vmatprep.subr.bf16.mxu0 %v9857_v24 }
 0xc66   : > { %9180 = vmatpush3.bf16.msra.mxu0 %v9718_v29 }
 0xc67   : > { %9181 = vmatprep.subr.bf16.mxu0 %v9857_v24 }
 0xc6a   : > { %9182 = vmatpush3.bf16.msra.mxu0 %v9719_v32 }
 0xc6b   : > { %9183 = vmatprep.subr.bf16.mxu0 %v9857_v24 }
 0xc6e   : > { %9184 = vmatpush3.bf16.msra.mxu0 %v9720_v33 }
 0xd0b   : > { %v6918_v34 = vpop.f32.mrb[84].mxu1 }
 0xd0c   : > { %v9167_v35 = vpop.f32.mrb[85].mxu1 }
 0xd0d   : > { %v6921_v36 = vpop.f32.mrb[86].mxu1 }
 0xd0e   : > { %v9168_v37 = vpop.f32.mrb[87].mxu1 }
 0xd24   : > { %v6830_v38 = vpop.f32.mrb[84].mxu0 }
 0xd25   : > { %v6919_v40 = vadd.f32 %v6918_v34, %v6830_v38  ;;  %v9147_v41 = vpop.f32.mrb[85].mxu0 }
 0xd26   : > { %v6833_v42 = vpop.f32.mrb[86].mxu0 }
 0xd27   : > { %v6931_v24 = vadd.f32 %v7607_v39, %v6919_v40  ;;  %v9148_v31 = vpop.f32.mrb[87].mxu0 }
 0xd29   : > { %v6932_v43 = vmax.f32 %v6931_v24, 0.0 }
 0xd2b   : > { %v6933_v44 = vpack.c.bf16 %v6932_v43, %v6932_v43 }
 0xd2d   : > { %9186 = vmatmul.mubr.bf16.vlgmr.msra.gmra.mrb[88].mxu0 %v6933_v44 }
 0xe00   : > { %v7039_v46 = vpop.f32.mrb[88].mxu0 }
 0xe01   : > { %v7040_v6 = vadd.f32 %v7608_v45, %v7039_v46  ;;  %v9187_v47 = vpop.f32.mrb[89].mxu0 }
 0xe02   : > { %v7042_v48 = vpop.f32.mrb[90].mxu0 }
 0xe03   : > { %7045 = vst [vmem:[%s358_s28] sm:$0x3] %v7040_v6  ;;  %v9188_v49 = vpop.f32.mrb[91].mxu0 }
 0xe04   : > { %9794 = shalt.err (!%p9791_p11)
}
 0xe05   : > { %s9795_s15 = scalar_lea.hbm %s10564_s17, 32  ;;  %s9799_s24 = scalar_lea.hbm %s10615_s9, 64 }
 0xe06   : > { %p9796_p13 = scmp.ne.s32.totalorder %s10564_s17, %s9795_s15  ;;  %p9800_p6 = scmp.lt.u32.totalorder %s10564_s17, %s10615_s9 }
 0xe07   : > { %p9801_p9 = scmp.lt.u32.totalorder %s9799_s24, %s9795_s15  ;;  %p9803_p12 = scmp.lt.u32.totalorder %s9795_s15, %s10564_s17 }
 0xe08   : > { %p9797_p5 = pnand %p9796_p13, %p10634_p1 }
 0xe09   : > { %p9802_p10 = por %p9801_p9, %p9800_p6 }
 0xe0a   : > { %p9798_p0 = pneg %p9797_p5 }
 0xe0b   : > { %p9804_p2 = por %p9803_p12, %p9802_p10 }
 0xe0d   : > { %p9805_p3 = pnand %p9804_p2, %p9798_p0 }
 0xe0f   : > { %9808 = shalt.err (!%p9805_p3)
}
 0xe10   : > { %9229 = dma.vmem_to_hbm [thread:$0]  (%p10634_p1), %s10566_s29, 32, %s10564_s17, %s7047_s22  }
 0xe11 PF: > { %p9246_p4 = scmp.ge.s32.totalorder %s9851_s12, 2  ;;  %s7072_s28 = sand.u32 1, %s9839_s30  }
 0xe12   : > { %p10635_p7 = scmp.ne.s32.totalorder %s10626_s20, 0  ;;  %s7073_s14 = scalar_lea.sflag [#allocation7], %s7072_s28 }
 0xe14   : > { %p9239_p8 = pnand %p9246_p4, %p10635_p7 }
 0xe16   : > { %9834 = dma.done.wait (!%p9239_p8), %s7073_s14, 32  }
 0xe17   : > { %9836 = vsyncadd (!%p9239_p8), %s7073_s14, 4294967264  ;;  %s10636_s12 = sld [smem:[#allocation15_spill]]  ;;  %s10637_s16 = sld [smem:[#allocation14_spill]] }
 0xe18   : > { %s10638_s11 = sld [smem:[#allocation16_spill]]  ;;  %s10639_s30 = smov %s9843_s10 }
 0xe1d   : > { %p21_p11 = scmp.ge.s32.totalorder %s10636_s12, 4   ;;  %s10640_s10 = smov %s10637_s16 }
 0xe1f   :  { %23 = sbr.rel (!%p21_p11) target bundleno = 5 (0x5), region = 128 }
 0xe26   :  { %7078 = vsyncpa [#allocation6], 1 }
 0xe27   :  { %7080 = vsyncpa [#allocation6 + $0x1], 1 }
 0xe28   :  { %7081 = vsyncpa [#allocation9], 1 }
 0xe29   :  { %7082 = vsyncpa [#allocation7], 1 }
 0xe2a   :  { %7084 = vsyncpa [#allocation7 + $0x1], 1 }

</bundles_post_ra>
